<compile_context>
chip_gen: v7x
topology: tpu7x:2x2x1
jax: 0.10.0
libtpu: 0.0.40
codegen_flags: <defaults>
</compile_context>

<pallas_src>
import jax
import jax.numpy as jnp
from jax import lax
from jax.experimental import pallas as pl
from jax.experimental.pallas import tpu as pltpu

NUM_CLASSES = 10
FC3_PAD = 128

# Static geometry (32x32x3 input, as implied by fc1 = Linear(64*4*4, 384)).
H0 = W0 = 32
C1_OH = 28                      # conv1 valid output height (32 - 5 + 1)
C1_OWP = 14                     # conv1 output width in column PAIRS (28 / 2)
C1_ROWS = C1_OH * C1_OWP        # 392 rows of the paired conv1 output
C1_K = 5 * 6 * 3                # 90 taps of the paired 5x6x3 union window
C1_K_PAD = 128                  # K padded to a full 128-lane contraction
C1_OUT2 = 128                   # 2 x 64 channels (even column | odd column)
P1_HW = 13                      # pool1 output is 13x13x64
P1_PAD_ROWS = 176               # flat pool1 rows incl. zero pad (>= 120 + 56)
C2_ROWS = 120                   # "wide" conv2 rows (covers flat idx 0..112)
C2_SHIFTS = tuple(di * P1_HW + dj for di in range(5) for dj in range(5))


# ----------------------------------------------------------------------------
# Fused kernel: whole AlexNet forward for one image (grid axis = batch)
# ----------------------------------------------------------------------------
def _alexnet_kernel(x_ref, w1_ref, b1_ref, w2_ref, b2_ref,
                    wf1_ref, bf1_ref, wf2_ref, bf2_ref, wf3_ref, bf3_ref,
                    o_ref, c1_ref, p1_ref, q_ref):
    f32 = jnp.float32

    # ---- conv1 + ReLU: one (392,128)x(128,128) MXU matmul --------------------
    # c1 row = oh*14 + jp ; lanes = [64ch @ col 2*jp | 64ch @ col 2*jp+1].
    h1 = jnp.dot(x_ref[0], w1_ref[...], preferred_element_type=f32)
    c1_ref[...] = jnp.maximum(h1 + b1_ref[...], 0.0)          # lane-dense store

    # ---- maxpool1 3x3 stride 2: 28x28x64 -> 13x13x64 (flat, 13-row pitch) ----
    for i in range(P1_HW):
        r0 = c1_ref[(2 * i + 0) * C1_OWP:(2 * i + 1) * C1_OWP, :]
        r1 = c1_ref[(2 * i + 1) * C1_OWP:(2 * i + 2) * C1_OWP, :]
        r2 = c1_ref[(2 * i + 2) * C1_OWP:(2 * i + 3) * C1_OWP, :]
        rm = jnp.maximum(jnp.maximum(r0, r1), r2)              # (14, 128)
        row = jnp.maximum(jnp.maximum(rm[0:13, 0:64], rm[0:13, 64:128]),
                          rm[1:14, 0:64])                      # (13, 64)
        p1_ref[i * P1_HW:(i + 1) * P1_HW, :] = row.astype(p1_ref.dtype)
    p1_ref[P1_HW * P1_HW:P1_PAD_ROWS, :] = jnp.zeros(
        (P1_PAD_ROWS - P1_HW * P1_HW, 64), p1_ref.dtype)

    # ---- conv2 + ReLU: tap-packed im2col, one (120,1600)x(1600,64) matmul ----
    taps = [p1_ref[s:s + C2_ROWS, :] for s in C2_SHIFTS]
    im2 = jnp.concatenate(taps, axis=1)                        # (120, 1600) bf16
    c2 = jnp.dot(im2, w2_ref[...], preferred_element_type=f32)
    c2 = jnp.maximum(c2 + b2_ref[...], 0.0)                    # (120, 64) "wide"

    # ---- maxpool2 3x3 stride 2: 9x9x64 (wide rows) -> 4x4x64, flattened ------
    # qq[r] = max over the 3-column window that starts at wide row r.
    qq = jnp.maximum(jnp.maximum(c2[0:118, :], c2[1:119, :]), c2[2:120, :])
    q_ref[0:118, :] = qq
    pieces = []
    for i in range(4):
        for j in range(4):
            r = 2 * i * P1_HW + 2 * j
            v = jnp.maximum(
                jnp.maximum(q_ref[r:r + 1, :],
                            q_ref[r + P1_HW:r + P1_HW + 1, :]),
                q_ref[r + 2 * P1_HW:r + 2 * P1_HW + 1, :])     # (1, 64)
            pieces.append(v)
    feats = jnp.concatenate(pieces, axis=1)                    # (1,1024), (h,w,c)

    # ---- fc1 -> ReLU -> fc2 -> ReLU -> fc3 (weights resident in VMEM) --------
    cdt = wf1_ref.dtype
    h = jnp.dot(feats.astype(cdt), wf1_ref[...], preferred_element_type=f32)
    h = jnp.maximum(h + bf1_ref[...], 0.0)
    h = jnp.dot(h.astype(cdt), wf2_ref[...], preferred_element_type=f32)
    h = jnp.maximum(h + bf2_ref[...], 0.0)
    o = jnp.dot(h.astype(cdt), wf3_ref[...], preferred_element_type=f32)
    o_ref[0] = (o + bf3_ref[...]).astype(o_ref.dtype)          # (1, 128) dense


# ----------------------------------------------------------------------------
# pallas_call wrapper
# ----------------------------------------------------------------------------
def alexnet_fused(x_col, p):
    n = x_col.shape[0]

    def resident(arr):
        nd = arr.ndim
        return pl.BlockSpec(arr.shape, lambda i, _n=nd: (0,) * _n)

    weights = (p["conv1_w"], p["conv1_b"], p["conv2_w"], p["conv2_b"],
               p["fc1_w"], p["fc1_b"], p["fc2_w"], p["fc2_b"],
               p["fc3_w"], p["fc3_b"])

    return pl.pallas_call(
        _alexnet_kernel,
        grid=(n,),
        in_specs=[pl.BlockSpec((1, C1_ROWS, C1_K_PAD), lambda i: (i, 0, 0))]
                 + [resident(w) for w in weights],
        out_specs=pl.BlockSpec((1, 1, FC3_PAD), lambda i: (i, 0, 0)),
        out_shape=jax.ShapeDtypeStruct((n, 1, FC3_PAD), jnp.float32),
        scratch_shapes=[
            pltpu.VMEM((C1_ROWS, C1_OUT2), jnp.float32),       # conv1 output
            pltpu.VMEM((P1_PAD_ROWS, 64), jnp.bfloat16),       # pool1, zero-padded
            pltpu.VMEM((C2_ROWS, 64), jnp.float32),            # pool2 column maxes
        ],
        compiler_params=pltpu.CompilerParams(
            dimension_semantics=("parallel",),                 # v7x: both cores
            vmem_limit_bytes=32 * 1024 * 1024,
        ),
    )(x_col, *weights)


def _conv1_im2col(x_nchw):
    """Paired-column conv1 im2col: (N,3,32,32) f32 -> (N, 392, 128) bf16."""
    n = x_nchw.shape[0]
    xh = jnp.transpose(x_nchw, (0, 2, 3, 1))                   # (N, 32, 32, 3)
    pieces = []
    for di in range(5):
        for dj in range(6):                                    # 5x6 union window
            pieces.append(xh[:, di:di + C1_OH, dj:dj + 2 * C1_OWP - 1:2, :])
    col = jnp.concatenate(pieces, axis=-1)                     # (N, 28, 14, 90)
    col = jnp.pad(col, ((0, 0), (0, 0), (0, 0), (0, C1_K_PAD - C1_K)))
    return col.reshape(n, C1_ROWS, C1_K_PAD).astype(jnp.bfloat16)


@jax.jit
def alexnet_forward(params, x):
    n, c, h, w = x.shape
    assert (c, h, w) == (3, H0, W0), "fc1 fan-in (64*4*4) implies 3x32x32 inputs"
    logits = alexnet_fused(_conv1_im2col(x), params)
    return logits.reshape(n, FC3_PAD)[:, :NUM_CLASSES]


# ----------------------------------------------------------------------------
# Parameters (PyTorch layouts + one-time kernel-friendly conversion)
# ----------------------------------------------------------------------------
def init_torch_params(key):
    ks = jax.random.split(key, 10)

    def rnd(k, shape, fan_in):
        return jax.random.normal(k, shape, jnp.float32) / jnp.sqrt(jnp.float32(fan_in))

    return {
        "conv1_w": rnd(ks[0], (64, 3, 5, 5), 3 * 5 * 5),
        "conv1_b": rnd(ks[1], (64,), 3 * 5 * 5),
        "conv2_w": rnd(ks[2], (64, 64, 5, 5), 64 * 5 * 5),
        "conv2_b": rnd(ks[3], (64,), 64 * 5 * 5),
        "fc1_w": rnd(ks[4], (384, 64 * 4 * 4), 64 * 4 * 4),
        "fc1_b": rnd(ks[5], (384,), 64 * 4 * 4),
        "fc2_w": rnd(ks[6], (192, 384), 384),
        "fc2_b": rnd(ks[7], (192,), 384),
        "fc3_w": rnd(ks[8], (10, 192), 192),
        "fc3_b": rnd(ks[9], (10,), 192),
    }


def prepare_params(tp, compute_dtype=jnp.bfloat16):
    """One-time conversion: paired conv1 weight, tap-major conv2 weight, (in,out)
    fc weights (fc1 permuted from CHW- to HWC-flatten order), padded fc3."""
    # conv1: (out, in, kh, kw) -> (kh, kw, in, out), then pack [even | odd] columns.
    w1 = jnp.transpose(tp["conv1_w"], (2, 3, 1, 0))            # (5, 5, 3, 64)
    w1_even = jnp.pad(w1, ((0, 0), (0, 1), (0, 0), (0, 0)))    # dj slot 5 is zero
    w1_odd = jnp.pad(w1, ((0, 0), (1, 0), (0, 0), (0, 0)))     # dj slot 0 is zero
    w1p = jnp.concatenate([w1_even.reshape(C1_K, 64),
                           w1_odd.reshape(C1_K, 64)], axis=1)  # (90, 128)
    w1p = jnp.pad(w1p, ((0, C1_K_PAD - C1_K), (0, 0)))         # (128, 128)
    b1d = jnp.concatenate([tp["conv1_b"], tp["conv1_b"]]).reshape(1, C1_OUT2)

    # conv2: tap-major (di, dj, c) rows x co columns -> (1600, 64)
    w2 = jnp.transpose(tp["conv2_w"], (2, 3, 1, 0)).reshape(25 * 64, 64)

    # fc1: permute the 1024 inputs from CHW- to HWC-flatten order.
    fc1 = tp["fc1_w"].reshape(384, 64, 4, 4).transpose(2, 3, 1, 0).reshape(1024, 384)
    w3 = jnp.pad(tp["fc3_w"].T, ((0, 0), (0, FC3_PAD - NUM_CLASSES)))
    b3 = jnp.pad(tp["fc3_b"], (0, FC3_PAD - NUM_CLASSES))

    return {
        "conv1_w": w1p.astype(compute_dtype),
        "conv1_b": b1d.astype(jnp.float32),
        "conv2_w": w2.astype(compute_dtype),
        "conv2_b": tp["conv2_b"].reshape(1, -1).astype(jnp.float32),
        "fc1_w": fc1.astype(compute_dtype),
        "fc1_b": tp["fc1_b"].reshape(1, -1).astype(jnp.float32),
        "fc2_w": tp["fc2_w"].T.astype(compute_dtype),
        "fc2_b": tp["fc2_b"].reshape(1, -1).astype(jnp.float32),
        "fc3_w": w3.astype(compute_dtype),
        "fc3_b": b3.reshape(1, -1).astype(jnp.float32),
    }


# ----------------------------------------------------------------------------
# Pure-JAX f32 NCHW reference (mirrors the PyTorch module exactly)
# ----------------------------------------------------------------------------
def reference_forward(tp, x):
    def conv(x, w, b):
        y = lax.conv_general_dilated(x, w, (1, 1), "VALID",
                                     dimension_numbers=("NCHW", "OIHW", "NCHW"))
        return jnp.maximum(y + b.reshape(1, -1, 1, 1), 0.0)

    def pool(x):
        return lax.reduce_window(x, -jnp.inf, lax.max,
                                 (1, 1, 3, 3), (1, 1, 2, 2), "VALID")

    x = pool(conv(x, tp["conv1_w"], tp["conv1_b"]))
    x = pool(conv(x, tp["conv2_w"], tp["conv2_b"]))
    x = x.reshape(x.shape[0], -1)
    x = jnp.maximum(x @ tp["fc1_w"].T + tp["fc1_b"], 0.0)
    x = jnp.maximum(x @ tp["fc2_w"].T + tp["fc2_b"], 0.0)
    return x @ tp["fc3_w"].T + tp["fc3_b"]


if __name__ == "__main__":
    key = jax.random.PRNGKey(0)
    pkey, xkey = jax.random.split(key)
    torch_params = init_torch_params(pkey)
    params = prepare_params(torch_params)
    # Input must be (N, 3, 32, 32) so the flatten matches fc1's 64*4*4 fan-in.
    x = jax.random.normal(xkey, (2, 3, 32, 32), jnp.float32)

    out = jax.block_until_ready(alexnet_forward(params, x))
    assert out.shape == (2, NUM_CLASSES), out.shape
    assert out.dtype == jnp.float32

    ref = reference_forward(torch_params, x)
    max_err = float(jnp.max(jnp.abs(out - ref)))
    assert jnp.allclose(out, ref, rtol=1e-1, atol=1e-1), max_err  # bf16 MXU tol
    print("KERNEL_OK")
</pallas_src>

<mosaic_0001>
module attributes {stable_mosaic.version = 11 : i64} {
  func.func @_alexnet_kernel(%arg0: i32, %arg1: memref<1x392x128xbf16, #tpu.memory_space<vmem>>, %arg2: memref<128x128xbf16, #tpu.memory_space<vmem>>, %arg3: memref<1x128xf32, #tpu.memory_space<vmem>>, %arg4: memref<1600x64xbf16, #tpu.memory_space<vmem>>, %arg5: memref<1x64xf32, #tpu.memory_space<vmem>>, %arg6: memref<1024x384xbf16, #tpu.memory_space<vmem>>, %arg7: memref<1x384xf32, #tpu.memory_space<vmem>>, %arg8: memref<384x192xbf16, #tpu.memory_space<vmem>>, %arg9: memref<1x192xf32, #tpu.memory_space<vmem>>, %arg10: memref<192x128xbf16, #tpu.memory_space<vmem>>, %arg11: memref<1x128xf32, #tpu.memory_space<vmem>>, %arg12: memref<1x1x128xf32, #tpu.memory_space<vmem>>, %arg13: memref<392x128xf32, #tpu.memory_space<vmem>>, %arg14: memref<176x64xbf16, #tpu.memory_space<vmem>>, %arg15: memref<120x64xf32, #tpu.memory_space<vmem>>) attributes {dimension_semantics = [#tpu.dimension_semantics<parallel>], iteration_bounds = array<i64: 2>, scalar_prefetch = 0 : i64, scratch_operands = 3 : i64, tpu.core_type = #tpu.core_type<tc>, window_params = [{transform_indices = @transform_0, window_bounds = array<i64: 1, 392, 128>}, {pipeline_mode = #tpu.pipeline_mode<synchronous>, transform_indices = @transform_1, window_bounds = array<i64: 128, 128>}, {pipeline_mode = #tpu.pipeline_mode<synchronous>, transform_indices = @transform_2, window_bounds = array<i64: 1, 128>}, {pipeline_mode = #tpu.pipeline_mode<synchronous>, transform_indices = @transform_3, window_bounds = array<i64: 1600, 64>}, {pipeline_mode = #tpu.pipeline_mode<synchronous>, transform_indices = @transform_4, window_bounds = array<i64: 1, 64>}, {pipeline_mode = #tpu.pipeline_mode<synchronous>, transform_indices = @transform_5, window_bounds = array<i64: 1024, 384>}, {pipeline_mode = #tpu.pipeline_mode<synchronous>, transform_indices = @transform_6, window_bounds = array<i64: 1, 384>}, {pipeline_mode = #tpu.pipeline_mode<synchronous>, transform_indices = @transform_7, window_bounds = array<i64: 384, 192>}, {pipeline_mode = #tpu.pipeline_mode<synchronous>, transform_indices = @transform_8, window_bounds = array<i64: 1, 192>}, {pipeline_mode = #tpu.pipeline_mode<synchronous>, transform_indices = @transform_9, window_bounds = array<i64: 192, 128>}, {pipeline_mode = #tpu.pipeline_mode<synchronous>, transform_indices = @transform_10, window_bounds = array<i64: 1, 128>}, {transform_indices = @transform_11, window_bounds = array<i64: 1, 1, 128>}]} {
    %c0 = arith.constant 0 : index
    %c0_0 = arith.constant 0 : index
    %c0_1 = arith.constant 0 : index
    %0 = vector.load %arg1[%c0, %c0_0, %c0_1] : memref<1x392x128xbf16, #tpu.memory_space<vmem>>, vector<1x392x128xbf16>
    %1 = vector.shape_cast %0 : vector<1x392x128xbf16> to vector<392x128xbf16>
    %c0_2 = arith.constant 0 : index
    %c0_3 = arith.constant 0 : index
    %2 = vector.load %arg2[%c0_2, %c0_3] : memref<128x128xbf16, #tpu.memory_space<vmem>>, vector<128x128xbf16>
    %cst = arith.constant dense<0.000000e+00> : vector<392x128xf32>
    %3 = tpu.matmul %1, %2, %cst {dimension_numbers = #tpu.dot_dimension_numbers<[1], [0], [0], [1], [0, 0, 1, 1], [], []>} : vector<392x128xbf16>, vector<128x128xbf16>, vector<392x128xf32> -> vector<392x128xf32>
    %c0_4 = arith.constant 0 : index
    %c0_5 = arith.constant 0 : index
    %4 = vector.load %arg3[%c0_4, %c0_5] : memref<1x128xf32, #tpu.memory_space<vmem>>, vector<1x128xf32>
    %5 = vector.broadcast %4 : vector<1x128xf32> to vector<392x128xf32>
    %6 = arith.addf %3, %5 : vector<392x128xf32>
    %cst_6 = arith.constant 0.000000e+00 : f32
    %7 = vector.broadcast %cst_6 : f32 to vector<392x128xf32>
    %8 = arith.maximumf %6, %7 : vector<392x128xf32>
    %c0_7 = arith.constant 0 : index
    %c0_8 = arith.constant 0 : index
    %9 = vector.load %arg13[%c0_7, %c0_8] : memref<392x128xf32, #tpu.memory_space<vmem>>, vector<392x128xf32>
    tpu.vector_store %arg13[%c0_7, %c0_8], %8 {strides = array<i32>} : memref<392x128xf32, #tpu.memory_space<vmem>>, vector<392x128xf32>,
    %c0_9 = arith.constant 0 : index
    %c0_10 = arith.constant 0 : index
    %10 = vector.load %arg13[%c0_9, %c0_10] : memref<392x128xf32, #tpu.memory_space<vmem>>, vector<14x128xf32>
    %c14 = arith.constant 14 : index
    %c0_11 = arith.constant 0 : index
    %11 = vector.load %arg13[%c14, %c0_11] : memref<392x128xf32, #tpu.memory_space<vmem>>, vector<14x128xf32>
    %c28 = arith.constant 28 : index
    %c0_12 = arith.constant 0 : index
    %12 = vector.load %arg13[%c28, %c0_12] : memref<392x128xf32, #tpu.memory_space<vmem>>, vector<14x128xf32>
    %13 = arith.maximumf %10, %11 : vector<14x128xf32>
    %14 = arith.maximumf %13, %12 : vector<14x128xf32>
    %15 = vector.extract_strided_slice %14 {offsets = [0, 0], sizes = [13, 64], strides = [1, 1]} : vector<14x128xf32> to vector<13x64xf32>
    %16 = vector.extract_strided_slice %14 {offsets = [0, 64], sizes = [13, 64], strides = [1, 1]} : vector<14x128xf32> to vector<13x64xf32>
    %17 = arith.maximumf %15, %16 : vector<13x64xf32>
    %18 = vector.extract_strided_slice %14 {offsets = [1, 0], sizes = [13, 64], strides = [1, 1]} : vector<14x128xf32> to vector<13x64xf32>
    %19 = arith.maximumf %17, %18 : vector<13x64xf32>
    %20 = arith.truncf %19 : vector<13x64xf32> to vector<13x64xbf16>
    %c0_13 = arith.constant 0 : index
    %c0_14 = arith.constant 0 : index
    %21 = vector.load %arg14[%c0_13, %c0_14] : memref<176x64xbf16, #tpu.memory_space<vmem>>, vector<13x64xbf16>
    tpu.vector_store %arg14[%c0_13, %c0_14], %20 {strides = array<i32>} : memref<176x64xbf16, #tpu.memory_space<vmem>>, vector<13x64xbf16>,
    %c28_15 = arith.constant 28 : index
    %c0_16 = arith.constant 0 : index
    %22 = vector.load %arg13[%c28_15, %c0_16] : memref<392x128xf32, #tpu.memory_space<vmem>>, vector<14x128xf32>
    %c42 = arith.constant 42 : index
    %c0_17 = arith.constant 0 : index
    %23 = vector.load %arg13[%c42, %c0_17] : memref<392x128xf32, #tpu.memory_space<vmem>>, vector<14x128xf32>
    %c56 = arith.constant 56 : index
    %c0_18 = arith.constant 0 : index
    %24 = vector.load %arg13[%c56, %c0_18] : memref<392x128xf32, #tpu.memory_space<vmem>>, vector<14x128xf32>
    %25 = arith.maximumf %22, %23 : vector<14x128xf32>
    %26 = arith.maximumf %25, %24 : vector<14x128xf32>
    %27 = vector.extract_strided_slice %26 {offsets = [0, 0], sizes = [13, 64], strides = [1, 1]} : vector<14x128xf32> to vector<13x64xf32>
    %28 = vector.extract_strided_slice %26 {offsets = [0, 64], sizes = [13, 64], strides = [1, 1]} : vector<14x128xf32> to vector<13x64xf32>
    %29 = arith.maximumf %27, %28 : vector<13x64xf32>
    %30 = vector.extract_strided_slice %26 {offsets = [1, 0], sizes = [13, 64], strides = [1, 1]} : vector<14x128xf32> to vector<13x64xf32>
    %31 = arith.maximumf %29, %30 : vector<13x64xf32>
    %32 = arith.truncf %31 : vector<13x64xf32> to vector<13x64xbf16>
    %c13 = arith.constant 13 : index
    %c0_19 = arith.constant 0 : index
    %33 = vector.load %arg14[%c13, %c0_19] : memref<176x64xbf16, #tpu.memory_space<vmem>>, vector<13x64xbf16>
    tpu.vector_store %arg14[%c13, %c0_19], %32 {strides = array<i32>} : memref<176x64xbf16, #tpu.memory_space<vmem>>, vector<13x64xbf16>,
    %c56_20 = arith.constant 56 : index
    %c0_21 = arith.constant 0 : index
    %34 = vector.load %arg13[%c56_20, %c0_21] : memref<392x128xf32, #tpu.memory_space<vmem>>, vector<14x128xf32>
    %c70 = arith.constant 70 : index
    %c0_22 = arith.constant 0 : index
    %35 = vector.load %arg13[%c70, %c0_22] : memref<392x128xf32, #tpu.memory_space<vmem>>, vector<14x128xf32>
    %c84 = arith.constant 84 : index
    %c0_23 = arith.constant 0 : index
    %36 = vector.load %arg13[%c84, %c0_23] : memref<392x128xf32, #tpu.memory_space<vmem>>, vector<14x128xf32>
    %37 = arith.maximumf %34, %35 : vector<14x128xf32>
    %38 = arith.maximumf %37, %36 : vector<14x128xf32>
    %39 = vector.extract_strided_slice %38 {offsets = [0, 0], sizes = [13, 64], strides = [1, 1]} : vector<14x128xf32> to vector<13x64xf32>
    %40 = vector.extract_strided_slice %38 {offsets = [0, 64], sizes = [13, 64], strides = [1, 1]} : vector<14x128xf32> to vector<13x64xf32>
    %41 = arith.maximumf %39, %40 : vector<13x64xf32>
    %42 = vector.extract_strided_slice %38 {offsets = [1, 0], sizes = [13, 64], strides = [1, 1]} : vector<14x128xf32> to vector<13x64xf32>
    %43 = arith.maximumf %41, %42 : vector<13x64xf32>
    %44 = arith.truncf %43 : vector<13x64xf32> to vector<13x64xbf16>
    %c26 = arith.constant 26 : index
    %c0_24 = arith.constant 0 : index
    %45 = vector.load %arg14[%c26, %c0_24] : memref<176x64xbf16, #tpu.memory_space<vmem>>, vector<13x64xbf16>
    tpu.vector_store %arg14[%c26, %c0_24], %44 {strides = array<i32>} : memref<176x64xbf16, #tpu.memory_space<vmem>>, vector<13x64xbf16>,
    %c84_25 = arith.constant 84 : index
    %c0_26 = arith.constant 0 : index
    %46 = vector.load %arg13[%c84_25, %c0_26] : memref<392x128xf32, #tpu.memory_space<vmem>>, vector<14x128xf32>
    %c98 = arith.constant 98 : index
    %c0_27 = arith.constant 0 : index
    %47 = vector.load %arg13[%c98, %c0_27] : memref<392x128xf32, #tpu.memory_space<vmem>>, vector<14x128xf32>
    %c112 = arith.constant 112 : index
    %c0_28 = arith.constant 0 : index
    %48 = vector.load %arg13[%c112, %c0_28] : memref<392x128xf32, #tpu.memory_space<vmem>>, vector<14x128xf32>
    %49 = arith.maximumf %46, %47 : vector<14x128xf32>
    %50 = arith.maximumf %49, %48 : vector<14x128xf32>
    %51 = vector.extract_strided_slice %50 {offsets = [0, 0], sizes = [13, 64], strides = [1, 1]} : vector<14x128xf32> to vector<13x64xf32>
    %52 = vector.extract_strided_slice %50 {offsets = [0, 64], sizes = [13, 64], strides = [1, 1]} : vector<14x128xf32> to vector<13x64xf32>
    %53 = arith.maximumf %51, %52 : vector<13x64xf32>
    %54 = vector.extract_strided_slice %50 {offsets = [1, 0], sizes = [13, 64], strides = [1, 1]} : vector<14x128xf32> to vector<13x64xf32>
    %55 = arith.maximumf %53, %54 : vector<13x64xf32>
    %56 = arith.truncf %55 : vector<13x64xf32> to vector<13x64xbf16>
    %c39 = arith.constant 39 : index
    %c0_29 = arith.constant 0 : index
    %57 = vector.load %arg14[%c39, %c0_29] : memref<176x64xbf16, #tpu.memory_space<vmem>>, vector<13x64xbf16>
    tpu.vector_store %arg14[%c39, %c0_29], %56 {strides = array<i32>} : memref<176x64xbf16, #tpu.memory_space<vmem>>, vector<13x64xbf16>,
    %c112_30 = arith.constant 112 : index
    %c0_31 = arith.constant 0 : index
    %58 = vector.load %arg13[%c112_30, %c0_31] : memref<392x128xf32, #tpu.memory_space<vmem>>, vector<14x128xf32>
    %c126 = arith.constant 126 : index
    %c0_32 = arith.constant 0 : index
    %59 = vector.load %arg13[%c126, %c0_32] : memref<392x128xf32, #tpu.memory_space<vmem>>, vector<14x128xf32>
    %c140 = arith.constant 140 : index
    %c0_33 = arith.constant 0 : index
    %60 = vector.load %arg13[%c140, %c0_33] : memref<392x128xf32, #tpu.memory_space<vmem>>, vector<14x128xf32>
    %61 = arith.maximumf %58, %59 : vector<14x128xf32>
    %62 = arith.maximumf %61, %60 : vector<14x128xf32>
    %63 = vector.extract_strided_slice %62 {offsets = [0, 0], sizes = [13, 64], strides = [1, 1]} : vector<14x128xf32> to vector<13x64xf32>
    %64 = vector.extract_strided_slice %62 {offsets = [0, 64], sizes = [13, 64], strides = [1, 1]} : vector<14x128xf32> to vector<13x64xf32>
    %65 = arith.maximumf %63, %64 : vector<13x64xf32>
    %66 = vector.extract_strided_slice %62 {offsets = [1, 0], sizes = [13, 64], strides = [1, 1]} : vector<14x128xf32> to vector<13x64xf32>
    %67 = arith.maximumf %65, %66 : vector<13x64xf32>
    %68 = arith.truncf %67 : vector<13x64xf32> to vector<13x64xbf16>
    %c52 = arith.constant 52 : index
    %c0_34 = arith.constant 0 : index
    %69 = vector.load %arg14[%c52, %c0_34] : memref<176x64xbf16, #tpu.memory_space<vmem>>, vector<13x64xbf16>
    tpu.vector_store %arg14[%c52, %c0_34], %68 {strides = array<i32>} : memref<176x64xbf16, #tpu.memory_space<vmem>>, vector<13x64xbf16>,
    %c140_35 = arith.constant 140 : index
    %c0_36 = arith.constant 0 : index
    %70 = vector.load %arg13[%c140_35, %c0_36] : memref<392x128xf32, #tpu.memory_space<vmem>>, vector<14x128xf32>
    %c154 = arith.constant 154 : index
    %c0_37 = arith.constant 0 : index
    %71 = vector.load %arg13[%c154, %c0_37] : memref<392x128xf32, #tpu.memory_space<vmem>>, vector<14x128xf32>
    %c168 = arith.constant 168 : index
    %c0_38 = arith.constant 0 : index
    %72 = vector.load %arg13[%c168, %c0_38] : memref<392x128xf32, #tpu.memory_space<vmem>>, vector<14x128xf32>
    %73 = arith.maximumf %70, %71 : vector<14x128xf32>
    %74 = arith.maximumf %73, %72 : vector<14x128xf32>
    %75 = vector.extract_strided_slice %74 {offsets = [0, 0], sizes = [13, 64], strides = [1, 1]} : vector<14x128xf32> to vector<13x64xf32>
    %76 = vector.extract_strided_slice %74 {offsets = [0, 64], sizes = [13, 64], strides = [1, 1]} : vector<14x128xf32> to vector<13x64xf32>
    %77 = arith.maximumf %75, %76 : vector<13x64xf32>
    %78 = vector.extract_strided_slice %74 {offsets = [1, 0], sizes = [13, 64], strides = [1, 1]} : vector<14x128xf32> to vector<13x64xf32>
    %79 = arith.maximumf %77, %78 : vector<13x64xf32>
    %80 = arith.truncf %79 : vector<13x64xf32> to vector<13x64xbf16>
    %c65 = arith.constant 65 : index
    %c0_39 = arith.constant 0 : index
    %81 = vector.load %arg14[%c65, %c0_39] : memref<176x64xbf16, #tpu.memory_space<vmem>>, vector<13x64xbf16>
    tpu.vector_store %arg14[%c65, %c0_39], %80 {strides = array<i32>} : memref<176x64xbf16, #tpu.memory_space<vmem>>, vector<13x64xbf16>,
    %c168_40 = arith.constant 168 : index
    %c0_41 = arith.constant 0 : index
    %82 = vector.load %arg13[%c168_40, %c0_41] : memref<392x128xf32, #tpu.memory_space<vmem>>, vector<14x128xf32>
    %c182 = arith.constant 182 : index
    %c0_42 = arith.constant 0 : index
    %83 = vector.load %arg13[%c182, %c0_42] : memref<392x128xf32, #tpu.memory_space<vmem>>, vector<14x128xf32>
    %c196 = arith.constant 196 : index
    %c0_43 = arith.constant 0 : index
    %84 = vector.load %arg13[%c196, %c0_43] : memref<392x128xf32, #tpu.memory_space<vmem>>, vector<14x128xf32>
    %85 = arith.maximumf %82, %83 : vector<14x128xf32>
    %86 = arith.maximumf %85, %84 : vector<14x128xf32>
    %87 = vector.extract_strided_slice %86 {offsets = [0, 0], sizes = [13, 64], strides = [1, 1]} : vector<14x128xf32> to vector<13x64xf32>
    %88 = vector.extract_strided_slice %86 {offsets = [0, 64], sizes = [13, 64], strides = [1, 1]} : vector<14x128xf32> to vector<13x64xf32>
    %89 = arith.maximumf %87, %88 : vector<13x64xf32>
    %90 = vector.extract_strided_slice %86 {offsets = [1, 0], sizes = [13, 64], strides = [1, 1]} : vector<14x128xf32> to vector<13x64xf32>
    %91 = arith.maximumf %89, %90 : vector<13x64xf32>
    %92 = arith.truncf %91 : vector<13x64xf32> to vector<13x64xbf16>
    %c78 = arith.constant 78 : index
    %c0_44 = arith.constant 0 : index
    %93 = vector.load %arg14[%c78, %c0_44] : memref<176x64xbf16, #tpu.memory_space<vmem>>, vector<13x64xbf16>
    tpu.vector_store %arg14[%c78, %c0_44], %92 {strides = array<i32>} : memref<176x64xbf16, #tpu.memory_space<vmem>>, vector<13x64xbf16>,
    %c196_45 = arith.constant 196 : index
    %c0_46 = arith.constant 0 : index
    %94 = vector.load %arg13[%c196_45, %c0_46] : memref<392x128xf32, #tpu.memory_space<vmem>>, vector<14x128xf32>
    %c210 = arith.constant 210 : index
    %c0_47 = arith.constant 0 : index
    %95 = vector.load %arg13[%c210, %c0_47] : memref<392x128xf32, #tpu.memory_space<vmem>>, vector<14x128xf32>
    %c224 = arith.constant 224 : index
    %c0_48 = arith.constant 0 : index
    %96 = vector.load %arg13[%c224, %c0_48] : memref<392x128xf32, #tpu.memory_space<vmem>>, vector<14x128xf32>
    %97 = arith.maximumf %94, %95 : vector<14x128xf32>
    %98 = arith.maximumf %97, %96 : vector<14x128xf32>
    %99 = vector.extract_strided_slice %98 {offsets = [0, 0], sizes = [13, 64], strides = [1, 1]} : vector<14x128xf32> to vector<13x64xf32>
    %100 = vector.extract_strided_slice %98 {offsets = [0, 64], sizes = [13, 64], strides = [1, 1]} : vector<14x128xf32> to vector<13x64xf32>
    %101 = arith.maximumf %99, %100 : vector<13x64xf32>
    %102 = vector.extract_strided_slice %98 {offsets = [1, 0], sizes = [13, 64], strides = [1, 1]} : vector<14x128xf32> to vector<13x64xf32>
    %103 = arith.maximumf %101, %102 : vector<13x64xf32>
    %104 = arith.truncf %103 : vector<13x64xf32> to vector<13x64xbf16>
    %c91 = arith.constant 91 : index
    %c0_49 = arith.constant 0 : index
    %105 = vector.load %arg14[%c91, %c0_49] : memref<176x64xbf16, #tpu.memory_space<vmem>>, vector<13x64xbf16>
    tpu.vector_store %arg14[%c91, %c0_49], %104 {strides = array<i32>} : memref<176x64xbf16, #tpu.memory_space<vmem>>, vector<13x64xbf16>,
    %c224_50 = arith.constant 224 : index
    %c0_51 = arith.constant 0 : index
    %106 = vector.load %arg13[%c224_50, %c0_51] : memref<392x128xf32, #tpu.memory_space<vmem>>, vector<14x128xf32>
    %c238 = arith.constant 238 : index
    %c0_52 = arith.constant 0 : index
    %107 = vector.load %arg13[%c238, %c0_52] : memref<392x128xf32, #tpu.memory_space<vmem>>, vector<14x128xf32>
    %c252 = arith.constant 252 : index
    %c0_53 = arith.constant 0 : index
    %108 = vector.load %arg13[%c252, %c0_53] : memref<392x128xf32, #tpu.memory_space<vmem>>, vector<14x128xf32>
    %109 = arith.maximumf %106, %107 : vector<14x128xf32>
    %110 = arith.maximumf %109, %108 : vector<14x128xf32>
    %111 = vector.extract_strided_slice %110 {offsets = [0, 0], sizes = [13, 64], strides = [1, 1]} : vector<14x128xf32> to vector<13x64xf32>
    %112 = vector.extract_strided_slice %110 {offsets = [0, 64], sizes = [13, 64], strides = [1, 1]} : vector<14x128xf32> to vector<13x64xf32>
    %113 = arith.maximumf %111, %112 : vector<13x64xf32>
    %114 = vector.extract_strided_slice %110 {offsets = [1, 0], sizes = [13, 64], strides = [1, 1]} : vector<14x128xf32> to vector<13x64xf32>
    %115 = arith.maximumf %113, %114 : vector<13x64xf32>
    %116 = arith.truncf %115 : vector<13x64xf32> to vector<13x64xbf16>
    %c104 = arith.constant 104 : index
    %c0_54 = arith.constant 0 : index
    %117 = vector.load %arg14[%c104, %c0_54] : memref<176x64xbf16, #tpu.memory_space<vmem>>, vector<13x64xbf16>
    tpu.vector_store %arg14[%c104, %c0_54], %116 {strides = array<i32>} : memref<176x64xbf16, #tpu.memory_space<vmem>>, vector<13x64xbf16>,
    %c252_55 = arith.constant 252 : index
    %c0_56 = arith.constant 0 : index
    %118 = vector.load %arg13[%c252_55, %c0_56] : memref<392x128xf32, #tpu.memory_space<vmem>>, vector<14x128xf32>
    %c266 = arith.constant 266 : index
    %c0_57 = arith.constant 0 : index
    %119 = vector.load %arg13[%c266, %c0_57] : memref<392x128xf32, #tpu.memory_space<vmem>>, vector<14x128xf32>
    %c280 = arith.constant 280 : index
    %c0_58 = arith.constant 0 : index
    %120 = vector.load %arg13[%c280, %c0_58] : memref<392x128xf32, #tpu.memory_space<vmem>>, vector<14x128xf32>
    %121 = arith.maximumf %118, %119 : vector<14x128xf32>
    %122 = arith.maximumf %121, %120 : vector<14x128xf32>
    %123 = vector.extract_strided_slice %122 {offsets = [0, 0], sizes = [13, 64], strides = [1, 1]} : vector<14x128xf32> to vector<13x64xf32>
    %124 = vector.extract_strided_slice %122 {offsets = [0, 64], sizes = [13, 64], strides = [1, 1]} : vector<14x128xf32> to vector<13x64xf32>
    %125 = arith.maximumf %123, %124 : vector<13x64xf32>
    %126 = vector.extract_strided_slice %122 {offsets = [1, 0], sizes = [13, 64], strides = [1, 1]} : vector<14x128xf32> to vector<13x64xf32>
    %127 = arith.maximumf %125, %126 : vector<13x64xf32>
    %128 = arith.truncf %127 : vector<13x64xf32> to vector<13x64xbf16>
    %c117 = arith.constant 117 : index
    %c0_59 = arith.constant 0 : index
    %129 = vector.load %arg14[%c117, %c0_59] : memref<176x64xbf16, #tpu.memory_space<vmem>>, vector<13x64xbf16>
    tpu.vector_store %arg14[%c117, %c0_59], %128 {strides = array<i32>} : memref<176x64xbf16, #tpu.memory_space<vmem>>, vector<13x64xbf16>,
    %c280_60 = arith.constant 280 : index
    %c0_61 = arith.constant 0 : index
    %130 = vector.load %arg13[%c280_60, %c0_61] : memref<392x128xf32, #tpu.memory_space<vmem>>, vector<14x128xf32>
    %c294 = arith.constant 294 : index
    %c0_62 = arith.constant 0 : index
    %131 = vector.load %arg13[%c294, %c0_62] : memref<392x128xf32, #tpu.memory_space<vmem>>, vector<14x128xf32>
    %c308 = arith.constant 308 : index
    %c0_63 = arith.constant 0 : index
    %132 = vector.load %arg13[%c308, %c0_63] : memref<392x128xf32, #tpu.memory_space<vmem>>, vector<14x128xf32>
    %133 = arith.maximumf %130, %131 : vector<14x128xf32>
    %134 = arith.maximumf %133, %132 : vector<14x128xf32>
    %135 = vector.extract_strided_slice %134 {offsets = [0, 0], sizes = [13, 64], strides = [1, 1]} : vector<14x128xf32> to vector<13x64xf32>
    %136 = vector.extract_strided_slice %134 {offsets = [0, 64], sizes = [13, 64], strides = [1, 1]} : vector<14x128xf32> to vector<13x64xf32>
    %137 = arith.maximumf %135, %136 : vector<13x64xf32>
    %138 = vector.extract_strided_slice %134 {offsets = [1, 0], sizes = [13, 64], strides = [1, 1]} : vector<14x128xf32> to vector<13x64xf32>
    %139 = arith.maximumf %137, %138 : vector<13x64xf32>
    %140 = arith.truncf %139 : vector<13x64xf32> to vector<13x64xbf16>
    %c130 = arith.constant 130 : index
    %c0_64 = arith.constant 0 : index
    %141 = vector.load %arg14[%c130, %c0_64] : memref<176x64xbf16, #tpu.memory_space<vmem>>, vector<13x64xbf16>
    tpu.vector_store %arg14[%c130, %c0_64], %140 {strides = array<i32>} : memref<176x64xbf16, #tpu.memory_space<vmem>>, vector<13x64xbf16>,
    %c308_65 = arith.constant 308 : index
    %c0_66 = arith.constant 0 : index
    %142 = vector.load %arg13[%c308_65, %c0_66] : memref<392x128xf32, #tpu.memory_space<vmem>>, vector<14x128xf32>
    %c322 = arith.constant 322 : index
    %c0_67 = arith.constant 0 : index
    %143 = vector.load %arg13[%c322, %c0_67] : memref<392x128xf32, #tpu.memory_space<vmem>>, vector<14x128xf32>
    %c336 = arith.constant 336 : index
    %c0_68 = arith.constant 0 : index
    %144 = vector.load %arg13[%c336, %c0_68] : memref<392x128xf32, #tpu.memory_space<vmem>>, vector<14x128xf32>
    %145 = arith.maximumf %142, %143 : vector<14x128xf32>
    %146 = arith.maximumf %145, %144 : vector<14x128xf32>
    %147 = vector.extract_strided_slice %146 {offsets = [0, 0], sizes = [13, 64], strides = [1, 1]} : vector<14x128xf32> to vector<13x64xf32>
    %148 = vector.extract_strided_slice %146 {offsets = [0, 64], sizes = [13, 64], strides = [1, 1]} : vector<14x128xf32> to vector<13x64xf32>
    %149 = arith.maximumf %147, %148 : vector<13x64xf32>
    %150 = vector.extract_strided_slice %146 {offsets = [1, 0], sizes = [13, 64], strides = [1, 1]} : vector<14x128xf32> to vector<13x64xf32>
    %151 = arith.maximumf %149, %150 : vector<13x64xf32>
    %152 = arith.truncf %151 : vector<13x64xf32> to vector<13x64xbf16>
    %c143 = arith.constant 143 : index
    %c0_69 = arith.constant 0 : index
    %153 = vector.load %arg14[%c143, %c0_69] : memref<176x64xbf16, #tpu.memory_space<vmem>>, vector<13x64xbf16>
    tpu.vector_store %arg14[%c143, %c0_69], %152 {strides = array<i32>} : memref<176x64xbf16, #tpu.memory_space<vmem>>, vector<13x64xbf16>,
    %c336_70 = arith.constant 336 : index
    %c0_71 = arith.constant 0 : index
    %154 = vector.load %arg13[%c336_70, %c0_71] : memref<392x128xf32, #tpu.memory_space<vmem>>, vector<14x128xf32>
    %c350 = arith.constant 350 : index
    %c0_72 = arith.constant 0 : index
    %155 = vector.load %arg13[%c350, %c0_72] : memref<392x128xf32, #tpu.memory_space<vmem>>, vector<14x128xf32>
    %c364 = arith.constant 364 : index
    %c0_73 = arith.constant 0 : index
    %156 = vector.load %arg13[%c364, %c0_73] : memref<392x128xf32, #tpu.memory_space<vmem>>, vector<14x128xf32>
    %157 = arith.maximumf %154, %155 : vector<14x128xf32>
    %158 = arith.maximumf %157, %156 : vector<14x128xf32>
    %159 = vector.extract_strided_slice %158 {offsets = [0, 0], sizes = [13, 64], strides = [1, 1]} : vector<14x128xf32> to vector<13x64xf32>
    %160 = vector.extract_strided_slice %158 {offsets = [0, 64], sizes = [13, 64], strides = [1, 1]} : vector<14x128xf32> to vector<13x64xf32>
    %161 = arith.maximumf %159, %160 : vector<13x64xf32>
    %162 = vector.extract_strided_slice %158 {offsets = [1, 0], sizes = [13, 64], strides = [1, 1]} : vector<14x128xf32> to vector<13x64xf32>
    %163 = arith.maximumf %161, %162 : vector<13x64xf32>
    %164 = arith.truncf %163 : vector<13x64xf32> to vector<13x64xbf16>
    %c156 = arith.constant 156 : index
    %c0_74 = arith.constant 0 : index
    %165 = vector.load %arg14[%c156, %c0_74] : memref<176x64xbf16, #tpu.memory_space<vmem>>, vector<13x64xbf16>
    tpu.vector_store %arg14[%c156, %c0_74], %164 {strides = array<i32>} : memref<176x64xbf16, #tpu.memory_space<vmem>>, vector<13x64xbf16>,
    %cst_75 = arith.constant 0.000000e+00 : bf16
    %166 = vector.broadcast %cst_75 : bf16 to vector<7x64xbf16>
    %c169 = arith.constant 169 : index
    %c0_76 = arith.constant 0 : index
    %167 = vector.load %arg14[%c169, %c0_76] : memref<176x64xbf16, #tpu.memory_space<vmem>>, vector<7x64xbf16>
    tpu.vector_store %arg14[%c169, %c0_76], %166 {strides = array<i32>} : memref<176x64xbf16, #tpu.memory_space<vmem>>, vector<7x64xbf16>,
    %c0_77 = arith.constant 0 : index
    %c0_78 = arith.constant 0 : index
    %168 = vector.load %arg14[%c0_77, %c0_78] : memref<176x64xbf16, #tpu.memory_space<vmem>>, vector<120x64xbf16>
    %c1 = arith.constant 1 : index
    %c0_79 = arith.constant 0 : index
    %169 = vector.load %arg14[%c1, %c0_79] : memref<176x64xbf16, #tpu.memory_space<vmem>>, vector<120x64xbf16>
    %c2 = arith.constant 2 : index
    %c0_80 = arith.constant 0 : index
    %170 = vector.load %arg14[%c2, %c0_80] : memref<176x64xbf16, #tpu.memory_space<vmem>>, vector<120x64xbf16>
    %c3 = arith.constant 3 : index
    %c0_81 = arith.constant 0 : index
    %171 = vector.load %arg14[%c3, %c0_81] : memref<176x64xbf16, #tpu.memory_space<vmem>>, vector<120x64xbf16>
    %c4 = arith.constant 4 : index
    %c0_82 = arith.constant 0 : index
    %172 = vector.load %arg14[%c4, %c0_82] : memref<176x64xbf16, #tpu.memory_space<vmem>>, vector<120x64xbf16>
    %c13_83 = arith.constant 13 : index
    %c0_84 = arith.constant 0 : index
    %173 = vector.load %arg14[%c13_83, %c0_84] : memref<176x64xbf16, #tpu.memory_space<vmem>>, vector<120x64xbf16>
    %c14_85 = arith.constant 14 : index
    %c0_86 = arith.constant 0 : index
    %174 = vector.load %arg14[%c14_85, %c0_86] : memref<176x64xbf16, #tpu.memory_space<vmem>>, vector<120x64xbf16>
    %c15 = arith.constant 15 : index
    %c0_87 = arith.constant 0 : index
    %175 = vector.load %arg14[%c15, %c0_87] : memref<176x64xbf16, #tpu.memory_space<vmem>>, vector<120x64xbf16>
    %c16 = arith.constant 16 : index
    %c0_88 = arith.constant 0 : index
    %176 = vector.load %arg14[%c16, %c0_88] : memref<176x64xbf16, #tpu.memory_space<vmem>>, vector<120x64xbf16>
    %c17 = arith.constant 17 : index
    %c0_89 = arith.constant 0 : index
    %177 = vector.load %arg14[%c17, %c0_89] : memref<176x64xbf16, #tpu.memory_space<vmem>>, vector<120x64xbf16>
    %c26_90 = arith.constant 26 : index
    %c0_91 = arith.constant 0 : index
    %178 = vector.load %arg14[%c26_90, %c0_91] : memref<176x64xbf16, #tpu.memory_space<vmem>>, vector<120x64xbf16>
    %c27 = arith.constant 27 : index
    %c0_92 = arith.constant 0 : index
    %179 = vector.load %arg14[%c27, %c0_92] : memref<176x64xbf16, #tpu.memory_space<vmem>>, vector<120x64xbf16>
    %c28_93 = arith.constant 28 : index
    %c0_94 = arith.constant 0 : index
    %180 = vector.load %arg14[%c28_93, %c0_94] : memref<176x64xbf16, #tpu.memory_space<vmem>>, vector<120x64xbf16>
    %c29 = arith.constant 29 : index
    %c0_95 = arith.constant 0 : index
    %181 = vector.load %arg14[%c29, %c0_95] : memref<176x64xbf16, #tpu.memory_space<vmem>>, vector<120x64xbf16>
    %c30 = arith.constant 30 : index
    %c0_96 = arith.constant 0 : index
    %182 = vector.load %arg14[%c30, %c0_96] : memref<176x64xbf16, #tpu.memory_space<vmem>>, vector<120x64xbf16>
    %c39_97 = arith.constant 39 : index
    %c0_98 = arith.constant 0 : index
    %183 = vector.load %arg14[%c39_97, %c0_98] : memref<176x64xbf16, #tpu.memory_space<vmem>>, vector<120x64xbf16>
    %c40 = arith.constant 40 : index
    %c0_99 = arith.constant 0 : index
    %184 = vector.load %arg14[%c40, %c0_99] : memref<176x64xbf16, #tpu.memory_space<vmem>>, vector<120x64xbf16>
    %c41 = arith.constant 41 : index
    %c0_100 = arith.constant 0 : index
    %185 = vector.load %arg14[%c41, %c0_100] : memref<176x64xbf16, #tpu.memory_space<vmem>>, vector<120x64xbf16>
    %c42_101 = arith.constant 42 : index
    %c0_102 = arith.constant 0 : index
    %186 = vector.load %arg14[%c42_101, %c0_102] : memref<176x64xbf16, #tpu.memory_space<vmem>>, vector<120x64xbf16>
    %c43 = arith.constant 43 : index
    %c0_103 = arith.constant 0 : index
    %187 = vector.load %arg14[%c43, %c0_103] : memref<176x64xbf16, #tpu.memory_space<vmem>>, vector<120x64xbf16>
    %c52_104 = arith.constant 52 : index
    %c0_105 = arith.constant 0 : index
    %188 = vector.load %arg14[%c52_104, %c0_105] : memref<176x64xbf16, #tpu.memory_space<vmem>>, vector<120x64xbf16>
    %c53 = arith.constant 53 : index
    %c0_106 = arith.constant 0 : index
    %189 = vector.load %arg14[%c53, %c0_106] : memref<176x64xbf16, #tpu.memory_space<vmem>>, vector<120x64xbf16>
    %c54 = arith.constant 54 : index
    %c0_107 = arith.constant 0 : index
    %190 = vector.load %arg14[%c54, %c0_107] : memref<176x64xbf16, #tpu.memory_space<vmem>>, vector<120x64xbf16>
    %c55 = arith.constant 55 : index
    %c0_108 = arith.constant 0 : index
    %191 = vector.load %arg14[%c55, %c0_108] : memref<176x64xbf16, #tpu.memory_space<vmem>>, vector<120x64xbf16>
    %c56_109 = arith.constant 56 : index
    %c0_110 = arith.constant 0 : index
    %192 = vector.load %arg14[%c56_109, %c0_110] : memref<176x64xbf16, #tpu.memory_space<vmem>>, vector<120x64xbf16>
    %193 = tpu.concatenate %168, %169, %170, %171, %172, %173, %174, %175, %176, %177, %178, %179, %180, %181, %182, %183 in 1 : vector<120x64xbf16>, vector<120x64xbf16>, vector<120x64xbf16>, vector<120x64xbf16>, vector<120x64xbf16>, vector<120x64xbf16>, vector<120x64xbf16>, vector<120x64xbf16>, vector<120x64xbf16>, vector<120x64xbf16>, vector<120x64xbf16>, vector<120x64xbf16>, vector<120x64xbf16>, vector<120x64xbf16>, vector<120x64xbf16>, vector<120x64xbf16> -> vector<120x1024xbf16>
    %194 = tpu.concatenate %184, %185, %186, %187, %188, %189, %190, %191, %192 in 1 : vector<120x64xbf16>, vector<120x64xbf16>, vector<120x64xbf16>, vector<120x64xbf16>, vector<120x64xbf16>, vector<120x64xbf16>, vector<120x64xbf16>, vector<120x64xbf16>, vector<120x64xbf16> -> vector<120x576xbf16>
    %195 = tpu.concatenate %193, %194 in 1 : vector<120x1024xbf16>, vector<120x576xbf16> -> vector<120x1600xbf16>
    %c0_111 = arith.constant 0 : index
    %c0_112 = arith.constant 0 : index
    %196 = vector.load %arg4[%c0_111, %c0_112] : memref<1600x64xbf16, #tpu.memory_space<vmem>>, vector<1600x64xbf16>
    %cst_113 = arith.constant dense<0.000000e+00> : vector<120x64xf32>
    %197 = tpu.matmul %195, %196, %cst_113 {dimension_numbers = #tpu.dot_dimension_numbers<[1], [0], [0], [1], [0, 0, 1, 1], [], []>} : vector<120x1600xbf16>, vector<1600x64xbf16>, vector<120x64xf32> -> vector<120x64xf32>
    %c0_114 = arith.constant 0 : index
    %c0_115 = arith.constant 0 : index
    %198 = vector.load %arg5[%c0_114, %c0_115] : memref<1x64xf32, #tpu.memory_space<vmem>>, vector<1x64xf32>
    %199 = vector.broadcast %198 : vector<1x64xf32> to vector<120x64xf32>
    %200 = arith.addf %197, %199 : vector<120x64xf32>
    %cst_116 = arith.constant 0.000000e+00 : f32
    %201 = vector.broadcast %cst_116 : f32 to vector<120x64xf32>
    %202 = arith.maximumf %200, %201 : vector<120x64xf32>
    %203 = vector.extract_strided_slice %202 {offsets = [0, 0], sizes = [118, 64], strides = [1, 1]} : vector<120x64xf32> to vector<118x64xf32>
    %204 = vector.extract_strided_slice %202 {offsets = [1, 0], sizes = [118, 64], strides = [1, 1]} : vector<120x64xf32> to vector<118x64xf32>
    %205 = arith.maximumf %203, %204 : vector<118x64xf32>
    %206 = vector.extract_strided_slice %202 {offsets = [2, 0], sizes = [118, 64], strides = [1, 1]} : vector<120x64xf32> to vector<118x64xf32>
    %207 = arith.maximumf %205, %206 : vector<118x64xf32>
    %c0_117 = arith.constant 0 : index
    %c0_118 = arith.constant 0 : index
    %208 = vector.load %arg15[%c0_117, %c0_118] : memref<120x64xf32, #tpu.memory_space<vmem>>, vector<118x64xf32>
    tpu.vector_store %arg15[%c0_117, %c0_118], %207 {strides = array<i32>} : memref<120x64xf32, #tpu.memory_space<vmem>>, vector<118x64xf32>,
    %c0_119 = arith.constant 0 : index
    %c0_120 = arith.constant 0 : index
    %209 = vector.load %arg15[%c0_119, %c0_120] : memref<120x64xf32, #tpu.memory_space<vmem>>, vector<1x64xf32>
    %c13_121 = arith.constant 13 : index
    %c0_122 = arith.constant 0 : index
    %210 = vector.load %arg15[%c13_121, %c0_122] : memref<120x64xf32, #tpu.memory_space<vmem>>, vector<1x64xf32>
    %211 = arith.maximumf %209, %210 : vector<1x64xf32>
    %c26_123 = arith.constant 26 : index
    %c0_124 = arith.constant 0 : index
    %212 = vector.load %arg15[%c26_123, %c0_124] : memref<120x64xf32, #tpu.memory_space<vmem>>, vector<1x64xf32>
    %213 = arith.maximumf %211, %212 : vector<1x64xf32>
    %c2_125 = arith.constant 2 : index
    %c0_126 = arith.constant 0 : index
    %214 = vector.load %arg15[%c2_125, %c0_126] : memref<120x64xf32, #tpu.memory_space<vmem>>, vector<1x64xf32>
    %c15_127 = arith.constant 15 : index
    %c0_128 = arith.constant 0 : index
    %215 = vector.load %arg15[%c15_127, %c0_128] : memref<120x64xf32, #tpu.memory_space<vmem>>, vector<1x64xf32>
    %216 = arith.maximumf %214, %215 : vector<1x64xf32>
    %c28_129 = arith.constant 28 : index
    %c0_130 = arith.constant 0 : index
    %217 = vector.load %arg15[%c28_129, %c0_130] : memref<120x64xf32, #tpu.memory_space<vmem>>, vector<1x64xf32>
    %218 = arith.maximumf %216, %217 : vector<1x64xf32>
    %c4_131 = arith.constant 4 : index
    %c0_132 = arith.constant 0 : index
    %219 = vector.load %arg15[%c4_131, %c0_132] : memref<120x64xf32, #tpu.memory_space<vmem>>, vector<1x64xf32>
    %c17_133 = arith.constant 17 : index
    %c0_134 = arith.constant 0 : index
    %220 = vector.load %arg15[%c17_133, %c0_134] : memref<120x64xf32, #tpu.memory_space<vmem>>, vector<1x64xf32>
    %221 = arith.maximumf %219, %220 : vector<1x64xf32>
    %c30_135 = arith.constant 30 : index
    %c0_136 = arith.constant 0 : index
    %222 = vector.load %arg15[%c30_135, %c0_136] : memref<120x64xf32, #tpu.memory_space<vmem>>, vector<1x64xf32>
    %223 = arith.maximumf %221, %222 : vector<1x64xf32>
    %c6 = arith.constant 6 : index
    %c0_137 = arith.constant 0 : index
    %224 = vector.load %arg15[%c6, %c0_137] : memref<120x64xf32, #tpu.memory_space<vmem>>, vector<1x64xf32>
    %c19 = arith.constant 19 : index
    %c0_138 = arith.constant 0 : index
    %225 = vector.load %arg15[%c19, %c0_138] : memref<120x64xf32, #tpu.memory_space<vmem>>, vector<1x64xf32>
    %226 = arith.maximumf %224, %225 : vector<1x64xf32>
    %c32 = arith.constant 32 : index
    %c0_139 = arith.constant 0 : index
    %227 = vector.load %arg15[%c32, %c0_139] : memref<120x64xf32, #tpu.memory_space<vmem>>, vector<1x64xf32>
    %228 = arith.maximumf %226, %227 : vector<1x64xf32>
    %c26_140 = arith.constant 26 : index
    %c0_141 = arith.constant 0 : index
    %229 = vector.load %arg15[%c26_140, %c0_141] : memref<120x64xf32, #tpu.memory_space<vmem>>, vector<1x64xf32>
    %c39_142 = arith.constant 39 : index
    %c0_143 = arith.constant 0 : index
    %230 = vector.load %arg15[%c39_142, %c0_143] : memref<120x64xf32, #tpu.memory_space<vmem>>, vector<1x64xf32>
    %231 = arith.maximumf %229, %230 : vector<1x64xf32>
    %c52_144 = arith.constant 52 : index
    %c0_145 = arith.constant 0 : index
    %232 = vector.load %arg15[%c52_144, %c0_145] : memref<120x64xf32, #tpu.memory_space<vmem>>, vector<1x64xf32>
    %233 = arith.maximumf %231, %232 : vector<1x64xf32>
    %c28_146 = arith.constant 28 : index
    %c0_147 = arith.constant 0 : index
    %234 = vector.load %arg15[%c28_146, %c0_147] : memref<120x64xf32, #tpu.memory_space<vmem>>, vector<1x64xf32>
    %c41_148 = arith.constant 41 : index
    %c0_149 = arith.constant 0 : index
    %235 = vector.load %arg15[%c41_148, %c0_149] : memref<120x64xf32, #tpu.memory_space<vmem>>, vector<1x64xf32>
    %236 = arith.maximumf %234, %235 : vector<1x64xf32>
    %c54_150 = arith.constant 54 : index
    %c0_151 = arith.constant 0 : index
    %237 = vector.load %arg15[%c54_150, %c0_151] : memref<120x64xf32, #tpu.memory_space<vmem>>, vector<1x64xf32>
    %238 = arith.maximumf %236, %237 : vector<1x64xf32>
    %c30_152 = arith.constant 30 : index
    %c0_153 = arith.constant 0 : index
    %239 = vector.load %arg15[%c30_152, %c0_153] : memref<120x64xf32, #tpu.memory_space<vmem>>, vector<1x64xf32>
    %c43_154 = arith.constant 43 : index
    %c0_155 = arith.constant 0 : index
    %240 = vector.load %arg15[%c43_154, %c0_155] : memref<120x64xf32, #tpu.memory_space<vmem>>, vector<1x64xf32>
    %241 = arith.maximumf %239, %240 : vector<1x64xf32>
    %c56_156 = arith.constant 56 : index
    %c0_157 = arith.constant 0 : index
    %242 = vector.load %arg15[%c56_156, %c0_157] : memref<120x64xf32, #tpu.memory_space<vmem>>, vector<1x64xf32>
    %243 = arith.maximumf %241, %242 : vector<1x64xf32>
    %c32_158 = arith.constant 32 : index
    %c0_159 = arith.constant 0 : index
    %244 = vector.load %arg15[%c32_158, %c0_159] : memref<120x64xf32, #tpu.memory_space<vmem>>, vector<1x64xf32>
    %c45 = arith.constant 45 : index
    %c0_160 = arith.constant 0 : index
    %245 = vector.load %arg15[%c45, %c0_160] : memref<120x64xf32, #tpu.memory_space<vmem>>, vector<1x64xf32>
    %246 = arith.maximumf %244, %245 : vector<1x64xf32>
    %c58 = arith.constant 58 : index
    %c0_161 = arith.constant 0 : index
    %247 = vector.load %arg15[%c58, %c0_161] : memref<120x64xf32, #tpu.memory_space<vmem>>, vector<1x64xf32>
    %248 = arith.maximumf %246, %247 : vector<1x64xf32>
    %c52_162 = arith.constant 52 : index
    %c0_163 = arith.constant 0 : index
    %249 = vector.load %arg15[%c52_162, %c0_163] : memref<120x64xf32, #tpu.memory_space<vmem>>, vector<1x64xf32>
    %c65_164 = arith.constant 65 : index
    %c0_165 = arith.constant 0 : index
    %250 = vector.load %arg15[%c65_164, %c0_165] : memref<120x64xf32, #tpu.memory_space<vmem>>, vector<1x64xf32>
    %251 = arith.maximumf %249, %250 : vector<1x64xf32>
    %c78_166 = arith.constant 78 : index
    %c0_167 = arith.constant 0 : index
    %252 = vector.load %arg15[%c78_166, %c0_167] : memref<120x64xf32, #tpu.memory_space<vmem>>, vector<1x64xf32>
    %253 = arith.maximumf %251, %252 : vector<1x64xf32>
    %c54_168 = arith.constant 54 : index
    %c0_169 = arith.constant 0 : index
    %254 = vector.load %arg15[%c54_168, %c0_169] : memref<120x64xf32, #tpu.memory_space<vmem>>, vector<1x64xf32>
    %c67 = arith.constant 67 : index
    %c0_170 = arith.constant 0 : index
    %255 = vector.load %arg15[%c67, %c0_170] : memref<120x64xf32, #tpu.memory_space<vmem>>, vector<1x64xf32>
    %256 = arith.maximumf %254, %255 : vector<1x64xf32>
    %c80 = arith.constant 80 : index
    %c0_171 = arith.constant 0 : index
    %257 = vector.load %arg15[%c80, %c0_171] : memref<120x64xf32, #tpu.memory_space<vmem>>, vector<1x64xf32>
    %258 = arith.maximumf %256, %257 : vector<1x64xf32>
    %c56_172 = arith.constant 56 : index
    %c0_173 = arith.constant 0 : index
    %259 = vector.load %arg15[%c56_172, %c0_173] : memref<120x64xf32, #tpu.memory_space<vmem>>, vector<1x64xf32>
    %c69 = arith.constant 69 : index
    %c0_174 = arith.constant 0 : index
    %260 = vector.load %arg15[%c69, %c0_174] : memref<120x64xf32, #tpu.memory_space<vmem>>, vector<1x64xf32>
    %261 = arith.maximumf %259, %260 : vector<1x64xf32>
    %c82 = arith.constant 82 : index
    %c0_175 = arith.constant 0 : index
    %262 = vector.load %arg15[%c82, %c0_175] : memref<120x64xf32, #tpu.memory_space<vmem>>, vector<1x64xf32>
    %263 = arith.maximumf %261, %262 : vector<1x64xf32>
    %c58_176 = arith.constant 58 : index
    %c0_177 = arith.constant 0 : index
    %264 = vector.load %arg15[%c58_176, %c0_177] : memref<120x64xf32, #tpu.memory_space<vmem>>, vector<1x64xf32>
    %c71 = arith.constant 71 : index
    %c0_178 = arith.constant 0 : index
    %265 = vector.load %arg15[%c71, %c0_178] : memref<120x64xf32, #tpu.memory_space<vmem>>, vector<1x64xf32>
    %266 = arith.maximumf %264, %265 : vector<1x64xf32>
    %c84_179 = arith.constant 84 : index
    %c0_180 = arith.constant 0 : index
    %267 = vector.load %arg15[%c84_179, %c0_180] : memref<120x64xf32, #tpu.memory_space<vmem>>, vector<1x64xf32>
    %268 = arith.maximumf %266, %267 : vector<1x64xf32>
    %c78_181 = arith.constant 78 : index
    %c0_182 = arith.constant 0 : index
    %269 = vector.load %arg15[%c78_181, %c0_182] : memref<120x64xf32, #tpu.memory_space<vmem>>, vector<1x64xf32>
    %c91_183 = arith.constant 91 : index
    %c0_184 = arith.constant 0 : index
    %270 = vector.load %arg15[%c91_183, %c0_184] : memref<120x64xf32, #tpu.memory_space<vmem>>, vector<1x64xf32>
    %271 = arith.maximumf %269, %270 : vector<1x64xf32>
    %c104_185 = arith.constant 104 : index
    %c0_186 = arith.constant 0 : index
    %272 = vector.load %arg15[%c104_185, %c0_186] : memref<120x64xf32, #tpu.memory_space<vmem>>, vector<1x64xf32>
    %273 = arith.maximumf %271, %272 : vector<1x64xf32>
    %c80_187 = arith.constant 80 : index
    %c0_188 = arith.constant 0 : index
    %274 = vector.load %arg15[%c80_187, %c0_188] : memref<120x64xf32, #tpu.memory_space<vmem>>, vector<1x64xf32>
    %c93 = arith.constant 93 : index
    %c0_189 = arith.constant 0 : index
    %275 = vector.load %arg15[%c93, %c0_189] : memref<120x64xf32, #tpu.memory_space<vmem>>, vector<1x64xf32>
    %276 = arith.maximumf %274, %275 : vector<1x64xf32>
    %c106 = arith.constant 106 : index
    %c0_190 = arith.constant 0 : index
    %277 = vector.load %arg15[%c106, %c0_190] : memref<120x64xf32, #tpu.memory_space<vmem>>, vector<1x64xf32>
    %278 = arith.maximumf %276, %277 : vector<1x64xf32>
    %c82_191 = arith.constant 82 : index
    %c0_192 = arith.constant 0 : index
    %279 = vector.load %arg15[%c82_191, %c0_192] : memref<120x64xf32, #tpu.memory_space<vmem>>, vector<1x64xf32>
    %c95 = arith.constant 95 : index
    %c0_193 = arith.constant 0 : index
    %280 = vector.load %arg15[%c95, %c0_193] : memref<120x64xf32, #tpu.memory_space<vmem>>, vector<1x64xf32>
    %281 = arith.maximumf %279, %280 : vector<1x64xf32>
    %c108 = arith.constant 108 : index
    %c0_194 = arith.constant 0 : index
    %282 = vector.load %arg15[%c108, %c0_194] : memref<120x64xf32, #tpu.memory_space<vmem>>, vector<1x64xf32>
    %283 = arith.maximumf %281, %282 : vector<1x64xf32>
    %c84_195 = arith.constant 84 : index
    %c0_196 = arith.constant 0 : index
    %284 = vector.load %arg15[%c84_195, %c0_196] : memref<120x64xf32, #tpu.memory_space<vmem>>, vector<1x64xf32>
    %c97 = arith.constant 97 : index
    %c0_197 = arith.constant 0 : index
    %285 = vector.load %arg15[%c97, %c0_197] : memref<120x64xf32, #tpu.memory_space<vmem>>, vector<1x64xf32>
    %286 = arith.maximumf %284, %285 : vector<1x64xf32>
    %c110 = arith.constant 110 : index
    %c0_198 = arith.constant 0 : index
    %287 = vector.load %arg15[%c110, %c0_198] : memref<120x64xf32, #tpu.memory_space<vmem>>, vector<1x64xf32>
    %288 = arith.maximumf %286, %287 : vector<1x64xf32>
    %289 = tpu.concatenate %213, %218, %223, %228, %233, %238, %243, %248, %253, %258, %263, %268, %273, %278, %283, %288 in 1 : vector<1x64xf32>, vector<1x64xf32>, vector<1x64xf32>, vector<1x64xf32>, vector<1x64xf32>, vector<1x64xf32>, vector<1x64xf32>, vector<1x64xf32>, vector<1x64xf32>, vector<1x64xf32>, vector<1x64xf32>, vector<1x64xf32>, vector<1x64xf32>, vector<1x64xf32>, vector<1x64xf32>, vector<1x64xf32> -> vector<1x1024xf32>
    %290 = arith.truncf %289 : vector<1x1024xf32> to vector<1x1024xbf16>
    %c0_199 = arith.constant 0 : index
    %c0_200 = arith.constant 0 : index
    %291 = vector.load %arg6[%c0_199, %c0_200] : memref<1024x384xbf16, #tpu.memory_space<vmem>>, vector<1024x384xbf16>
    %cst_201 = arith.constant dense<0.000000e+00> : vector<1x384xf32>
    %292 = tpu.matmul %290, %291, %cst_201 {dimension_numbers = #tpu.dot_dimension_numbers<[1], [0], [0], [1], [0, 0, 1, 1], [], []>} : vector<1x1024xbf16>, vector<1024x384xbf16>, vector<1x384xf32> -> vector<1x384xf32>
    %c0_202 = arith.constant 0 : index
    %c0_203 = arith.constant 0 : index
    %293 = vector.load %arg7[%c0_202, %c0_203] : memref<1x384xf32, #tpu.memory_space<vmem>>, vector<1x384xf32>
    %294 = arith.addf %292, %293 : vector<1x384xf32>
    %cst_204 = arith.constant 0.000000e+00 : f32
    %295 = vector.broadcast %cst_204 : f32 to vector<1x384xf32>
    %296 = arith.maximumf %294, %295 : vector<1x384xf32>
    %297 = arith.truncf %296 : vector<1x384xf32> to vector<1x384xbf16>
    %c0_205 = arith.constant 0 : index
    %c0_206 = arith.constant 0 : index
    %298 = vector.load %arg8[%c0_205, %c0_206] : memref<384x192xbf16, #tpu.memory_space<vmem>>, vector<384x192xbf16>
    %cst_207 = arith.constant dense<0.000000e+00> : vector<1x192xf32>
    %299 = tpu.matmul %297, %298, %cst_207 {dimension_numbers = #tpu.dot_dimension_numbers<[1], [0], [0], [1], [0, 0, 1, 1], [], []>} : vector<1x384xbf16>, vector<384x192xbf16>, vector<1x192xf32> -> vector<1x192xf32>
    %c0_208 = arith.constant 0 : index
    %c0_209 = arith.constant 0 : index
    %300 = vector.load %arg9[%c0_208, %c0_209] : memref<1x192xf32, #tpu.memory_space<vmem>>, vector<1x192xf32>
    %301 = arith.addf %299, %300 : vector<1x192xf32>
    %cst_210 = arith.constant 0.000000e+00 : f32
    %302 = vector.broadcast %cst_210 : f32 to vector<1x192xf32>
    %303 = arith.maximumf %301, %302 : vector<1x192xf32>
    %304 = arith.truncf %303 : vector<1x192xf32> to vector<1x192xbf16>
    %c0_211 = arith.constant 0 : index
    %c0_212 = arith.constant 0 : index
    %305 = vector.load %arg10[%c0_211, %c0_212] : memref<192x128xbf16, #tpu.memory_space<vmem>>, vector<192x128xbf16>
    %cst_213 = arith.constant dense<0.000000e+00> : vector<1x128xf32>
    %306 = tpu.matmul %304, %305, %cst_213 {dimension_numbers = #tpu.dot_dimension_numbers<[1], [0], [0], [1], [0, 0, 1, 1], [], []>} : vector<1x192xbf16>, vector<192x128xbf16>, vector<1x128xf32> -> vector<1x128xf32>
    %c0_214 = arith.constant 0 : index
    %c0_215 = arith.constant 0 : index
    %307 = vector.load %arg11[%c0_214, %c0_215] : memref<1x128xf32, #tpu.memory_space<vmem>>, vector<1x128xf32>
    %308 = arith.addf %306, %307 : vector<1x128xf32>
    %c0_216 = arith.constant 0 : index
    %c0_217 = arith.constant 0 : index
    %c0_218 = arith.constant 0 : index
    %309 = vector.load %arg12[%c0_216, %c0_217, %c0_218] : memref<1x1x128xf32, #tpu.memory_space<vmem>>, vector<1x1x128xf32>
    %310 = vector.shape_cast %309 : vector<1x1x128xf32> to vector<1x128xf32>
    %311 = vector.shape_cast %308 : vector<1x128xf32> to vector<1x1x128xf32>
    tpu.vector_store %arg12[%c0_216, %c0_217, %c0_218], %311 {strides = array<i32>} : memref<1x1x128xf32, #tpu.memory_space<vmem>>, vector<1x1x128xf32>,
    return
  }
  func.func @transform_0(%arg0: i32) -> (i32, i32, i32) {
    %c0_i32 = arith.constant 0 : i32
    %c0_i32_0 = arith.constant 0 : i32
    %c0_i32_1 = arith.constant 0 : i32
    return %arg0, %c0_i32, %c0_i32_0 : i32, i32, i32
  }
  func.func @transform_1(%arg0: i32) -> (i32, i32) {
    %c0_i32 = arith.constant 0 : i32
    %c0_i32_0 = arith.constant 0 : i32
    %c0_i32_1 = arith.constant 0 : i32
    return %c0_i32, %c0_i32_0 : i32, i32
  }
  func.func @transform_2(%arg0: i32) -> (i32, i32) {
    %c0_i32 = arith.constant 0 : i32
    %c0_i32_0 = arith.constant 0 : i32
    %c0_i32_1 = arith.constant 0 : i32
    return %c0_i32, %c0_i32_0 : i32, i32
  }
  func.func @transform_3(%arg0: i32) -> (i32, i32) {
    %c0_i32 = arith.constant 0 : i32
    %c0_i32_0 = arith.constant 0 : i32
    %c0_i32_1 = arith.constant 0 : i32
    return %c0_i32, %c0_i32_0 : i32, i32
  }
  func.func @transform_4(%arg0: i32) -> (i32, i32) {
    %c0_i32 = arith.constant 0 : i32
    %c0_i32_0 = arith.constant 0 : i32
    %c0_i32_1 = arith.constant 0 : i32
    return %c0_i32, %c0_i32_0 : i32, i32
  }
  func.func @transform_5(%arg0: i32) -> (i32, i32) {
    %c0_i32 = arith.constant 0 : i32
    %c0_i32_0 = arith.constant 0 : i32
    %c0_i32_1 = arith.constant 0 : i32
    return %c0_i32, %c0_i32_0 : i32, i32
  }
  func.func @transform_6(%arg0: i32) -> (i32, i32) {
    %c0_i32 = arith.constant 0 : i32
    %c0_i32_0 = arith.constant 0 : i32
    %c0_i32_1 = arith.constant 0 : i32
    return %c0_i32, %c0_i32_0 : i32, i32
  }
  func.func @transform_7(%arg0: i32) -> (i32, i32) {
    %c0_i32 = arith.constant 0 : i32
    %c0_i32_0 = arith.constant 0 : i32
    %c0_i32_1 = arith.constant 0 : i32
    return %c0_i32, %c0_i32_0 : i32, i32
  }
  func.func @transform_8(%arg0: i32) -> (i32, i32) {
    %c0_i32 = arith.constant 0 : i32
    %c0_i32_0 = arith.constant 0 : i32
    %c0_i32_1 = arith.constant 0 : i32
    return %c0_i32, %c0_i32_0 : i32, i32
  }
  func.func @transform_9(%arg0: i32) -> (i32, i32) {
    %c0_i32 = arith.constant 0 : i32
    %c0_i32_0 = arith.constant 0 : i32
    %c0_i32_1 = arith.constant 0 : i32
    return %c0_i32, %c0_i32_0 : i32, i32
  }
  func.func @transform_10(%arg0: i32) -> (i32, i32) {
    %c0_i32 = arith.constant 0 : i32
    %c0_i32_0 = arith.constant 0 : i32
    %c0_i32_1 = arith.constant 0 : i32
    return %c0_i32, %c0_i32_0 : i32, i32
  }
  func.func @transform_11(%arg0: i32) -> (i32, i32, i32) {
    %c0_i32 = arith.constant 0 : i32
    %c0_i32_0 = arith.constant 0 : i32
    %c0_i32_1 = arith.constant 0 : i32
    return %arg0, %c0_i32, %c0_i32_0 : i32, i32, i32
  }
}

</mosaic_0001>

<bundles_post_ra>
// kernel: alexnet_forward.1
= control target key start
LH: loop header
LB: loop body
LE: loop exit
PB: predicated region body
PF: predicated region fallthrough
CT: control target
= control target key end

     0   :  { %s11469_s0 = inlined_call_operand.vmem [shape: bf16[2,392,128], index: 0, kind: input, shape index: {}]   ;;  %s11470_s1 = inlined_call_operand.vmem [shape: bf16[128,128], index: 1, kind: input, shape index: {}]   ;;  %s11471_s2 = inlined_call_operand.vmem [shape: f32[1,128], index: 2, kind: input, shape index: {}]   ;;  %s11472_s3 = inlined_call_operand.vmem [shape: bf16[1600,64], index: 3, kind: input, shape index: {}]   ;;  %s11473_s4 = inlined_call_operand.vmem [shape: f32[1,64], index: 4, kind: input, shape index: {}]   ;;  %s11474_s5 = inlined_call_operand.vmem [shape: bf16[1024,384], index: 5, kind: input, shape index: {}]   ;;  %s11475_s6 = inlined_call_operand.vmem [shape: f32[1,384], index: 6, kind: input, shape index: {}]   ;;  %s11476_s7 = inlined_call_operand.vmem [shape: bf16[384,192], index: 7, kind: input, shape index: {}]   ;;  %s11477_s8 = inlined_call_operand.vmem [shape: f32[1,192], index: 8, kind: input, shape index: {}]   ;;  %s11478_s9 = inlined_call_operand.vmem [shape: bf16[192,128], index: 9, kind: input, shape index: {}]   ;;  %s11479_s10 = inlined_call_operand.vmem [shape: f32[1,128], index: 10, kind: input, shape index: {}]   ;;  %s11480_s11 = inlined_call_operand.hbm [shape: f32[2,1,128], index: 11, kind: output, shape index: {}]  }
   0x1   :  { %11511 = sst [smem:[#allocation27_spill]] %s11469_s0 }
   0x2   :  { %16 = vsyncpa [#allocation6], 0 }
   0x3   :  { %18 = vsyncpa [#allocation6 + $0x1], 0  ;;  %s8490_s17 = smov 0   ;;  %s8492_s18 = smov 0  }
   0x4   :  { %s8494_s19 = smov 0   ;;  %s8496_s20 = smov 0  }
   0x5 LB: > { %s8511_s21 = sadd.s32 4294967295, %s8423_s20   ;;  %s6662_s22 = sadd.s32 4294967294, %s8423_s20   ;;  %s8423_s20 = sphi %s8496_s20, %s11595_s20   ;;  %s8419_s19 = sphi %s8494_s19, %s11594_s19   ;;  %s8415_s18 = sphi %s8492_s18, %s11593_s18   ;;  %s8411_s17 = sphi %s8490_s17, %s11592_s17  }
   0x6   : > { %s8515_s23 = sadd.s32 1, %s8423_s20   ;;  %s267_s24 = sadd.s32 1, %s8419_s19 }
   0x7   : > { %s264_s25 = ssub.s32 %s8423_s20, %s8515_s23  ;;  %p277_p0 = scmp.ne.s32.totalorder %s8419_s19, %s8415_s18 }
   0x8   : > { %p265_p1 = scmp.eq.s32.totalorder %s264_s25, 0  ;;  %p278_p2 = scmp.eq.s32.totalorder %s8511_s21, 1 }
   0x9   : > { %p283_p3 = scmp.ne.s32.totalorder %s8415_s18, %s8411_s17  ;;  %p284_p4 = scmp.eq.s32.totalorder %s6662_s22, 1 }
   0xa   : > { %s8526_s26 = scalar_select %p265_p1, %s8419_s19, %s267_s24  }
   0xb   : > { %p8528_p5 = por %p278_p2, %p277_p0  ;;  %p8532_p6 = por %p284_p4, %p283_p3 }
   0xc   : > { %p6665_p7 = scmp.ge.s32.totalorder %s8423_s20, 1  ;;  %p340_p8 = scmp.lt.s32.totalorder %s8423_s20, 3 }
   0xe   : > { %p341_p9 = pnand %p6665_p7, %p340_p8 }
  0x10   : > { %344 = sbr.rel (%p341_p9) target bundleno = 2252 (0x8cc), region = 64 }
  0x17   : > { %v7872_v0 = vld [vmem:[%s11470_s1] sm:$0xff]   ;;  %v8425_v1 = vmov 0.0   ;;  %v7873_v2 = vld [vmem:[%s11470_s1 + $0x8] sm:$0xff]   ;;  %vm8426_vm0 = vmmov 0   ;;  %p379_p10 = scmp.lt.s32.totalorder %s8511_s21, 1  ;;  %v7874_v3 = vld [vmem:[%s11470_s1 + $0x10] sm:$0xff]  }
  0x18   : > { %7583 = vmatprep.subr.bf16.mxu0 %v8425_v1  ;;  %7599 = vmatprep.mubr.msk.bf16.mxu0 %vm8426_vm0, %v8425_v1  ;;  %s11514_s0 = sld [smem:[#allocation27_spill]]  ;;  %v7875_v4 = vld [vmem:[%s11470_s1 + $0x18] sm:$0xff]   ;;  %v7876_v5 = vld [vmem:[%s11470_s1 + $0x20] sm:$0xff]   ;;  %v7877_v6 = vld [vmem:[%s11470_s1 + $0x28] sm:$0xff]   ;;  %s11495_s15 = smov 64   ;;  %vm1003_vm1 = vcmask 1046528  }
  0x19   : > { %7584 = vmatpush3.bf16.msra.mxu0 %v7872_v0  ;;  %s380_s14 = scalar_select %p379_p10, %s8511_s21, 1  ;;  %v7878_v7 = vld [vmem:[%s11470_s1 + $0x30] sm:$0xff]   ;;  %v7879_v8 = vld [vmem:[%s11470_s1 + $0x38] sm:$0xff]   ;;  %v8649_v32 = vld [vmem:[%s11471_s2] ss:$0 sm:$0xff]  ;;  %vm1012_vm2 = vcmask 522240  }
  0x1a   : > { %7585 = vmatprep.subr.bf16.mxu0 %v8425_v1  ;;  %vm1013_vm3 = vsmask.f32 6400  ;;  %vm11481_vm5 = vcmask 523270   ;;  %vm1056_vm6 = vsmask.f32 7962  ;;  %vm11482_vm8 = vcmask 520192  }
  0x1b   : > { %s7743_s22 = smul.u32 196, %s380_s14  ;;  %vm1014_vm4 = vmand %vm1012_vm2, %vm1013_vm3  ;;  %vm1096_vm9 = vcmask 519168   ;;  %vm1097_vm10 = vsmask.f32 3328  ;;  %vm1094_vm11 = vcmask 523269   ;;  %vm1139_vm13 = vcmask 523267  }
  0x1c   : > { %vm1057_vm7 = vmand %vm11481_vm5, %vm1056_vm6  ;;  %vm1140_vm14 = vsmask.f32 7950  ;;  %vm1145_vm15 = vcmask 517120   ;;  %vm1180_vm6 = vcmask 516096   ;;  %vm1342_vm5 = vcmask 523268   ;;  %s7063_s14 = sshll.u32 %s8511_s21, 4 }
  0x1d   : > { %7586 = vmatpush3.bf16.msra.mxu0 %v7873_v2  ;;  %vm1098_vm12 = vmand %vm1096_vm9, %vm1097_vm10  ;;  %vm1178_vm10 = vcmask 523266  }
  0x1e   : > { %7587 = vmatprep.subr.bf16.mxu0 %v8425_v1  ;;  %s8557_s29 = scalar_lea.vmem %s11514_s0, %s7743_s22  ;;  %s11533_s22 = smov 64  }
  0x1f   : > { %v7880_v9 = vld [vmem:[%s8557_s29] sm:$0xff]   ;;  %v7881_v10 = vld [vmem:[%s8557_s29 + $0x8] sm:$0xff]   ;;  %v7882_v11 = vld [vmem:[%s8557_s29 + $0x10] sm:$0xff]   ;;  %s11427_s0 = scalar_lea.hbm %s11480_s11, %s7063_s14 }
  0x20   : > { %v7883_v12 = vld [vmem:[%s8557_s29 + $0x18] sm:$0xff]   ;;  %v7884_v13 = vld [vmem:[%s8557_s29 + $0x20] sm:$0xff]   ;;  %v7885_v14 = vld [vmem:[%s8557_s29 + $0x28] sm:$0xff]  }
  0x21   : > { %7588 = vmatpush3.bf16.msra.mxu0 %v7874_v3  ;;  %v7886_v15 = vld [vmem:[%s8557_s29 + $0x30] sm:$0xff]   ;;  %v7887_v16 = vld [vmem:[%s8557_s29 + $0x38] sm:$0xff]   ;;  %v7888_v17 = vld [vmem:[%s8557_s29 + $0x40] sm:$0xff]  }
  0x22   : > { %7589 = vmatprep.subr.bf16.mxu0 %v8425_v1  ;;  %v7889_v18 = vld [vmem:[%s8557_s29 + $0x48] sm:$0xff]   ;;  %v7890_v19 = vld [vmem:[%s8557_s29 + $0x50] sm:$0xff]   ;;  %v7891_v20 = vld [vmem:[%s8557_s29 + $0x58] sm:$0xff]  }
  0x23   : > { %v7892_v21 = vld [vmem:[%s8557_s29 + $0x60] sm:$0xff]   ;;  %v7893_v22 = vld [vmem:[%s8557_s29 + $0x68] sm:$0xff]   ;;  %v7894_v23 = vld [vmem:[%s8557_s29 + $0x70] sm:$0xff]  }
  0x24   : > { %v7895_v24 = vld [vmem:[%s8557_s29 + $0x78] sm:$0xff]   ;;  %v7896_v25 = vld [vmem:[%s8557_s29 + $0x80] sm:$0xff]   ;;  %v7897_v26 = vld [vmem:[%s8557_s29 + $0x88] sm:$0xff]  }
  0x25   : > { %7590 = vmatpush3.bf16.msra.mxu0 %v7875_v4  ;;  %v7898_v27 = vld [vmem:[%s8557_s29 + $0x90] sm:$0xff]   ;;  %v7899_v28 = vld [vmem:[%s8557_s29 + $0x98] sm:$0xff]   ;;  %v7900_v29 = vld [vmem:[%s8557_s29 + $0xa0] sm:$0xff]  }
  0x26   : > { %7591 = vmatprep.subr.bf16.mxu0 %v8425_v1  ;;  %v7901_v30 = vld [vmem:[%s8557_s29 + $0xa8] sm:$0xff]   ;;  %v7902_v31 = vld [vmem:[%s8557_s29 + $0xb0] sm:$0xff]   ;;  %v7903_v40 = vld [vmem:[%s8557_s29 + $0xb8] sm:$0xff]  }
  0x29   : > { %7592 = vmatpush3.bf16.msra.mxu0 %v7876_v5 }
  0x2a   : > { %7593 = vmatprep.subr.bf16.mxu0 %v8425_v1 }
  0x2d   : > { %7594 = vmatpush3.bf16.msra.mxu0 %v7877_v6 }
  0x2e   : > { %7595 = vmatprep.subr.bf16.mxu0 %v8425_v1 }
  0x31   : > { %7596 = vmatpush3.bf16.msra.mxu0 %v7878_v7 }
  0x32   : > { %7597 = vmatprep.subr.bf16.mxu0 %v8425_v1 }
  0x35   : > { %7598 = vmatpush3.bf16.msra.mxu0 %v7879_v8 }
  0x38   : > { %7600 = vmatmul.mubr.bf16.vlgmr.msra.gmra.mrb[0].mxu0 %v7880_v9 }
  0x39   : > { %7603 = vmatprep.mubr.msk.bf16.mxu0 %vm8426_vm0, %v8425_v1 }
  0x40   : > { %7604 = vmatmul.mubr.bf16.gmra.mrb[4].mxu0 %v7881_v10 }
  0x41   : > { %7607 = vmatprep.mubr.msk.bf16.mxu0 %vm8426_vm0, %v8425_v1 }
  0x48   : > { %7608 = vmatmul.mubr.bf16.gmra.mrb[8].mxu0 %v7882_v11 }
  0x49   : > { %7611 = vmatprep.mubr.msk.bf16.mxu0 %vm8426_vm0, %v8425_v1 }
  0x50   : > { %7612 = vmatmul.mubr.bf16.gmra.mrb[12].mxu0 %v7883_v12 }
  0x51   : > { %7615 = vmatprep.mubr.msk.bf16.mxu0 %vm8426_vm0, %v8425_v1 }
  0x58   : > { %7616 = vmatmul.mubr.bf16.gmra.mrb[16].mxu0 %v7884_v13 }
  0x59   : > { %7619 = vmatprep.mubr.msk.bf16.mxu0 %vm8426_vm0, %v8425_v1 }
  0x60   : > { %7620 = vmatmul.mubr.bf16.gmra.mrb[20].mxu0 %v7885_v14 }
  0x61   : > { %7623 = vmatprep.mubr.msk.bf16.mxu0 %vm8426_vm0, %v8425_v1 }
  0x68   : > { %7624 = vmatmul.mubr.bf16.gmra.mrb[24].mxu0 %v7886_v15 }
  0x69   : > { %7627 = vmatprep.mubr.msk.bf16.mxu0 %vm8426_vm0, %v8425_v1 }
  0x70   : > { %7628 = vmatmul.mubr.bf16.gmra.mrb[28].mxu0 %v7887_v16 }
  0x71   : > { %7631 = vmatprep.mubr.msk.bf16.mxu0 %vm8426_vm0, %v8425_v1 }
  0x78   : > { %7632 = vmatmul.mubr.bf16.gmra.mrb[32].mxu0 %v7888_v17 }
  0x79   : > { %7635 = vmatprep.mubr.msk.bf16.mxu0 %vm8426_vm0, %v8425_v1 }
  0x80   : > { %7636 = vmatmul.mubr.bf16.gmra.mrb[36].mxu0 %v7889_v18 }
  0x81   : > { %7639 = vmatprep.mubr.msk.bf16.mxu0 %vm8426_vm0, %v8425_v1 }
  0x88   : > { %7640 = vmatmul.mubr.bf16.gmra.mrb[40].mxu0 %v7890_v19 }
  0x89   : > { %7643 = vmatprep.mubr.msk.bf16.mxu0 %vm8426_vm0, %v8425_v1 }
  0x90   : > { %7644 = vmatmul.mubr.bf16.gmra.mrb[44].mxu0 %v7891_v20 }
  0x91   : > { %7647 = vmatprep.mubr.msk.bf16.mxu0 %vm8426_vm0, %v8425_v1 }
  0x98   : > { %7648 = vmatmul.mubr.bf16.gmra.mrb[48].mxu0 %v7892_v21 }
  0x99   : > { %7651 = vmatprep.mubr.msk.bf16.mxu0 %vm8426_vm0, %v8425_v1 }
  0xa0   : > { %7652 = vmatmul.mubr.bf16.gmra.mrb[52].mxu0 %v7893_v22 }
  0xa1   : > { %7655 = vmatprep.mubr.msk.bf16.mxu0 %vm8426_vm0, %v8425_v1 }
  0xa8   : > { %7656 = vmatmul.mubr.bf16.gmra.mrb[56].mxu0 %v7894_v23 }
  0xa9   : > { %7659 = vmatprep.mubr.msk.bf16.mxu0 %vm8426_vm0, %v8425_v1 }
  0xb0   : > { %7660 = vmatmul.mubr.bf16.gmra.mrb[60].mxu0 %v7895_v24 }
  0xb1   : > { %7663 = vmatprep.mubr.msk.bf16.mxu0 %vm8426_vm0, %v8425_v1 }
  0xb8   : > { %7664 = vmatmul.mubr.bf16.gmra.mrb[64].mxu0 %v7896_v25 }
  0xb9   : > { %7667 = vmatprep.mubr.msk.bf16.mxu0 %vm8426_vm0, %v8425_v1 }
  0xc0   : > { %7668 = vmatmul.mubr.bf16.gmra.mrb[68].mxu0 %v7897_v26 }
  0xc1   : > { %7671 = vmatprep.mubr.msk.bf16.mxu0 %vm8426_vm0, %v8425_v1 }
  0xc8   : > { %7672 = vmatmul.mubr.bf16.gmra.mrb[72].mxu0 %v7898_v27 }
  0xc9   : > { %7675 = vmatprep.mubr.msk.bf16.mxu0 %vm8426_vm0, %v8425_v1 }
  0xd0   : > { %7676 = vmatmul.mubr.bf16.gmra.mrb[76].mxu0 %v7899_v28 }
  0xd1   : > { %7679 = vmatprep.mubr.msk.bf16.mxu0 %vm8426_vm0, %v8425_v1 }
  0xd8   : > { %7680 = vmatmul.mubr.bf16.gmra.mrb[80].mxu0 %v7900_v29 }
  0xd9   : > { %7683 = vmatprep.mubr.msk.bf16.mxu0 %vm8426_vm0, %v8425_v1 }
  0xe0   : > { %7684 = vmatmul.mubr.bf16.gmra.mrb[84].mxu0 %v7901_v30 }
  0xe1   : > { %7687 = vmatprep.mubr.msk.bf16.mxu0 %vm8426_vm0, %v8425_v1 }
  0xe8   : > { %7688 = vmatmul.mubr.bf16.gmra.mrb[88].mxu0 %v7902_v31 }
  0xe9   : > { %7691 = vmatprep.mubr.msk.bf16.mxu0 %vm8426_vm0, %v8425_v1 }
  0xf0   : > { %7692 = vmatmul.mubr.bf16.gmra.mrb[92].mxu0 %v7903_v40 }
  0xf1   : > { %7695 = vmatprep.mubr.msk.bf16.mxu0 %vm8426_vm0, %v8425_v1  ;;  %vm1427_vm0 = vsmask.f32 7424 }
 0x10b   : > { %v687_v33 = vpop.f32.mrb[0].mxu0 }
 0x10c   : > { %v688_v34 = vadd.f32 %v8649_v32, %v687_v33  ;;  %v7601_v35 = vpop.f32.mrb[1].mxu0 }
 0x10d   : > { %v690_v36 = vpop.f32.mrb[2].mxu0 }
 0x10e   : > { %v885_v37 = vmax.f32 %v688_v34, 0.0  ;;  %v691_v38 = vadd.f32 %v8649_v32, %v690_v36  ;;  %v7602_v39 = vpop.f32.mrb[3].mxu0 }
 0x110   : > { %v886_v41 = vmax.f32 %v691_v38, 0.0 }
 0x112   : > { %935 = vst [vmem:[#allocation2 + $0x8] sm:$0xff] %v886_v41 }
 0x113   : > { %v695_v42 = vpop.f32.mrb[4].mxu0 }
 0x114   : > { %v696_v43 = vadd.f32 %v8649_v32, %v695_v42  ;;  %v7605_v44 = vpop.f32.mrb[5].mxu0 }
 0x115   : > { %v698_v45 = vpop.f32.mrb[6].mxu0 }
 0x116   : > { %v887_v46 = vmax.f32 %v696_v43, 0.0  ;;  %v699_v47 = vadd.f32 %v8649_v32, %v698_v45  ;;  %v7606_v48 = vpop.f32.mrb[7].mxu0 }
 0x118   : > { %936 = vst [vmem:[#allocation2 + $0x10] sm:$0xff] %v887_v46  ;;  %v888_v49 = vmax.f32 %v699_v47, 0.0 }
 0x119   : > { %v984_v3 = vld [vmem:[#allocation2 + $0x8] sm:$0x3f] }
 0x11a   : > { %937 = vst [vmem:[#allocation2 + $0x18] sm:$0xff] %v888_v49 }
 0x11b   : > { %v703_v50 = vpop.f32.mrb[8].mxu0 }
 0x11c   : > { %v704_v51 = vadd.f32 %v8649_v32, %v703_v50  ;;  %v7609_v52 = vpop.f32.mrb[9].mxu0 }
 0x11d   : > { %v706_v53 = vpop.f32.mrb[10].mxu0 }
 0x11e   : > { %v889_v54 = vmax.f32 %v704_v51, 0.0  ;;  %v707_v55 = vadd.f32 %v8649_v32, %v706_v53  ;;  %v7610_v56 = vpop.f32.mrb[11].mxu0 }
 0x11f   : > { %v985_v62 = vld [vmem:[#allocation2 + $0xe] sm:$0xff] }
 0x120   : > { %938 = vst [vmem:[#allocation2 + $0x20] sm:$0xff] %v889_v54  ;;  %v890_v57 = vmax.f32 %v707_v55, 0.0  ;;  %v989_v6 = vmax.f32 %v885_v37, %v985_v62 }
 0x121   : > { %v986_v63 = vld [vmem:[#allocation2 + $0x16] sm:$0x3f] }
 0x122   : > { %939 = vst [vmem:[#allocation2 + $0x28] sm:$0xff] %v890_v57  ;;  %v990_v7 = vmax.f32 %v984_v3, %v986_v63 }
 0x123   : > { %v711_v58 = vpop.f32.mrb[12].mxu0 }
 0x124   : > { %v712_v59 = vadd.f32 %v8649_v32, %v711_v58  ;;  %v7613_v60 = vpop.f32.mrb[13].mxu0 }
 0x125   : > { %v714_v61 = vpop.f32.mrb[14].mxu0 }
 0x126   : > { %v891_v0 = vmax.f32 %v712_v59, 0.0  ;;  %v8664_v1 = vadd.f32 %v8649_v32, %v714_v61  ;;  %v7614_v2 = vpop.f32.mrb[15].mxu0 }
 0x127   : > { %v987_v4 = vld [vmem:[#allocation2 + $0x1c] sm:$0xff] }
 0x128   : > { %940 = vst [vmem:[#allocation2 + $0x30] sm:$0xff] %v891_v0  ;;  %v892_v5 = vmax.f32 %v8664_v1, 0.0  ;;  %v8667_v9 = vmax.f32 %v989_v6, %v987_v4 }
 0x129   : > { %v988_v8 = vld [vmem:[#allocation2 + $0x24] sm:$0x3f] }
 0x12a   : > { %v8669_v10 = vmax.f32 %v990_v7, %v988_v8  ;;  %v1019_v27 = vld [vmem:[#allocation2 + $0x24] sm:$0x3f] }
 0x12b   : > { %v719_v11 = vpop.f32.mrb[16].mxu0 }
 0x12c   : > { %v720_v12 = vadd.f32 %v8649_v32, %v719_v11  ;;  %v7617_v13 = vpop.f32.mrb[17].mxu0  ;;  %v7787_v14 = vpack.i.bf16 %v8669_v10, %v8667_v9 }
 0x12d   : > { %v722_v15 = vpop.f32.mrb[18].mxu0 }
 0x12e   : > { %v893_v16 = vmax.f32 %v720_v12, 0.0  ;;  %v723_v17 = vadd.f32 %v8649_v32, %v722_v15  ;;  %7788 = vrot.lane.b32.xlu0 %v7787_v14, %s11495_s15  ;;  %v7618_v18 = vpop.f32.mrb[19].mxu0 }
 0x12f   : > { %v1020_v20 = vld [vmem:[#allocation2 + $0x2a] sm:$0xff]  ;;  %v1021_v22 = vld [vmem:[#allocation2 + $0x32] sm:$0x3f] }
 0x130   : > { %942 = vst [vmem:[#allocation2 + $0x40] sm:$0xff] %v893_v16  ;;  %v894_v19 = vmax.f32 %v723_v17, 0.0  ;;  %v1024_v25 = vmax.f32 %v987_v4, %v1020_v20  ;;  %v1025_v31 = vmax.f32 %v1019_v27, %v1021_v22 }
 0x132   : > { %943 = vst [vmem:[#allocation2 + $0x48] sm:$0xff] %v894_v19  ;;  %v8678_v35 = vmax.f32 %v1024_v25, %v892_v5 }
 0x133   : > { %v727_v21 = vpop.f32.mrb[20].mxu0 }
 0x134   : > { %v728_v23 = vadd.f32 %v8649_v32, %v727_v21  ;;  %v7621_v24 = vpop.f32.mrb[21].mxu0 }
 0x135   : > { %v730_v26 = vpop.f32.mrb[22].mxu0 }
 0x136   : > { %v895_v28 = vmax.f32 %v728_v23, 0.0  ;;  %v731_v29 = vadd.f32 %v8649_v32, %v730_v26  ;;  %v7622_v30 = vpop.f32.mrb[23].mxu0 }
 0x137   : > { %v1023_v33 = vld [vmem:[#allocation2 + $0x40] sm:$0x3f] }
 0x138   : > { %944 = vst [vmem:[#allocation2 + $0x50] sm:$0xff] %v895_v28  ;;  %v896_v34 = vmax.f32 %v731_v29, 0.0  ;;  %v8680_v36 = vmax.f32 %v1025_v31, %v1023_v33  ;;  %v1064_v52 = vld [vmem:[#allocation2 + $0x40] sm:$0x3f] }
 0x139   : > { %v1065_v47 = vld [vmem:[#allocation2 + $0x46] sm:$0xff] }
 0x13a   : > { %945 = vst [vmem:[#allocation2 + $0x58] sm:$0xff] %v896_v34  ;;  %v7792_v37 = vpack.i.bf16 %v8680_v36, %v8678_v35  ;;  %v1069_v57 = vmax.f32 %v892_v5, %v1065_v47 }
 0x13b   : > { %v735_v38 = vpop.f32.mrb[24].mxu0 }
 0x13c   : > { %v736_v39 = vadd.f32 %v8649_v32, %v735_v38  ;;  %7793 = vrot.lane.b32.xlu0 %v7792_v37, %s11495_s15  ;;  %v7625_v40 = vpop.f32.mrb[25].mxu0 }
 0x13d   : > { %v738_v41 = vpop.f32.mrb[26].mxu0 }
 0x13e   : > { %v897_v42 = vmax.f32 %v736_v39, 0.0  ;;  %v739_v43 = vadd.f32 %v8649_v32, %v738_v41  ;;  %v7626_v44 = vpop.f32.mrb[27].mxu0 }
 0x13f   : > { %v1066_v48 = vld [vmem:[#allocation2 + $0x4e] sm:$0x3f] }
 0x140   : > { %946 = vst [vmem:[#allocation2 + $0x60] sm:$0xff] %v897_v42  ;;  %v898_v45 = vmax.f32 %v739_v43, 0.0  ;;  %v1070_v58 = vmax.f32 %v1064_v52, %v1066_v48 }
 0x141   : > { %v1067_v53 = vld [vmem:[#allocation2 + $0x54] sm:$0xff] }
 0x142   : > { %947 = vst [vmem:[#allocation2 + $0x68] sm:$0xff] %v898_v45  ;;  %v8689_v61 = vmax.f32 %v1069_v57, %v1067_v53 }
 0x143   : > { %v743_v46 = vpop.f32.mrb[28].mxu0 }
 0x144   : > { %v744_v49 = vadd.f32 %v8649_v32, %v743_v46  ;;  %v7629_v50 = vpop.f32.mrb[29].mxu0 }
 0x145   : > { %v746_v51 = vpop.f32.mrb[30].mxu0 }
 0x146   : > { %v899_v54 = vmax.f32 %v744_v49, 0.0  ;;  %v747_v55 = vadd.f32 %v8649_v32, %v746_v51  ;;  %v7630_v56 = vpop.f32.mrb[31].mxu0 }
 0x147   : > { %v1068_v59 = vld [vmem:[#allocation2 + $0x5c] sm:$0x3f] }
 0x148   : > { %v900_v60 = vmax.f32 %v747_v55, 0.0  ;;  %v8691_v62 = vmax.f32 %v1070_v58, %v1068_v59  ;;  %v1103_v12 = vld [vmem:[#allocation2 + $0x5c] sm:$0x3f] }
 0x149   : > { %v1104_v1 = vld [vmem:[#allocation2 + $0x62] sm:$0xff]  ;;  %v1105_v5 = vld [vmem:[#allocation2 + $0x6a] sm:$0x3f] }
 0x14a   : > { %949 = vst [vmem:[#allocation2 + $0x78] sm:$0xff] %v900_v60  ;;  %v7797_v63 = vpack.i.bf16 %v8691_v62, %v8689_v61  ;;  %v1108_v11 = vmax.f32 %v1067_v53, %v1104_v1  ;;  %v1109_v14 = vmax.f32 %v1103_v12, %v1105_v5 }
 0x14b   : > { %v751_v0 = vpop.f32.mrb[32].mxu0 }
 0x14c   : > { %v752_v2 = vadd.f32 %v8649_v32, %v751_v0  ;;  %7798 = vrot.lane.b32.xlu1 %v7797_v63, %s11495_s15  ;;  %v7633_v3 = vpop.f32.mrb[33].mxu0  ;;  %v8698_v16 = vmax.f32 %v1108_v11, %v899_v54 }
 0x14d   : > { %v754_v4 = vpop.f32.mrb[34].mxu0 }
 0x14e   : > { %v901_v6 = vmax.f32 %v752_v2, 0.0  ;;  %v755_v7 = vadd.f32 %v8649_v32, %v754_v4  ;;  %v7634_v8 = vpop.f32.mrb[35].mxu0 }
 0x150   : > { %950 = vst [vmem:[#allocation2 + $0x80] sm:$0xff] %v901_v6  ;;  %v902_v13 = vmax.f32 %v755_v7, 0.0 }
 0x151   : > { %v1107_v15 = vld [vmem:[#allocation2 + $0x78] sm:$0x3f] }
 0x152   : > { %951 = vst [vmem:[#allocation2 + $0x88] sm:$0xff] %v902_v13  ;;  %v8700_v17 = vmax.f32 %v1109_v14, %v1107_v15  ;;  %v1148_v39 = vld [vmem:[#allocation2 + $0x78] sm:$0x3f] }
 0x153   : > { %v759_v18 = vpop.f32.mrb[36].mxu0 }
 0x154   : > { %v760_v19 = vadd.f32 %v8649_v32, %v759_v18  ;;  %v7637_v20 = vpop.f32.mrb[37].mxu0  ;;  %v7802_v21 = vpack.i.bf16 %v8700_v17, %v8698_v16 }
 0x155   : > { %v762_v22 = vpop.f32.mrb[38].mxu0 }
 0x156   : > { %v903_v23 = vmax.f32 %v760_v19, 0.0  ;;  %v763_v24 = vadd.f32 %v8649_v32, %v762_v22  ;;  %7803 = vrot.lane.b32.xlu1 %v7802_v21, %s11495_s15  ;;  %v7638_v25 = vpop.f32.mrb[39].mxu0 }
 0x157   : > { %v1149_v31 = vld [vmem:[#allocation2 + $0x7e] sm:$0xff] }
 0x158   : > { %952 = vst [vmem:[#allocation2 + $0x90] sm:$0xff] %v903_v23  ;;  %v904_v26 = vmax.f32 %v763_v24, 0.0  ;;  %v1153_v42 = vmax.f32 %v899_v54, %v1149_v31 }
 0x159   : > { %v1150_v33 = vld [vmem:[#allocation2 + $0x86] sm:$0x3f] }
 0x15a   : > { %953 = vst [vmem:[#allocation2 + $0x98] sm:$0xff] %v904_v26  ;;  %v1154_v43 = vmax.f32 %v1148_v39, %v1150_v33 }
 0x15b   : > { %v767_v27 = vpop.f32.mrb[40].mxu0 }
 0x15c   : > { %v768_v28 = vadd.f32 %v8649_v32, %v767_v27  ;;  %v7641_v29 = vpop.f32.mrb[41].mxu0 }
 0x15d   : > { %v770_v30 = vpop.f32.mrb[42].mxu0 }
 0x15e   : > { %v905_v34 = vmax.f32 %v768_v28, 0.0  ;;  %v8709_v37 = vadd.f32 %v8649_v32, %v770_v30  ;;  %v7642_v38 = vpop.f32.mrb[43].mxu0 }
 0x15f   : > { %v1151_v40 = vld [vmem:[#allocation2 + $0x8c] sm:$0xff] }
 0x160   : > { %954 = vst [vmem:[#allocation2 + $0xa0] sm:$0xff] %v905_v34  ;;  %v906_v41 = vmax.f32 %v8709_v37, 0.0  ;;  %v8712_v45 = vmax.f32 %v1153_v42, %v1151_v40 }
 0x161   : > { %v1152_v44 = vld [vmem:[#allocation2 + $0x94] sm:$0x3f] }
 0x162   : > { %v8714_v46 = vmax.f32 %v1154_v43, %v1152_v44  ;;  %v1187_v1 = vld [vmem:[#allocation2 + $0x94] sm:$0x3f] }
 0x163   : > { %v775_v47 = vpop.f32.mrb[44].mxu0 }
 0x164   : > { %v776_v48 = vadd.f32 %v8649_v32, %v775_v47  ;;  %v7645_v49 = vpop.f32.mrb[45].mxu0  ;;  %v7807_v50 = vpack.i.bf16 %v8714_v46, %v8712_v45 }
 0x165   : > { %v778_v51 = vpop.f32.mrb[46].mxu0 }
 0x166   : > { %v907_v52 = vmax.f32 %v776_v48, 0.0  ;;  %v779_v53 = vadd.f32 %v8649_v32, %v778_v51  ;;  %7808 = vrot.lane.b32.xlu0 %v7807_v50, %s11495_s15  ;;  %v7646_v54 = vpop.f32.mrb[47].mxu0 }
 0x167   : > { %v1188_v56 = vld [vmem:[#allocation2 + $0x9a] sm:$0xff]  ;;  %v1189_v58 = vld [vmem:[#allocation2 + $0xa2] sm:$0x3f] }
 0x168   : > { %956 = vst [vmem:[#allocation2 + $0xb0] sm:$0xff] %v907_v52  ;;  %v908_v55 = vmax.f32 %v779_v53, 0.0  ;;  %v1192_v63 = vmax.f32 %v1151_v40, %v1188_v56  ;;  %v1193_v5 = vmax.f32 %v1187_v1, %v1189_v58 }
 0x16a   : > { %957 = vst [vmem:[#allocation2 + $0xb8] sm:$0xff] %v908_v55  ;;  %v8723_v8 = vmax.f32 %v1192_v63, %v906_v41 }
 0x16b   : > { %v783_v57 = vpop.f32.mrb[48].mxu0 }
 0x16c   : > { %v784_v59 = vadd.f32 %v8649_v32, %v783_v57  ;;  %v7649_v60 = vpop.f32.mrb[49].mxu0 }
 0x16d   : > { %v786_v0 = vpop.f32.mrb[50].mxu0 }
 0x16e   : > { %v909_v2 = vmax.f32 %v784_v59, 0.0  ;;  %v787_v3 = vadd.f32 %v8649_v32, %v786_v0  ;;  %v7650_v4 = vpop.f32.mrb[51].mxu0 }
 0x16f   : > { %v1191_v6 = vld [vmem:[#allocation2 + $0xb0] sm:$0x3f] }
 0x170   : > { %958 = vst [vmem:[#allocation2 + $0xc0] sm:$0xff] %v909_v2  ;;  %v910_v7 = vmax.f32 %v787_v3, 0.0  ;;  %v8725_v11 = vmax.f32 %v1193_v5, %v1191_v6  ;;  %v1228_v29 = vld [vmem:[#allocation2 + $0xb0] sm:$0x3f] }
 0x171   : > { %v1229_v24 = vld [vmem:[#allocation2 + $0xb6] sm:$0xff] }
 0x172   : > { %959 = vst [vmem:[#allocation2 + $0xc8] sm:$0xff] %v910_v7  ;;  %v7812_v12 = vpack.i.bf16 %v8725_v11, %v8723_v8  ;;  %v1233_v37 = vmax.f32 %v906_v41, %v1229_v24 }
 0x173   : > { %v791_v13 = vpop.f32.mrb[52].mxu0 }
 0x174   : > { %v792_v14 = vadd.f32 %v8649_v32, %v791_v13  ;;  %7813 = vrot.lane.b32.xlu1 %v7812_v12, %s11495_s15  ;;  %v7653_v15 = vpop.f32.mrb[53].mxu0 }
 0x175   : > { %v794_v18 = vpop.f32.mrb[54].mxu0 }
 0x176   : > { %v911_v19 = vmax.f32 %v792_v14, 0.0  ;;  %v795_v20 = vadd.f32 %v8649_v32, %v794_v18  ;;  %v7654_v21 = vpop.f32.mrb[55].mxu0 }
 0x177   : > { %v1230_v25 = vld [vmem:[#allocation2 + $0xbe] sm:$0x3f] }
 0x178   : > { %960 = vst [vmem:[#allocation2 + $0xd0] sm:$0xff] %v911_v19  ;;  %v912_v22 = vmax.f32 %v795_v20, 0.0  ;;  %v1234_v38 = vmax.f32 %v1228_v29, %v1230_v25 }
 0x179   : > { %v1231_v30 = vld [vmem:[#allocation2 + $0xc4] sm:$0xff] }
 0x17a   : > { %961 = vst [vmem:[#allocation2 + $0xd8] sm:$0xff] %v912_v22  ;;  %v8734_v42 = vmax.f32 %v1233_v37, %v1231_v30 }
 0x17b   : > { %v799_v23 = vpop.f32.mrb[56].mxu0 }
 0x17c   : > { %v800_v26 = vadd.f32 %v8649_v32, %v799_v23  ;;  %v7657_v27 = vpop.f32.mrb[57].mxu0 }
 0x17d   : > { %v802_v28 = vpop.f32.mrb[58].mxu0 }
 0x17e   : > { %v913_v31 = vmax.f32 %v800_v26, 0.0  ;;  %v803_v33 = vadd.f32 %v8649_v32, %v802_v28  ;;  %v7658_v34 = vpop.f32.mrb[59].mxu0 }
 0x17f   : > { %v1232_v39 = vld [vmem:[#allocation2 + $0xcc] sm:$0x3f] }
 0x180   : > { %v914_v40 = vmax.f32 %v803_v33, 0.0  ;;  %v8736_v43 = vmax.f32 %v1234_v38, %v1232_v39  ;;  %v1267_v56 = vld [vmem:[#allocation2 + $0xcc] sm:$0x3f] }
 0x181   : > { %v1268_v48 = vld [vmem:[#allocation2 + $0xd2] sm:$0xff]  ;;  %v1269_v41 = vld [vmem:[#allocation2 + $0xda] sm:$0x3f] }
 0x182   : > { %963 = vst [vmem:[#allocation2 + $0xe8] sm:$0xff] %v914_v40  ;;  %v7817_v44 = vpack.i.bf16 %v8736_v43, %v8734_v42  ;;  %v1272_v55 = vmax.f32 %v1231_v30, %v1268_v48  ;;  %v1273_v58 = vmax.f32 %v1267_v56, %v1269_v41 }
 0x183   : > { %v807_v47 = vpop.f32.mrb[60].mxu0 }
 0x184   : > { %v808_v49 = vadd.f32 %v8649_v32, %v807_v47  ;;  %7818 = vrot.lane.b32.xlu0 %v7817_v44, %s11495_s15  ;;  %v7661_v50 = vpop.f32.mrb[61].mxu0  ;;  %v8743_v60 = vmax.f32 %v1272_v55, %v913_v31  ;;  %v1004_v55 = vrot.slane %v8667_v9, 1 }
 0x185   : > { %v810_v51 = vpop.f32.mrb[62].mxu0  ;;  %v1005_v50 = vrot.slane %v8669_v10, 1 }
 0x186   : > { %v915_v52 = vmax.f32 %v808_v49, 0.0  ;;  %v811_v53 = vadd.f32 %v8649_v32, %v810_v51  ;;  %v7662_v54 = vpop.f32.mrb[63].mxu0 }
 0x188   : > { %964 = vst [vmem:[#allocation2 + $0xf0] sm:$0xff] %v915_v52  ;;  %v916_v57 = vmax.f32 %v811_v53, 0.0 }
 0x189   : > { %v1271_v59 = vld [vmem:[#allocation2 + $0xe8] sm:$0x3f] }
 0x18a   : > { %965 = vst [vmem:[#allocation2 + $0xf8] sm:$0xff] %v916_v57  ;;  %v8745_v63 = vmax.f32 %v1273_v58, %v1271_v59  ;;  %v1312_v24 = vld [vmem:[#allocation2 + $0xe8] sm:$0x3f] }
 0x18b   : > { %v815_v0 = vpop.f32.mrb[64].mxu0 }
 0x18c   : > { %v816_v1 = vadd.f32 %v8649_v32, %v815_v0  ;;  %v7665_v2 = vpop.f32.mrb[65].mxu0  ;;  %v7822_v3 = vpack.i.bf16 %v8745_v63, %v8743_v60  ;;  %v1006_v0 = vsel %vm1003_vm1, %v1004_v55, %v1005_v50 }
 0x18d   : > { %v818_v4 = vpop.f32.mrb[66].mxu0 }
 0x18e   : > { %v917_v5 = vmax.f32 %v816_v1, 0.0  ;;  %v819_v6 = vadd.f32 %v8649_v32, %v818_v4  ;;  %7823 = vrot.lane.b32.xlu1 %v7822_v3, %s11495_s15  ;;  %v7666_v7 = vpop.f32.mrb[67].mxu0 }
 0x18f   : > { %v1313_v19 = vld [vmem:[#allocation2 + $0xee] sm:$0xff] }
 0x190   : > { %966 = vst [vmem:[#allocation2 + $0x100] sm:$0xff] %v917_v5  ;;  %v918_v12 = vmax.f32 %v819_v6, 0.0  ;;  %v1317_v27 = vmax.f32 %v913_v31, %v1313_v19  ;;  %v1015_v7 = vld [vmem:[#allocation3] sm:$0x7f] }
 0x191   : > { %v1314_v20 = vld [vmem:[#allocation2 + $0xf6] sm:$0x3f] }
 0x192   : > { %967 = vst [vmem:[#allocation2 + $0x108] sm:$0xff] %v918_v12  ;;  %v1318_v28 = vmax.f32 %v1312_v24, %v1314_v20 }
 0x193   : > { %v823_v13 = vpop.f32.mrb[68].mxu0 }
 0x194   : > { %v824_v14 = vadd.f32 %v8649_v32, %v823_v13  ;;  %v7669_v15 = vpop.f32.mrb[69].mxu0 }
 0x195   : > { %v826_v18 = vpop.f32.mrb[70].mxu0 }
 0x196   : > { %v919_v21 = vmax.f32 %v824_v14, 0.0  ;;  %v8754_v22 = vadd.f32 %v8649_v32, %v826_v18  ;;  %v7670_v23 = vpop.f32.mrb[71].mxu0 }
 0x197   : > { %v1315_v25 = vld [vmem:[#allocation2 + $0xfc] sm:$0xff] }
 0x198   : > { %968 = vst [vmem:[#allocation2 + $0x110] sm:$0xff] %v919_v21  ;;  %v920_v26 = vmax.f32 %v8754_v22, 0.0  ;;  %v8757_v30 = vmax.f32 %v1317_v27, %v1315_v25  ;;  %v7904_v27 = vld [vmem:[%s11472_s3 + $0x40] sm:$0xff]  }
 0x199   : > { %v1316_v29 = vld [vmem:[#allocation2 + $0x104] sm:$0x3f]  ;;  %7099 = vmatprep.subr.bf16.mxu1 %v7904_v27  ;;  %v1083_v27 = vrot.slane %v8689_v61, 1 }
 0x19a   : > { %v8759_v33 = vmax.f32 %v1318_v28, %v1316_v29  ;;  %v1351_v53 = vld [vmem:[#allocation2 + $0x104] sm:$0x3f] }
 0x19b   : > { %v831_v34 = vpop.f32.mrb[72].mxu0  ;;  %v7905_v29 = vld [vmem:[%s11472_s3] sm:$0xff]  }
 0x19c   : > { %v832_v37 = vadd.f32 %v8649_v32, %v831_v34  ;;  %v7827_v38 = vpack.i.bf16 %v8759_v33, %v8757_v30  ;;  %v7673_v39 = vpop.f32.mrb[73].mxu0  ;;  %7100 = vmatpush3.bf16.msra.mxu1 %v7905_v29 }
 0x19d   : > { %v834_v40 = vpop.f32.mrb[74].mxu0 }
 0x19e   : > { %v921_v44 = vmax.f32 %v832_v37, 0.0  ;;  %7828 = vrot.lane.b32.xlu0 %v7827_v38, %s11495_s15  ;;  %v835_v47 = vadd.f32 %v8649_v32, %v834_v40  ;;  %v7674_v31 = vpop.f32.mrb[75].mxu0  ;;  %v1039_v37 = vrot.slane %v8680_v36, 1 }
 0x19f   : > { %v1352_v48 = vld [vmem:[#allocation2 + $0x10a] sm:$0xff]  ;;  %v1353_v54 = vld [vmem:[#allocation2 + $0x112] sm:$0x3f] }
 0x1a0   : > { %970 = vst [vmem:[#allocation2 + $0x120] sm:$0xff] %v921_v44  ;;  %v7789_v49 = vpop.permute.xlu0 %7788  ;;  %v922_v51 = vmax.f32 %v835_v47, 0.0  ;;  %v1356_v56 = vmax.f32 %v1315_v25, %v1352_v48  ;;  %v1357_v1 = vmax.f32 %v1351_v53, %v1353_v54  ;;  %v7906_v44 = vld [vmem:[%s11472_s3 + $0x48] sm:$0xff]  }
 0x1a1   : > { %v7791_v41 = vunpack.i.h.bf16 %v7789_v49  ;;  %v7790_v52 = vunpack.i.l.bf16 %v7789_v49  ;;  %v7907_v48 = vld [vmem:[%s11472_s3 + $0x8] sm:$0xff]   ;;  %v1038_v49 = vrot.slane %v8678_v35, 1  ;;  %7101 = vmatprep.subr.bf16.mxu1 %v7906_v44 }
 0x1a2   : > { %971 = vst [vmem:[#allocation2 + $0x128] sm:$0xff] %v922_v51  ;;  %v8776_v12 = vmax.f32 %v1356_v56, %v920_v26  ;;  %v7908_v51 = vld [vmem:[%s11472_s3 + $0x50] sm:$0xff]   ;;  %7102 = vmatpush3.bf16.msra.mxu1 %v7907_v48 }
 0x1a3   : > { %v1002_v57 = vmax.f32 %v8669_v10, %v7791_v41  ;;  %v1001_v58 = vmax.f32 %v8667_v9, %v7790_v52  ;;  %v839_v59 = vpop.f32.mrb[76].mxu0  ;;  %v1040_v53 = vsel %vm1003_vm1, %v1038_v49, %v1039_v37  ;;  %7103 = vmatprep.subr.bf16.mxu1 %v7908_v51  ;;  %v1123_v49 = vrot.slane %v8700_v17, 1 }
 0x1a4   : > { %v840_v2 = vadd.f32 %v8649_v32, %v839_v59  ;;  %v7677_v3 = vpop.f32.mrb[77].mxu0 }
 0x1a5   : > { %v1009_v4 = vmax.f32 %v1001_v58, %v1006_v0  ;;  %v1010_v5 = vmax.f32 %v1002_v57, %v1005_v50  ;;  %v842_v6 = vpop.f32.mrb[78].mxu0  ;;  %v7909_v57 = vld [vmem:[%s11472_s3 + $0x10] sm:$0xff]  }
 0x1a6   : > { %v923_v10 = vmax.f32 %v840_v2, 0.0  ;;  %v843_v9 = vadd.f32 %v8649_v32, %v842_v6  ;;  %v7678_v13 = vpop.f32.mrb[79].mxu0  ;;  %7104 = vmatpush3.bf16.msra.mxu1 %v7909_v57  ;;  %v7911_v6 = vld [vmem:[%s11472_s3 + $0x18] sm:$0xff]  }
 0x1a7   : > { %v1011_v14 = vpack.c.bf16 %v1010_v5, %v1009_v4  ;;  %v1355_v15 = vld [vmem:[#allocation2 + $0x120] sm:$0x3f] }
 0x1a8   : > { %v8779_v18 = vmax.f32 %v1357_v1, %v1355_v15  ;;  %972 = vst [vmem:[#allocation2 + $0x130] sm:$0xff] %v923_v10  ;;  %v924_v19 = vmax.f32 %v843_v9, 0.0  ;;  %v7912_v13 = vld [vmem:[%s11472_s3 + $0x60] sm:$0xff]  }
 0x1a9   : > { %v1016_v20 = vsel %vm1014_vm4, %v1011_v14, %v1015_v7  ;;  %vm1141_vm4 = vmand %vm1139_vm13, %vm1140_vm14  ;;  %vm1737_vm13 = vsmask.f32 1280  ;;  %vm1222_vm14 = vsmask.f32 7938 }
 0x1aa   : > { %1017 = vst [vmem:[#allocation3] sm:$0x7f] %v1016_v20  ;;  %v7832_v21 = vpack.i.bf16 %v8779_v18, %v8776_v12  ;;  %973 = vst [vmem:[#allocation2 + $0x138] sm:$0xff] %v924_v19  ;;  %v7913_v19 = vld [vmem:[%s11472_s3 + $0x20] sm:$0xff]  }
 0x1ab   : > { %v847_v23 = vpop.f32.mrb[80].mxu0 }
 0x1ac   : > { %7833 = vrot.lane.b32.xlu1 %v7832_v21, %s11495_s15  ;;  %v848_v24 = vadd.f32 %v8649_v32, %v847_v23  ;;  %v7681_v25 = vpop.f32.mrb[81].mxu0  ;;  %v1084_v21 = vrot.slane %v8691_v62, 1 }
 0x1ad   : > { %v850_v28 = vpop.f32.mrb[82].mxu0  ;;  %v7914_v25 = vld [vmem:[%s11472_s3 + $0x68] sm:$0xff]  }
 0x1ae   : > { %v7794_v34 = vpop.permute.xlu0 %7793  ;;  %v925_v38 = vmax.f32 %v848_v24, 0.0  ;;  %v851_v39 = vadd.f32 %v8649_v32, %v850_v28  ;;  %v7682_v40 = vpop.f32.mrb[83].mxu0 }
 0x1af   : > { %v7796_v47 = vunpack.i.h.bf16 %v7794_v34  ;;  %v7795_v31 = vunpack.i.l.bf16 %v7794_v34  ;;  %v7915_v34 = vld [vmem:[%s11472_s3 + $0x28] sm:$0xff]   ;;  %v7916_v40 = vld [vmem:[%s11472_s3 + $0x70] sm:$0xff]  }
 0x1b0   : > { %974 = vst [vmem:[#allocation2 + $0x140] sm:$0xff] %v925_v38  ;;  %v926_v50 = vmax.f32 %v851_v39, 0.0 }
 0x1b1   : > { %v1037_v41 = vmax.f32 %v8680_v36, %v7796_v47  ;;  %v1036_v52 = vmax.f32 %v8678_v35, %v7795_v31  ;;  %v7910_v35 = vld [vmem:[%s11472_s3 + $0x58] sm:$0xff]   ;;  %v1058_v14 = vld [vmem:[#allocation3] sm:$0xc0]  ;;  %v7917_v31 = vld [vmem:[%s11472_s3 + $0x30] sm:$0xff]  }
 0x1b2   : > { %975 = vst [vmem:[#allocation2 + $0x148] sm:$0xff] %v926_v50  ;;  %7105 = vmatprep.subr.bf16.mxu1 %v7910_v35  ;;  %v7918_v50 = vld [vmem:[%s11472_s3 + $0x78] sm:$0xff]  }
 0x1b3   : > { %v1043_v54 = vmax.f32 %v1036_v52, %v1040_v53  ;;  %v1044_v55 = vmax.f32 %v1037_v41, %v1039_v37  ;;  %v855_v56 = vpop.f32.mrb[84].mxu0  ;;  %7106 = vmatpush3.bf16.msra.mxu1 %v7911_v6  ;;  %v1085_v37 = vsel %vm1003_vm1, %v1083_v27, %v1084_v21  ;;  %v7919_v53 = vld [vmem:[%s11472_s3 + $0x38] sm:$0xff]  }
 0x1b4   : > { %v8810_v58 = vadd.f32 %v8649_v32, %v855_v56  ;;  %v7685_v59 = vpop.f32.mrb[85].mxu0  ;;  %7107 = vmatprep.subr.bf16.mxu1 %v7912_v13 }
 0x1b5   : > { %v1045_v36 = vpack.c.bf16 %v1044_v55, %v1043_v54  ;;  %v858_v0 = vpop.f32.mrb[86].mxu0  ;;  %v1122_v54 = vrot.slane %v8698_v16, 1 }
 0x1b6   : > { %v11486_v1 = vmax.f32 %v8810_v58, 0.0  ;;  %v859_v2 = vadd.f32 %v8649_v32, %v858_v0  ;;  %v7686_v3 = vpop.f32.mrb[87].mxu0 }
 0x1b7   : > { %v1047_v4 = vshrl.u32 %v1045_v36, 16  ;;  %v1050_v5 = vshll.u32 %v1045_v36, 16  ;;  %7108 = vmatpush3.bf16.msra.mxu1 %v7913_v19  ;;  %v1124_v35 = vsel %vm1003_vm1, %v1122_v54, %v1123_v49 }
 0x1b8   : > { %976 = vst [vmem:[#allocation2 + $0x150] sm:$0xff] %v11486_v1  ;;  %v928_v7 = vmax.f32 %v859_v2, 0.0  ;;  %7109 = vmatprep.subr.bf16.mxu1 %v7914_v25  ;;  %v7920_v1 = vld [vmem:[%s11472_s3 + $0xc0] sm:$0xff]  }
 0x1b9   : > { %v1049_v10 = vrot.slane %v1047_v4, 1  ;;  %v1052_v9 = vrot.slane %v1050_v5, 2 }
 0x1ba   : > { %977 = vst [vmem:[#allocation2 + $0x158] sm:$0xff] %v928_v7 }
 0x1bb   : > { %v1053_v32 = vor.u32 %v1052_v9, %v1049_v10  ;;  %7110 = vmatpush3.bf16.msra.mxu1 %v7915_v34 }
 0x1bc   : > { %7111 = vmatprep.subr.bf16.mxu1 %v7916_v40 }
 0x1bd   : > { %v1059_v15 = vsel %vm1057_vm7, %v1053_v32, %v1058_v14  ;;  %1062 = vst.msk [vmem:[#allocation3 + $0x8] sm:$0x1f] %vm11482_vm8, %v1053_v32  ;;  %vm1181_vm7 = vsmask.f32 256 }
 0x1be   : > { %1060 = vst [vmem:[#allocation3] sm:$0xc0] %v1059_v15  ;;  %v7799_v20 = vpop.permute.xlu1 %7798 }
 0x1bf   : > { %v7801_v23 = vunpack.i.h.bf16 %v7799_v20  ;;  %v7800_v24 = vunpack.i.l.bf16 %v7799_v20  ;;  %7112 = vmatpush3.bf16.msra.mxu1 %v7917_v31 }
 0x1c0   : > { %7113 = vmatprep.subr.bf16.mxu1 %v7918_v50  ;;  %v1167_v50 = vrot.slane %v8712_v45, 1 }
 0x1c1   : > { %v1082_v28 = vmax.f32 %v8691_v62, %v7801_v23  ;;  %v1081_v29 = vmax.f32 %v8689_v61, %v7800_v24  ;;  %v1099_v61 = vld [vmem:[#allocation3 + $0x10] sm:$0xf] }
 0x1c3   : > { %v1088_v38 = vmax.f32 %v1081_v29, %v1085_v37  ;;  %v1089_v39 = vmax.f32 %v1082_v28, %v1084_v21  ;;  %7114 = vmatpush3.bf16.msra.mxu1 %v7919_v53 }
 0x1c4   : > { %7163 = vmatprep.subr.bf16.mxu1 %v7920_v1 }
 0x1c5   : > { %v1090_v44 = vpack.c.bf16 %v1089_v39, %v1088_v38  ;;  %v8845_v47 = vld [vmem:[#allocation3] sm:$0xff] }
 0x1c6   : > { %v1562_v55 = vshll.u32 %v8845_v47, 16  ;;  %v8862_v59 = vld [vmem:[#allocation3] sm:$0xfe] }
 0x1c7   : > { %v1092_v62 = vrot.slane %v1090_v44, 3  ;;  %v1663_v3 = vshrl.u32 %v8862_v59, 16  ;;  %v1666_v4 = vshll.u32 %v8862_v59, 16 }
 0x1c8   : > { %v7804_v48 = vpop.permute.xlu1 %7803  ;;  %v1564_v2 = vrot.slane %v1562_v55, 1 }
 0x1c9   : > { %1095 = vst.msk [vmem:[#allocation3 + $0x8] sm:$0xe0] %vm1094_vm11, %v1092_v62  ;;  %v1100_v51 = vsel %vm1098_vm12, %v1092_v62, %v1099_v61  ;;  %v7806_v41 = vunpack.i.h.bf16 %v7804_v48  ;;  %v7805_v52 = vunpack.i.l.bf16 %v7804_v48  ;;  %v1665_v13 = vrot.slane %v1663_v3, 1  ;;  %vm1182_vm12 = vmand %vm1180_vm6, %vm1181_vm7 }
 0x1ca   : > { %1101 = vst [vmem:[#allocation3 + $0x10] sm:$0xf] %v1100_v51  ;;  %v1668_v14 = vrot.slane %v1666_v4, 2  ;;  %v1168_v62 = vrot.slane %v8714_v46, 1 }
 0x1cb   : > { %v1121_v56 = vmax.f32 %v8700_v17, %v7806_v41  ;;  %v1120_v57 = vmax.f32 %v8698_v16, %v7805_v52  ;;  %v1560_v16 = vshrl.u32 %v8845_v47, 16 }
 0x1cc   : > { %v1669_v37 = vor.u32 %v1668_v14, %v1665_v13  ;;  %v1169_v52 = vsel %vm1003_vm1, %v1167_v50, %v1168_v62 }
 0x1cd   : > { %v1127_v36 = vmax.f32 %v1120_v57, %v1124_v35  ;;  %v1128_v0 = vmax.f32 %v1121_v56, %v1123_v49  ;;  %v1565_v32 = vor.u32 %v1564_v2, %v1560_v16  ;;  %v1183_v57 = vld [vmem:[#allocation3 + $0x20] sm:$0x1] }
 0x1cf   : > { %v1129_v5 = vpack.c.bf16 %v1128_v0, %v1127_v36 }
 0x1d0   : > { %v8867_v6 = vld [vmem:[#allocation3 + $0x8] sm:$0xff] }
 0x1d1   : > { %v1131_v17 = vshrl.u32 %v1129_v5, 16  ;;  %v1134_v7 = vshll.u32 %v1129_v5, 16  ;;  %v1567_v10 = vshll.u32 %v8867_v6, 16  ;;  %v8872_v9 = vshrl.u32 %v8867_v6, 16  ;;  %v1142_v34 = vld [vmem:[#allocation3 + $0x10] sm:$0xf8] }
 0x1d2   : > { %v863_v5 = vpop.f32.mrb[88].mxu0 }
 0x1d3   : > { %v1133_v15 = vrot.slane %v1131_v17, 4  ;;  %v1136_v19 = vrot.slane %v1134_v7, 5  ;;  %v1569_v20 = vrot.slane %v1567_v10, 1  ;;  %v1670_v21 = vrot.slane %v8872_v9, 1 }
 0x1d4   : > { %v1671_v23 = vrot.slane %v1567_v10, 2  ;;  %v1746_v24 = vrot.slane %v8872_v9, 6  ;;  %v1747_v25 = vrot.slane %v1567_v10, 7  ;;  %v1829_v27 = vrot.slane %v8872_v9, 7 }
 0x1d5   : > { %v1137_v28 = vor.u32 %v1136_v19, %v1133_v15  ;;  %v1570_v29 = vsel %vm1427_vm0, %v1565_v32, %v1569_v20  ;;  %v1573_v36 = vor.u32 %v8872_v9, %v1569_v20 }
 0x1d6   : > { %1622 = vrot.lane.b32.xlu1 %v1570_v29, %s11495_s15  ;;  %v1672_v38 = vor.u32 %v1671_v23, %v1670_v21  ;;  %v8881_v39 = vor.u32 %v1747_v25, %v1746_v24  ;;  %v8885_v40 = vor.u32 %v1829_v27, %v1567_v10  ;;  %v7689_v10 = vpop.f32.mrb[89].mxu0  ;;  %v1206_v24 = vrot.slane %v8723_v8, 1 }
 0x1d7   : > { %v1143_v44 = vsel %vm1141_vm4, %v1137_v28, %v1142_v34  ;;  %1146 = vst.msk [vmem:[#allocation3 + $0x18] sm:$0x3] %vm1145_vm15, %v1137_v28  ;;  %v866_v14 = vpop.f32.mrb[90].mxu0  ;;  %v1207_v28 = vrot.slane %v8725_v11, 1  ;;  %vm1223_vm15 = vmand %vm1012_vm2, %vm1222_vm14  ;;  %vm1345_vm4 = vsmask.f32 2304 }
 0x1d8   : > { %1144 = vst [vmem:[#allocation3 + $0x10] sm:$0xf8] %v1143_v44  ;;  %v7809_v61 = vpop.permute.xlu0 %7808  ;;  %v1673_v31 = vsel %vm1013_vm3, %v1669_v37, %v1672_v38  ;;  %v7690_v21 = vpop.f32.mrb[91].mxu0  ;;  %vm1260_vm2 = vcmask 521216   ;;  %vm1258_vm14 = vcmask 523271  }
 0x1d9   : > { %v7811_v48 = vunpack.i.h.bf16 %v7809_v61  ;;  %v7810_v49 = vunpack.i.l.bf16 %v7809_v61  ;;  %1703 = vrot.lane.b32.xlu0 %v1673_v31, %s11495_s15  ;;  %v871_v34 = vpop.f32.mrb[92].mxu0 }
 0x1da   : > { %v7693_v31 = vpop.f32.mrb[93].mxu0 }
 0x1db   : > { %v1166_v51 = vmax.f32 %v8714_v46, %v7811_v48  ;;  %v1165_v41 = vmax.f32 %v8712_v45, %v7810_v49 }
 0x1dd   : > { %v1172_v53 = vmax.f32 %v1165_v41, %v1169_v52  ;;  %v1173_v54 = vmax.f32 %v1166_v51, %v1168_v62  ;;  %v874_v51 = vpop.f32.mrb[94].mxu0 }
 0x1de   : > { %v7694_v9 = vpop.f32.mrb[95].mxu0 }
 0x1df   : > { %v1174_v55 = vpack.c.bf16 %v1173_v54, %v1172_v53  ;;  %v8895_v56 = vld [vmem:[#allocation3 + $0x10] sm:$0xff] }
 0x1e0   : > { %v1575_v35 = vshll.u32 %v8895_v56, 16  ;;  %v8901_v46 = vshrl.u32 %v8895_v56, 16 }
 0x1e1   : > { %v1176_v45 = vrot.slane %v1174_v55, 6 }
 0x1e2   : > { %v1577_v0 = vrot.slane %v1575_v35, 1  ;;  %v1674_v2 = vrot.slane %v8901_v46, 1  ;;  %v1675_v3 = vrot.slane %v1575_v35, 2  ;;  %v1750_v4 = vrot.slane %v8901_v46, 6 }
 0x1e3   : > { %1179 = vst.msk [vmem:[#allocation3 + $0x18] sm:$0xfc] %vm1178_vm10, %v1176_v45  ;;  %v1184_v16 = vsel %vm1182_vm12, %v1176_v45, %v1183_v57  ;;  %v1751_v17 = vrot.slane %v1575_v35, 7  ;;  %v1832_v7 = vrot.slane %v8901_v46, 7  ;;  %v1920_v15 = vrot.slane %v8901_v46, 5 }
 0x1e4   : > { %1185 = vst [vmem:[#allocation3 + $0x20] sm:$0x1] %v1184_v16  ;;  %v1578_v32 = vsel %vm1427_vm0, %v1573_v36, %v1577_v0  ;;  %v8909_v13 = vor.u32 %v1675_v3, %v1674_v2  ;;  %v1921_v23 = vrot.slane %v1575_v35, 6  ;;  %vm1261_vm12 = vsmask.f32 5376 }
 0x1e5   : > { %1624 = vrot.lane.b32.xlu1 %v1578_v32, %s11495_s15  ;;  %v8913_v19 = vor.u32 %v1751_v17, %v1750_v4  ;;  %v1833_v20 = vor.u32 %v1832_v7, %v1575_v35 }
 0x1e6   : > { %v7814_v25 = vpop.permute.xlu1 %7813  ;;  %v1677_v29 = vsel %vm1013_vm3, %v1672_v38, %v8909_v13  ;;  %v8345_v38 = vld [vmem:[%s11471_s2] ss:$0 sm:$0xff]  ;;  %v8935_v41 = vor.u32 %v1921_v23, %v1920_v15 }
 0x1e7   : > { %v7816_v37 = vunpack.i.h.bf16 %v7814_v25  ;;  %v7815_v44 = vunpack.i.l.bf16 %v7814_v25  ;;  %1705 = vrot.lane.b32.xlu0 %v1677_v29, %s11495_s15  ;;  %v8925_v61 = vsel %vm1737_vm13, %v8881_v39, %v8913_v19  ;;  %v8930_v62 = vsel %vm1181_vm7, %v1829_v27, %v1833_v20 }
 0x1e8   : > { %v864_v48 = vadd.f32 %v8345_v38, %v863_v5  ;;  %v867_v49 = vadd.f32 %v8345_v38, %v866_v14  ;;  %v872_v50 = vadd.f32 %v8345_v38, %v871_v34  ;;  %v875_v54 = vadd.f32 %v8345_v38, %v874_v51 }
 0x1e9   : > { %v1205_v52 = vmax.f32 %v8725_v11, %v7816_v37  ;;  %v1204_v53 = vmax.f32 %v8723_v8, %v7815_v44  ;;  %v1208_v27 = vsel %vm1003_vm1, %v1206_v24, %v1207_v28  ;;  %v1581_v11 = vor.u32 %v8901_v46, %v1577_v0 }
 0x1ea   : > { %v8940_v55 = vld [vmem:[#allocation3 + $0x18] sm:$0xff]  ;;  %v929_v57 = vmax.f32 %v864_v48, 0.0  ;;  %v930_v35 = vmax.f32 %v867_v49, 0.0  ;;  %v931_v45 = vmax.f32 %v872_v50, 0.0  ;;  %v932_v8 = vmax.f32 %v875_v54, 0.0 }
 0x1eb   : > { %v1211_v36 = vmax.f32 %v1204_v53, %v1208_v27  ;;  %v1212_v2 = vmax.f32 %v1205_v52, %v1207_v28  ;;  %v1583_v3 = vshll.u32 %v8940_v55, 16  ;;  %v8944_v4 = vshrl.u32 %v8940_v55, 16  ;;  %v1224_v49 = vld [vmem:[#allocation3 + $0x20] sm:$0x7f] }
 0x1ec   : > { %978 = vst [vmem:[#allocation2 + $0x160] sm:$0xff] %v929_v57  ;;  %979 = vst [vmem:[#allocation2 + $0x168] sm:$0xff] %v930_v35  ;;  %v1248_v46 = vrot.slane %v8736_v43, 1  ;;  %v1247_v27 = vrot.slane %v8734_v42, 1 }
 0x1ed   : > { %980 = vst [vmem:[#allocation2 + $0x170] sm:$0xff] %v931_v45  ;;  %v1213_v5 = vpack.c.bf16 %v1212_v2, %v1211_v36  ;;  %v8947_v16 = vrot.slane %v1583_v3, 1  ;;  %v1678_v17 = vrot.slane %v8944_v4, 1  ;;  %v1679_v10 = vrot.slane %v1583_v3, 2  ;;  %981 = vst [vmem:[#allocation2 + $0x178] sm:$0xff] %v932_v8 }
 0x1ee   : > { %v1754_v32 = vrot.slane %v8944_v4, 6  ;;  %v1755_v14 = vrot.slane %v1583_v3, 7  ;;  %v1835_v15 = vrot.slane %v8944_v4, 7  ;;  %v1924_v25 = vrot.slane %v8944_v4, 5  ;;  %v8991_v45 = vld [vmem:[#allocation3 + $0x10] sm:$0xe0] }
 0x1ef   : > { %11515 = vst [vmem:[#allocation8_spill] sm:$0xff] %v8947_v16  ;;  %v1215_v20 = vshrl.u32 %v1213_v5, 16  ;;  %v1586_v0 = vsel %vm1427_vm0, %v1581_v11, %v8947_v16  ;;  %v8954_v21 = vor.u32 %v1679_v10, %v1678_v17  ;;  %v1218_v29 = vshll.u32 %v1213_v5, 16 }
 0x1f0   : > { %1626 = vrot.lane.b32.xlu1 %v1586_v0, %s11495_s15  ;;  %v8957_v23 = vor.u32 %v1755_v14, %v1754_v32  ;;  %v1836_v24 = vor.u32 %v1835_v15, %v1583_v3  ;;  %v1925_v37 = vrot.slane %v1583_v3, 6  ;;  %v2043_v50 = vrot.slane %v1583_v3, 4 }
 0x1f1   : > { %v1217_v28 = vrot.slane %v1215_v20, 7  ;;  %v1681_v34 = vsel %vm1013_vm3, %v8909_v13, %v8954_v21  ;;  %v2042_v13 = vrot.slane %v8944_v4, 3  ;;  %v1249_v36 = vsel %vm1003_vm1, %v1247_v27, %v1248_v46 }
 0x1f2   : > { %1707 = vrot.lane.b32.xlu0 %v1681_v34, %s11495_s15  ;;  %v8970_v44 = vsel %vm1737_vm13, %v8913_v19, %v8957_v23  ;;  %v8975_v31 = vsel %vm1181_vm7, %v1832_v7, %v1836_v24  ;;  %v8977_v48 = vor.u32 %v1925_v37, %v1924_v25  ;;  %v8995_v2 = vrot.slane %v8940_v55, 1 }
 0x1f3   : > { %v1220_v38 = vor.u32 %v1218_v29, %v1217_v28  ;;  %v8986_v7 = vor.u32 %v2043_v50, %v2042_v13  ;;  %v2338_v8 = vrot.slane %v8991_v45, 1  ;;  %v1287_v32 = vrot.slane %v8745_v63, 1 }
 0x1f4   : > { %v8983_v52 = vsel %vm1345_vm4, %v8935_v41, %v8977_v48  ;;  %v1286_v24 = vrot.slane %v8743_v60, 1 }
 0x1f5   : > { %v1225_v51 = vsel %vm1223_vm15, %v1220_v38, %v1224_v49  ;;  %11516 = vst [vmem:[#allocation9_spill] sm:$0xff] %v8986_v7  ;;  %vm1262_vm15 = vmand %vm1260_vm2, %vm1261_vm12  ;;  %vm1304_vm12 = vsmask.f32 7958 }
 0x1f6   : > { %1226 = vst [vmem:[#allocation3 + $0x20] sm:$0x7f] %v1225_v51  ;;  %v7819_v53 = vpop.permute.xlu0 %7818  ;;  %v1288_v29 = vsel %vm1003_vm1, %v1286_v24, %v1287_v32 }
 0x1f7   : > { %v7821_v54 = vunpack.i.h.bf16 %v7819_v53  ;;  %v7820_v9 = vunpack.i.l.bf16 %v7819_v53 }
 0x1f9   : > { %v1246_v57 = vmax.f32 %v8736_v43, %v7821_v54  ;;  %v1245_v35 = vmax.f32 %v8734_v42, %v7820_v9  ;;  %v1263_v43 = vld [vmem:[#allocation3 + $0x28] sm:$0x3f]  ;;  %v9001_v42 = vsel %vm1003_vm1, %v2338_v8, %v8995_v2 }
 0x1fa   : > { %11517 = vst [vmem:[#allocation10_spill] sm:$0xff] %v9001_v42 }
 0x1fb   : > { %v1252_v3 = vmax.f32 %v1245_v35, %v1249_v36  ;;  %v1253_v11 = vmax.f32 %v1246_v57, %v1248_v46 }
 0x1fd   : > { %v1254_v5 = vpack.c.bf16 %v1253_v11, %v1252_v3 }
 0x1ff   : > { %v1256_v17 = vrot.slane %v1254_v5, 1 }
 0x200   : > { %v7824_v10 = vpop.permute.xlu1 %7823 }
 0x201   : > { %1259 = vst.msk [vmem:[#allocation3 + $0x20] sm:$0x80] %vm1258_vm14, %v1256_v17  ;;  %v1264_v14 = vsel %vm1262_vm15, %v1256_v17, %v1263_v43  ;;  %v7826_v20 = vunpack.i.h.bf16 %v7824_v10  ;;  %v7825_v0 = vunpack.i.l.bf16 %v7824_v10  ;;  %vm9022_vm15 = vmand %vm1094_vm11, %vm1304_vm12  ;;  %vm1511_vm11 = vsmask.f32 4352 }
 0x202   : > { %1265 = vst [vmem:[#allocation3 + $0x28] sm:$0x3f] %v1264_v14  ;;  %vm1344_vm12 = vcmask 518144  }
 0x203   : > { %v1285_v25 = vmax.f32 %v8745_v63, %v7826_v20  ;;  %v1284_v28 = vmax.f32 %v8743_v60, %v7825_v0  ;;  %v1589_v63 = vor.u32 %v8944_v4, %v8947_v16  ;;  %v1332_v20 = vrot.slane %v8759_v33, 1  ;;  %vm1346_vm8 = vmand %vm1344_vm12, %vm1345_vm4  ;;  %v9213_v16 = vld [vmem:[#allocation3] sm:$0x80] }
 0x204   : > { %v1331_v4 = vrot.slane %v8757_v30, 1 }
 0x205   : > { %v1291_v34 = vmax.f32 %v1284_v28, %v1288_v29  ;;  %v1292_v37 = vmax.f32 %v1285_v25, %v1287_v32 }
 0x207   : > { %v1293_v38 = vpack.c.bf16 %v1292_v37, %v1291_v34 }
 0x208   : > { %v9009_v49 = vld [vmem:[#allocation3 + $0x20] sm:$0xff] }
 0x209   : > { %v1295_v13 = vshrl.u32 %v1293_v38, 16  ;;  %v1298_v50 = vshll.u32 %v1293_v38, 16  ;;  %v9012_v51 = vshll.u32 %v9009_v49, 16  ;;  %v9015_v53 = vshrl.u32 %v9009_v49, 16  ;;  %v1306_v5 = vld [vmem:[#allocation3 + $0x28] sm:$0xe0] }
 0x20a   : > { %v9065_v38 = vld [vmem:[#allocation3 + $0x18] sm:$0xf8] }
 0x20b   : > { %v1297_v60 = vrot.slane %v1295_v13, 2  ;;  %v1300_v46 = vrot.slane %v1298_v50, 3  ;;  %v1593_v54 = vrot.slane %v9012_v51, 1  ;;  %v1682_v9 = vrot.slane %v9015_v53, 1  ;;  %11521 = vst [vmem:[#allocation12_spill] sm:$0xff] %v9065_v38 }
 0x20c   : > { %v1683_v57 = vrot.slane %v9012_v51, 2  ;;  %v1758_v35 = vrot.slane %v9015_v53, 6  ;;  %v1759_v36 = vrot.slane %v9012_v51, 7  ;;  %v11485_v3 = vrot.slane %v9015_v53, 7 }
 0x20d   : > { %v1301_v11 = vor.u32 %v1300_v46, %v1297_v60  ;;  %v1594_v8 = vsel %vm1427_vm0, %v1589_v63, %v1593_v54  ;;  %v1928_v32 = vrot.slane %v9015_v53, 5  ;;  %v1929_v0 = vrot.slane %v9012_v51, 6 }
 0x20e   : > { %1628 = vrot.lane.b32.xlu1 %v1594_v8, %s11495_s15  ;;  %v9034_v43 = vor.u32 %v1683_v57, %v1682_v9  ;;  %v9036_v17 = vor.u32 %v1759_v36, %v1758_v35  ;;  %v9041_v10 = vor.u32 %v11485_v3, %v9012_v51  ;;  %v2046_v24 = vrot.slane %v9015_v53, 3 }
 0x20f   : > { %v1307_v14 = vsel %vm9022_vm15, %v1301_v11, %v1306_v5  ;;  %1310 = vst.msk [vmem:[#allocation3 + $0x30] sm:$0xf] %vm1096_vm9, %v1301_v11  ;;  %v2047_v37 = vrot.slane %v9012_v51, 4  ;;  %v9068_v63 = vor.u32 %v1929_v0, %v1928_v32  ;;  %v9071_v60 = vrot.slane %v9009_v49, 7  ;;  %v1396_v32 = vld [vmem:[#allocation2 + $0x120] sm:$0x3f] }
 0x210   : > { %11520 = vst [vmem:[#allocation11_spill] sm:$0xff] %v9041_v10  ;;  %1308 = vst [vmem:[#allocation3 + $0x28] sm:$0xe0] %v1307_v14  ;;  %v1685_v25 = vsel %vm1013_vm3, %v8954_v21, %v9034_v43  ;;  %v7829_v28 = vpop.permute.xlu0 %7828  ;;  %v9056_v29 = vsel %vm1737_vm13, %v8957_v23, %v9036_v17  ;;  %v9062_v34 = vsel %vm1181_vm7, %v1835_v15, %v9041_v10  ;;  %v9073_v23 = vld [vmem:[#allocation3 + $0x18] sm:$0xfc]  ;;  %vm1807_vm9 = vcmask 1040384  }
 0x211   : > { %1709 = vrot.lane.b32.xlu0 %v1685_v25, %s11495_s15  ;;  %v7831_v13 = vunpack.i.h.bf16 %v7829_v28  ;;  %v7830_v50 = vunpack.i.l.bf16 %v7829_v28  ;;  %11522 = vst [vmem:[#allocation13_spill] sm:$0xff] %v9073_v23  ;;  %v9076_v15 = vor.u32 %v2047_v37, %v2046_v24  ;;  %v9083_v27 = vsel %vm1345_vm4, %v8977_v48, %v9068_v63  ;;  %v1398_v14 = vld [vmem:[#allocation2 + $0x12e] sm:$0x3f]  ;;  %v1347_v25 = vld [vmem:[#allocation3 + $0x38] sm:$0x7] }
 0x212   : > { %v11484_v57 = vrot.slane %v9065_v38, 7  ;;  %v1333_v35 = vsel %vm1003_vm1, %v1331_v4, %v1332_v20  ;;  %v11483_v11 = vrot.slane %v9073_v23, 6  ;;  %v9094_v5 = vrot.slane %v9009_v49, 6  ;;  %v9120_v4 = vld [vmem:[#allocation2 + $0x134] sm:$0xff] }
 0x213   : > { %v1330_v46 = vmax.f32 %v8759_v33, %v7831_v13  ;;  %v1329_v9 = vmax.f32 %v8757_v30, %v7830_v50  ;;  %v9090_v36 = vsel %vm1511_vm11, %v8986_v7, %v9076_v15  ;;  %v1397_v30 = vld [vmem:[#allocation2 + $0x126] sm:$0xff]  ;;  %vm11500_vm15 = vcmask 1041408  }
 0x214   : > { %11523 = vst [vmem:[#allocation14_spill] sm:$0xff] %v9090_v36  ;;  %11524 = vst [vmem:[#allocation15_spill] sm:$0xff] %v9094_v5  ;;  %v9100_v48 = vsel %vm1807_vm9, %v11484_v57, %v9071_v60  ;;  %v1401_v13 = vmax.f32 %v920_v26, %v1397_v30 }
 0x215   : > { %v1336_v33 = vmax.f32 %v1329_v9, %v1333_v35  ;;  %v1337_v8 = vmax.f32 %v1330_v46, %v1332_v20  ;;  %11525 = vst [vmem:[#allocation16_spill] sm:$0xff] %v9100_v48  ;;  %v9108_v20 = vsel %vm11500_vm15, %v11483_v11, %v9094_v5  ;;  %v1402_v46 = vmax.f32 %v1396_v32, %v1398_v14  ;;  %v1400_v11 = vld [vmem:[#allocation2 + $0x13c] sm:$0x3f] }
 0x216   : > { %11526 = vst [vmem:[#allocation17_spill] sm:$0xff] %v9108_v20  ;;  %v1597_v9 = vor.u32 %v9015_v53, %v1593_v54  ;;  %v9131_v30 = vmax.f32 %v1401_v13, %v9120_v4 }
 0x217   : > { %v1338_v0 = vpack.c.bf16 %v1337_v8, %v1336_v33  ;;  %v9102_v24 = vld [vmem:[#allocation3 + $0x28] sm:$0xff]  ;;  %v9134_v51 = vmax.f32 %v1402_v46, %v1400_v11 }
 0x218   : > { %v9113_v28 = vshll.u32 %v9102_v24, 16  ;;  %v9116_v37 = vshrl.u32 %v9102_v24, 16 }
 0x219   : > { %v1340_v50 = vrot.slane %v1338_v0, 4  ;;  %v1370_v0 = vrot.slane %v8776_v12, 1  ;;  %v7837_v3 = vpack.i.bf16 %v9134_v51, %v9131_v30 }
 0x21a   : > { %v1601_v35 = vrot.slane %v9113_v28, 1  ;;  %v1686_v33 = vrot.slane %v9116_v37, 1  ;;  %v1687_v8 = vrot.slane %v9113_v28, 2  ;;  %v1932_v54 = vrot.slane %v9116_v37, 5 }
 0x21b   : > { %1343 = vst.msk [vmem:[#allocation3 + $0x30] sm:$0xf0] %vm1342_vm5, %v1340_v50  ;;  %v1348_v57 = vsel %vm1346_vm8, %v1340_v50, %v1347_v25  ;;  %v1933_v32 = vrot.slane %v9113_v28, 6  ;;  %v2050_v14 = vrot.slane %v9116_v37, 3  ;;  %v2051_v13 = vrot.slane %v9113_v28, 4 }
 0x21c   : > { %1349 = vst [vmem:[#allocation3 + $0x38] sm:$0x7] %v1348_v57  ;;  %v1602_v22 = vsel %vm1427_vm0, %v1597_v9, %v1601_v35  ;;  %v1688_v26 = vor.u32 %v1687_v8, %v1686_v33  ;;  %v1371_v57 = vrot.slane %v8779_v18, 1  ;;  %vm1388_vm8 = vsmask.f32 7946 }
 0x21d   : > { %1630 = vrot.lane.b32.xlu1 %v1602_v22, %s11495_s15  ;;  %v1934_v11 = vor.u32 %v1933_v32, %v1932_v54  ;;  %v2052_v46 = vor.u32 %v2051_v13, %v2050_v14  ;;  %vm1389_vm12 = vmand %vm1178_vm10, %vm1388_vm8  ;;  %vm2549_vm10 = vcmask 1043456   ;;  %vm1426_vm8 = vcmask 523265  }
 0x21e   : > { %v7834_v25 = vpop.permute.xlu1 %7833  ;;  %v1689_v50 = vsel %vm1013_vm3, %v9034_v43, %v1688_v26  ;;  %v1372_v54 = vsel %vm1003_vm1, %v1370_v0, %v1371_v57 }
 0x21f   : > { %v7836_v9 = vunpack.i.h.bf16 %v7834_v25  ;;  %v7835_v33 = vunpack.i.l.bf16 %v7834_v25  ;;  %1711 = vrot.lane.b32.xlu0 %v1689_v50, %s11495_s15  ;;  %v9154_v43 = vsel %vm1345_vm4, %v9068_v63, %v1934_v11  ;;  %v1605_v63 = vor.u32 %v9116_v37, %v1601_v35 }
 0x221   : > { %v1369_v8 = vmax.f32 %v8779_v18, %v7836_v9  ;;  %v1368_v22 = vmax.f32 %v8776_v12, %v7835_v33  ;;  %v9161_v18 = vsel %vm1511_vm11, %v9076_v15, %v2052_v46 }
 0x222   : > { %v9156_v25 = vld [vmem:[#allocation3 + $0x30] sm:$0xff] }
 0x223   : > { %v1375_v12 = vmax.f32 %v1368_v22, %v1372_v54  ;;  %v1376_v32 = vmax.f32 %v1369_v8, %v1371_v57  ;;  %7838 = vrot.lane.b32.xlu0 %v7837_v3, %s11495_s15  ;;  %v9165_v14 = vshll.u32 %v9156_v25, 16  ;;  %v9168_v50 = vshrl.u32 %v9156_v25, 16 }
 0x225   : > { %v1377_v13 = vpack.c.bf16 %v1376_v32, %v1375_v12  ;;  %v1609_v0 = vrot.slane %v9165_v14, 1  ;;  %v1690_v9 = vrot.slane %v9168_v50, 1  ;;  %v1691_v15 = vrot.slane %v9165_v14, 2 }
 0x226   : > { %v1936_v1 = vrot.slane %v9168_v50, 5  ;;  %v1937_v12 = vrot.slane %v9165_v14, 6  ;;  %v2054_v32 = vrot.slane %v9168_v50, 3 }
 0x227   : > { %v1379_v57 = vshrl.u32 %v1377_v13, 16  ;;  %v1382_v33 = vshll.u32 %v1377_v13, 16  ;;  %v1610_v3 = vsel %vm1427_vm0, %v1605_v63, %v1609_v0  ;;  %v9175_v8 = vor.u32 %v1691_v15, %v1690_v9  ;;  %v1390_v15 = vld [vmem:[#allocation3 + $0x38] sm:$0xfc] }
 0x228   : > { %1632 = vrot.lane.b32.xlu0 %v1610_v3, %s11495_s15  ;;  %v2055_v63 = vrot.slane %v9165_v14, 4  ;;  %v1938_v9 = vor.u32 %v1937_v12, %v1936_v1 }
 0x229   : > { %v1381_v22 = vrot.slane %v1379_v57, 5  ;;  %v1384_v35 = vrot.slane %v1382_v33, 6  ;;  %v1693_v54 = vsel %vm1013_vm3, %v1688_v26, %v9175_v8  ;;  %v1534_v33 = vld [vmem:[#allocation3] sm:$0xc0] }
 0x22a   : > { %1713 = vrot.lane.b32.xlu1 %v1693_v54, %s11495_s15  ;;  %v2056_v3 = vor.u32 %v2055_v63, %v2054_v32  ;;  %v9188_v57 = vsel %vm1345_vm4, %v1934_v11, %v1938_v9  ;;  %v1739_v12 = vshrl.u32 %v1534_v33, 16  ;;  %v1742_v11 = vshll.u32 %v1534_v33, 16 }
 0x22b   : > { %v1385_v13 = vor.u32 %v1384_v35, %v1381_v22  ;;  %v1613_v32 = vor.u32 %v9168_v50, %v1609_v0 }
 0x22c   : > { %v9191_v26 = vsel %vm1511_vm11, %v2052_v46, %v2056_v3  ;;  %v1741_v10 = vrot.slane %v1739_v12, 6 }
 0x22d   : > { %v1391_v23 = vsel %vm1389_vm12, %v1385_v13, %v1390_v15  ;;  %1394 = vst.msk [vmem:[#allocation3 + $0x40] sm:$0x1] %vm1180_vm6, %v1385_v13  ;;  %11527 = vst [vmem:[#allocation18_spill] sm:$0xff] %v9191_v26  ;;  %v1744_v26 = vrot.slane %v1742_v11, 7  ;;  %vm2091_vm6 = vcmask 523264  }
 0x22e   : > { %1392 = vst [vmem:[#allocation3 + $0x38] sm:$0xfc] %v1391_v23  ;;  %vm1428_vm12 = vmand %vm1426_vm8, %vm1427_vm0  ;;  %vm1721_vm8 = vcmask 1045504  }
 0x235   : > { %v9193_v54 = vld [vmem:[#allocation3 + $0x38] sm:$0x1f] }
 0x236   : > { %v9195_v20 = vld [vmem:[#allocation3 + $0x38] sm:$0x3f]  ;;  %v1615_v1 = vshll.u32 %v9193_v54, 16  ;;  %v1619_v33 = vshrl.u32 %v9193_v54, 16 }
 0x237   : > { %11528 = vst [vmem:[#allocation19_spill] sm:$0xff] %v9195_v20  ;;  %v9197_v38 = vld [vmem:[#allocation3 + $0x38] sm:$0xff]  ;;  %v1695_v22 = vshrl.u32 %v9195_v20, 16  ;;  %v1698_v35 = vshll.u32 %v9195_v20, 16 }
 0x238   : > { %v9203_v23 = vshrl.u32 %v9197_v38, 16  ;;  %v9206_v46 = vshll.u32 %v9197_v38, 16  ;;  %v1617_v63 = vrot.slane %v1615_v1, 1 }
 0x239   : > { %v1697_v13 = vrot.slane %v1695_v22, 1  ;;  %v1700_v15 = vrot.slane %v1698_v35, 2 }
 0x23a   : > { %v1618_v48 = vsel %vm1427_vm0, %v1613_v32, %v1617_v63  ;;  %v1874_v42 = vrot.slane %v9206_v46, 1  ;;  %v1940_v36 = vrot.slane %v9203_v23, 5  ;;  %v1941_v0 = vrot.slane %v9206_v46, 6 }
 0x23b   : > { %v1701_v5 = vor.u32 %v1700_v15, %v1697_v13  ;;  %1634 = vrot.lane.b32.xlu0 %v1618_v48, %s11495_s15  ;;  %v2058_v48 = vrot.slane %v9203_v23, 3  ;;  %v1621_v12 = vor.u32 %v1619_v33, %v1617_v63  ;;  %v2059_v13 = vrot.slane %v9206_v46, 4 }
 0x23c   : > { %v9220_v22 = vsel %vm1427_vm0, %v1613_v32, %v1874_v42  ;;  %v9223_v35 = vor.u32 %v1874_v42, %v9203_v23  ;;  %v9227_v11 = vor.u32 %v1941_v0, %v1940_v36  ;;  %v1826_v15 = vshrl.u32 %v9213_v16, 16 }
 0x23d   : > { %v1702_v1 = vsel %vm1013_vm3, %v9175_v8, %v1701_v5  ;;  %v2357_v20 = vrot.slane %v9203_v23, 1  ;;  %v2358_v7 = vrot.slane %v9206_v46, 2  ;;  %v9238_v32 = vor.u32 %v2059_v13, %v2058_v48  ;;  %v1437_v13 = vld [vmem:[#allocation2 + $0x158] sm:$0x3f] }
 0x23e   : > { %1715 = vrot.lane.b32.xlu1 %v1702_v1, %s11495_s15  ;;  %v9236_v42 = vsel %vm1345_vm4, %v1938_v9, %v9227_v11  ;;  %v1745_v1 = vor.u32 %v1744_v26, %v1741_v10  ;;  %v1828_v0 = vrot.slane %v1826_v15, 7  ;;  %v1648_v10 = vrot.slane %v8867_v6, 1  ;;  %v7922_v15 = vld [vmem:[%s11472_s3 + $0xc8] sm:$0xff]  }
 0x23f   : > { %1636 = vrot.lane.b32.xlu0 %v1621_v12, %s11495_s15  ;;  %v9240_v63 = vor.u32 %v2358_v7, %v2357_v20  ;;  %v9245_v36 = vsel %vm1511_vm11, %v2056_v3, %v9238_v32  ;;  %v1435_v20 = vld [vmem:[#allocation2 + $0x14a] sm:$0x3f]  ;;  %v1841_v26 = vrot.slane %v9116_v37, 7 }
 0x240   : > { %v1749_v33 = vsel %vm1737_vm13, %v1745_v1, %v8881_v39  ;;  %v1831_v7 = vsel %vm1181_vm7, %v1828_v0, %v8885_v40  ;;  %v1434_v39 = vld [vmem:[#allocation2 + $0x142] sm:$0xff]  ;;  %v1844_v1 = vrot.slane %v9168_v50, 7 }
 0x241   : > { %v9252_v9 = vsel %vm1013_vm3, %v9175_v8, %v9240_v63  ;;  %v1647_v8 = vrot.slane %v8862_v59, 1  ;;  %v1438_v48 = vmax.f32 %v9120_v4, %v1434_v39  ;;  %v1842_v4 = vor.u32 %v1841_v26, %v9113_v28 }
 0x242   : > { %1717 = vrot.lane.b32.xlu1 %v1701_v5, %s11495_s15  ;;  %v1433_v5 = vld [vmem:[#allocation2 + $0x13c] sm:$0x3f] }
 0x243   : > { %1788 = vrot.lane.b32.xlu0 %v1749_v33, %s11495_s15  ;;  %v1439_v12 = vmax.f32 %v1433_v5, %v1435_v20  ;;  %v11529_v33 = vmax.f32 %v8810_v58, 0.0  ;;  %v1763_v5 = vrot.slane %v9113_v28, 7  ;;  %v11530_v58 = vrot.slane %v9015_v53, 7 }
 0x244   : > { %v1845_v20 = vor.u32 %v1844_v1, %v9165_v14  ;;  %v1766_v53 = vrot.slane %v9168_v50, 6  ;;  %v7936_v50 = vld [vmem:[%s11472_s3 + $0x240] sm:$0xff]  }
 0x245   : > { %v9288_v0 = vmax.f32 %v1438_v48, %v11529_v33  ;;  %v1843_v39 = vsel %vm1181_vm7, %v11530_v58, %v1842_v4  ;;  %7355 = vmatprep.subr.bf16.mxu0 %v7936_v50  ;;  %v7927_v33 = vld [vmem:[%s11472_s3 + $0x98] sm:$0xff]   ;;  %v7931_v58 = vld [vmem:[%s11472_s3 + $0xa8] sm:$0xff]   ;;  %v7940_v50 = vld [vmem:[%s11472_s3 + $0x250] sm:$0xff]  }
 0x246   : > { %1858 = vrot.lane.b32.xlu1 %v1831_v7, %s11495_s15  ;;  %v9290_v7 = vmax.f32 %v1439_v12, %v1437_v13  ;;  %v1846_v48 = vsel %vm1181_vm7, %v1841_v26, %v1845_v20  ;;  %v1773_v26 = vrot.slane %v9203_v23, 6 }
 0x247   : > { %1790 = vrot.lane.b32.xlu0 %v8925_v61, %s11495_s15  ;;  %v1649_v61 = vsel %vm1003_vm1, %v1647_v8, %v1648_v10  ;;  %v9307_v8 = vrot.slane %v9203_v23, 7 }
 0x248   : > { %v1623_v3 = vpop.permute.xlu1 %1622  ;;  %v7842_v28 = vpack.i.bf16 %v9290_v7, %v9288_v0 }
 0x249   : > { %v1848_v12 = vor.u32 %v9307_v8, %v9206_v46 }
 0x24a   : > { %1860 = vrot.lane.b32.xlu1 %v8930_v62, %s11495_s15  ;;  %v7921_v62 = vld [vmem:[%s11472_s3 + $0x80] sm:$0xff]  }
 0x24b   : > { %v1704_v40 = vpop.permute.xlu0 %1703  ;;  %1792 = vrot.lane.b32.xlu0 %v8970_v44, %s11495_s15  ;;  %v2093_v44 = vsel %vm2091_vm6, %v8845_v47, %v1623_v3  ;;  %v7923_v47 = vld [vmem:[%s11472_s3 + $0x88] sm:$0xff]   ;;  %v1767_v3 = vrot.slane %v9165_v14, 7  ;;  %v7937_v14 = vld [vmem:[%s11472_s3 + $0x200] sm:$0xff]   ;;  %v1849_v23 = vsel %vm1181_vm7, %v1844_v1, %v1848_v12  ;;  %v1654_v12 = vrot.slane %v9009_v49, 1 }
 0x24c   : > { %v2119_v59 = vsel %vm2091_vm6, %v1649_v61, %v1704_v40  ;;  %v7926_v40 = vld [vmem:[%s11472_s3 + $0xd8] sm:$0xff]   ;;  %v1650_v61 = vrot.slane %v8895_v56, 1  ;;  %7356 = vmatpush3.bf16.msra.mxu0 %v7937_v14  ;;  %v7929_v1 = vld [vmem:[%s11472_s3 + $0xa0] sm:$0xff]   ;;  %v7941_v14 = vld [vmem:[%s11472_s3 + $0x210] sm:$0xff]  }
 0x24d   : > { %3520 = vmatprep.mubr.bf16.mxu1 %v2119_v59  ;;  %v1768_v13 = vor.u32 %v1767_v3, %v1766_v53  ;;  %v7933_v53 = vld [vmem:[%s11472_s3 + $0xb0] sm:$0xff]  }
 0x24e   : > { %1862 = vrot.lane.b32.xlu1 %v8975_v31, %s11495_s15  ;;  %3521 = vmatmul.mubr.bf16.vlgmr.msra.gmra.mrb[0].mxu1 %v2093_v44  ;;  %v1762_v31 = vrot.slane %v9116_v37, 6  ;;  %v7925_v37 = vld [vmem:[%s11472_s3 + $0x90] sm:$0xff]   ;;  %v1651_v4 = vsel %vm1003_vm1, %v1648_v10, %v1650_v61 }
 0x24f   : > { %1794 = vrot.lane.b32.xlu0 %v9056_v29, %s11495_s15  ;;  %7164 = vmatpush3.bf16.msra.mxu1 %v7921_v62  ;;  %v7924_v29 = vld [vmem:[%s11472_s3 + $0xd0] sm:$0xff]  }
 0x250   : > { %7165 = vmatprep.subr.bf16.mxu1 %v7922_v15  ;;  %v1776_v15 = vrot.slane %v9206_v46, 7  ;;  %v7928_v46 = vld [vmem:[%s11472_s3 + $0xe0] sm:$0xff]  }
 0x252   : > { %1864 = vrot.lane.b32.xlu1 %v9062_v34, %s11495_s15  ;;  %v1764_v34 = vor.u32 %v1763_v5, %v1762_v31  ;;  %v9355_v5 = vor.u32 %v1776_v15, %v1773_v26  ;;  %v1655_v26 = vsel %vm1003_vm1, %v8995_v2, %v1654_v12 }
 0x253   : > { %1866 = vrot.lane.b32.xlu0 %v1843_v39, %s11495_s15  ;;  %7166 = vmatpush3.bf16.msra.mxu1 %v7923_v47  ;;  %v7932_v39 = vld [vmem:[%s11472_s3 + $0xf0] sm:$0xff]  }
 0x254   : > { %7167 = vmatprep.subr.bf16.mxu1 %v7924_v29  ;;  %v1765_v59 = vsel %vm1737_vm13, %v9036_v17, %v1764_v34  ;;  %v1769_v10 = vsel %vm1737_vm13, %v1764_v34, %v1768_v13  ;;  %v7930_v29 = vld [vmem:[%s11472_s3 + $0xe8] sm:$0xff]  }
 0x256   : > { %7843 = vrot.lane.b32.xlu1 %v7842_v28, %s11495_s15 }
 0x257   : > { %1868 = vrot.lane.b32.xlu0 %v1846_v48, %s11495_s15  ;;  %7168 = vmatpush3.bf16.msra.mxu1 %v7925_v37  ;;  %v1625_v62 = vpop.permute.xlu1 %1624  ;;  %v1653_v37 = vsel %vm1003_vm1, %v1650_v61, %v8995_v2  ;;  %v7935_v61 = vld [vmem:[%s11472_s3 + $0xb8] sm:$0xff]   ;;  %v7938_v48 = vld [vmem:[%s11472_s3 + $0x248] sm:$0xff]  }
 0x258   : > { %7169 = vmatprep.subr.bf16.mxu1 %v7926_v40  ;;  %v9351_v31 = vsel %vm2091_vm6, %v8867_v6, %v1625_v62  ;;  %v1778_v6 = vsel %vm1737_vm13, %v1768_v13, %v9355_v5  ;;  %v7934_v40 = vld [vmem:[%s11472_s3 + $0xf8] sm:$0xff]   ;;  %7357 = vmatprep.subr.bf16.mxu0 %v7938_v48  ;;  %v7942_v62 = vld [vmem:[%s11472_s3 + $0x140] sm:$0xff]  }
 0x259   : > { %v1706_v44 = vpop.permute.xlu0 %1705 }
 0x25a   : > { %1796 = vrot.lane.b32.xlu1 %v1765_v59, %s11495_s15  ;;  %v2123_v47 = vsel %vm2091_vm6, %v1651_v4, %v1706_v44  ;;  %v1656_v4 = vrot.slane %v9102_v24, 1 }
 0x25b   : > { %3528 = vmatprep.mubr.bf16.mxu1 %v2123_v47  ;;  %1870 = vrot.lane.b32.xlu0 %v1849_v23, %s11495_s15 }
 0x25c   : > { %3529 = vmatmul.mubr.bf16.gmra.mrb[4].mxu1 %v9351_v31  ;;  %v1657_v23 = vsel %vm1003_vm1, %v1654_v12, %v1656_v4 }
 0x25d   : > { %7170 = vmatpush3.bf16.msra.mxu1 %v7927_v33 }
 0x25e   : > { %1798 = vrot.lane.b32.xlu1 %v1769_v10, %s11495_s15  ;;  %7171 = vmatprep.subr.bf16.mxu1 %v7928_v46 }
 0x261   : > { %7172 = vmatpush3.bf16.msra.mxu1 %v7929_v1 }
 0x262   : > { %1800 = vrot.lane.b32.xlu1 %v1778_v6, %s11495_s15  ;;  %7173 = vmatprep.subr.bf16.mxu1 %v7930_v29  ;;  %v1627_v20 = vpop.permute.xlu1 %1626  ;;  %v1416_v6 = vrot.slane %v9134_v51, 1  ;;  %s377_s15 = sand.u32 1, %s8415_s18  }
 0x263   : > { %v9381_v3 = vsel %vm2091_vm6, %v8895_v56, %v1627_v20  ;;  %v7939_v56 = vld [vmem:[%s11472_s3 + $0x208] sm:$0xff]   ;;  %s378_s16 = scalar_lea.vmem [#allocation5], %s377_s15  ;;  %s6595_s12 = scalar_lea.sflag [#allocation6], %s377_s15 }
 0x264   : > { %v1708_v28 = vpop.permute.xlu0 %1707  ;;  %7358 = vmatpush3.bf16.msra.mxu0 %v7939_v56  ;;  %s6607_s24 = sshll.u32 %s378_s16, 4  ;;  %s11429_s24 = int_to_ptr.vmem [resolvable:$true] %s6607_s24 }
 0x265   : > { %v2127_v34 = vsel %vm2091_vm6, %v1653_v37, %v1708_v28  ;;  %7174 = vmatpush3.bf16.msra.mxu1 %v7931_v58  ;;  %7359 = vmatprep.subr.bf16.mxu0 %v7940_v50  ;;  %v9436_v37 = vrot.slane %v9156_v25, 1  ;;  %v1429_v50 = vld [vmem:[#allocation3 + $0x40] sm:$0xfe]  ;;  %s8361_s21 = scalar_lea.vmem %s11429_s24, 16 }
 0x266   : > { %3536 = vmatprep.mubr.bf16.mxu1 %v2127_v34  ;;  %7175 = vmatprep.subr.bf16.mxu1 %v7932_v39  ;;  %p8362_p11 = scmp.ne.s32.totalorder %s11429_s24, %s8361_s21 }
 0x267   : > { %3537 = vmatmul.mubr.bf16.gmra.mrb[8].mxu1 %v9381_v3  ;;  %v1659_v12 = vsel %vm1003_vm1, %v1656_v4, %v9436_v37  ;;  %v7953_v4 = vld [vmem:[%s11472_s3 + $0x258] sm:$0xff]  }
 0x268   : > { %7360 = vmatpush3.bf16.msra.mxu0 %v7941_v14  ;;  %p8363_p12 = pnand %p8362_p11, %p8528_p5 }
 0x269   : > { %7176 = vmatpush3.bf16.msra.mxu1 %v7933_v53  ;;  %7361 = vmatprep.subr.bf16.mxu0 %v7953_v4  ;;  %v1479_v4 = vld [vmem:[#allocation2 + $0x15e] sm:$0xff] }
 0x26a   : > { %7177 = vmatprep.subr.bf16.mxu1 %v7934_v40  ;;  %p8364_p13 = pneg %p8363_p12 }
 0x26d   : > { %7178 = vmatpush3.bf16.msra.mxu1 %v7935_v61 }
 0x26e   : > { %7227 = vmatprep.subr.bf16.mxu1 %v7942_v62 }
 0x280   : > { %v1629_v59 = vpop.permute.xlu1 %1628 }
 0x281   : > { %v9414_v44 = vsel %vm2091_vm6, %v8940_v55, %v1629_v59  ;;  %v1415_v55 = vrot.slane %v9131_v30, 1 }
 0x283   : > { %v1710_v13 = vpop.permute.xlu0 %1709  ;;  %v1417_v34 = vsel %vm1003_vm1, %v1415_v55, %v1416_v6 }
 0x284   : > { %v9409_v15 = vsel %vm2091_vm6, %v1655_v26, %v1710_v13  ;;  %v9457_v26 = vld [vmem:[#allocation3 + $0x8] sm:$0xe0] }
 0x285   : > { %3544 = vmatprep.mubr.bf16.mxu1 %v9409_v15  ;;  %v11498_v46 = vrot.slane %v9409_v15, 4 }
 0x286   : > { %3545 = vmatmul.mubr.bf16.gmra.mrb[12].mxu1 %v9414_v44 }
 0x28f   : > { %v1631_v33 = vpop.permute.xlu1 %1630 }
 0x290   : > { %v9423_v1 = vsel %vm2091_vm6, %v9009_v49, %v1631_v33  ;;  %v7955_v33 = vld [vmem:[%s11472_s3 + $0x218] sm:$0xff]  }
 0x291   : > { %v1712_v47 = vpop.permute.xlu0 %1711  ;;  %7362 = vmatpush3.bf16.msra.mxu0 %v7955_v33  ;;  %v1480_v33 = vld [vmem:[#allocation2 + $0x166] sm:$0x3f] }
 0x292   : > { %v2135_v2 = vsel %vm2091_vm6, %v1657_v23, %v1712_v47 }
 0x293   : > { %v2567_v10 = vrot.slane %v2135_v2, 4  ;;  %3552 = vmatprep.mubr.bf16.mxu1 %v2135_v2  ;;  %v1913_v2 = vshrl.u32 %v9457_v26, 16 }
 0x294   : > { %3553 = vmatmul.mubr.bf16.gmra.mrb[16].mxu1 %v9423_v1 }
 0x295   : > { %v7839_v29 = vpop.permute.xlu0 %7838  ;;  %v9431_v58 = vsel %vm2549_vm10, %v11498_v46, %v2567_v10 }
 0x296   : > { %v7841_v39 = vunpack.i.h.bf16 %v7839_v29  ;;  %v7840_v20 = vunpack.i.l.bf16 %v7839_v29 }
 0x298   : > { %v1414_v28 = vmax.f32 %v9134_v51, %v7841_v39  ;;  %v1413_v49 = vmax.f32 %v9131_v30, %v7840_v20  ;;  %v1660_v39 = vrot.slane %v9193_v54, 1  ;;  %v1478_v54 = vld [vmem:[#allocation2 + $0x158] sm:$0x3f] }
 0x29a   : > { %v1420_v53 = vmax.f32 %v1413_v49, %v1417_v34  ;;  %v1421_v40 = vmax.f32 %v1414_v28, %v1416_v6  ;;  %v1633_v61 = vpop.permute.xlu0 %1632  ;;  %v1916_v6 = vshll.u32 %v9457_v26, 16 }
 0x29b   : > { %v9449_v62 = vsel %vm2091_vm6, %v9102_v24, %v1633_v61 }
 0x29c   : > { %v1422_v48 = vpack.c.bf16 %v1421_v40, %v1420_v53  ;;  %v1714_v56 = vpop.permute.xlu1 %1713 }
 0x29d   : > { %v9443_v51 = vsel %vm2091_vm6, %v1659_v12, %v1714_v56  ;;  %v1918_v56 = vrot.slane %v1916_v6, 6 }
 0x29e   : > { %11531 = vst [vmem:[#allocation20_spill] sm:$0xff] %v9443_v51  ;;  %v1424_v30 = vrot.slane %v1422_v48, 7  ;;  %v11497_v14 = vrot.slane %v9443_v51, 4  ;;  %3560 = vmatprep.mubr.bf16.mxu1 %v9443_v51  ;;  %v1915_v48 = vrot.slane %v1913_v2, 5 }
 0x29f   : > { %3561 = vmatmul.mubr.bf16.gmra.mrb[20].mxu1 %v9449_v62 }
 0x2a0   : > { %v1430_v59 = vsel %vm1428_vm12, %v1424_v30, %v1429_v50  ;;  %v9455_v13 = vsel %vm2549_vm10, %v2567_v10, %v11497_v14  ;;  %v1452_v14 = vrot.slane %v9288_v0, 1  ;;  %vm1470_vm12 = vsmask.f32 7966 }
 0x2a1   : > { %11532 = vst [vmem:[#allocation21_spill] sm:$0xff] %v9455_v13  ;;  %1431 = vst [vmem:[#allocation3 + $0x40] sm:$0xfe] %v1430_v59  ;;  %v1661_v59 = vsel %vm1003_vm1, %v9436_v37, %v1660_v39 }
 0x2a2   : > { %vm9651_vm15 = vmand %vm1258_vm14, %vm1470_vm12  ;;  %vm1517_vm12 = vsmask.f32 7954 }
 0x2a8   : > { %v1538_v47 = vld [vmem:[#allocation3 + $0x40] sm:$0xf] }
 0x2a9   : > { %v9465_v23 = vld [vmem:[#allocation3 + $0x40] sm:$0x7]  ;;  %v1851_v10 = vshrl.u32 %v1538_v47, 16  ;;  %v1854_v28 = vshll.u32 %v1538_v47, 16 }
 0x2aa   : > { %v1780_v55 = vshrl.u32 %v9465_v23, 16  ;;  %v1783_v29 = vshll.u32 %v9465_v23, 16 }
 0x2ab   : > { %v1853_v20 = vrot.slane %v1851_v10, 7 }
 0x2ac   : > { %v1782_v49 = vrot.slane %v1780_v55, 6  ;;  %v1785_v34 = vrot.slane %v1783_v29, 7  ;;  %v1919_v55 = vor.u32 %v1918_v56, %v1915_v48  ;;  %v8346_v29 = vld [vmem:[#allocation2 + $0x150] sm:$0xff] }
 0x2ad   : > { %v1635_v53 = vpop.permute.xlu0 %1634  ;;  %v1856_v40 = vor.u32 %v1854_v28, %v1853_v20  ;;  %v1483_v6 = vmax.f32 %v8346_v29, %v1479_v4  ;;  %v1484_v20 = vmax.f32 %v1478_v54, %v1480_v33  ;;  %v9489_v48 = vld [vmem:[#allocation3 + $0x8] sm:$0xff]  ;;  %v9516_v29 = vld [vmem:[#allocation3 + $0x10] sm:$0xff] }
 0x2ae   : > { %v1786_v61 = vor.u32 %v1785_v34, %v1782_v49  ;;  %v2111_v10 = vsel %vm2091_vm6, %v9156_v25, %v1635_v53  ;;  %v1923_v49 = vsel %vm1345_vm4, %v1919_v55, %v8935_v41  ;;  %v1481_v34 = vld [vmem:[#allocation2 + $0x16c] sm:$0xff]  ;;  %v1809_v56 = vrot.slane %v9489_v48, 7  ;;  %v9508_v55 = vld [vmem:[#allocation3 + $0x8] sm:$0xc0] }
 0x2af   : > { %v1857_v50 = vsel %vm1181_vm7, %v9307_v8, %v1856_v40  ;;  %v1482_v40 = vld [vmem:[#allocation2 + $0x174] sm:$0x3f] }
 0x2b0   : > { %v1716_v12 = vpop.permute.xlu1 %1715  ;;  %v1787_v30 = vsel %vm1737_vm13, %v9355_v5, %v1786_v61  ;;  %1872 = vrot.lane.b32.xlu0 %v1857_v50, %s11533_s22  ;;  %v9494_v50 = vmax.f32 %v1484_v20, %v1482_v40 }
 0x2b1   : > { %1802 = vrot.lane.b32.xlu1 %v1787_v30, %s11533_s22  ;;  %v2143_v47 = vsel %vm2091_vm6, %v1661_v59, %v1716_v12  ;;  %v1637_v2 = vpop.permute.xlu0 %1636  ;;  %v9492_v12 = vmax.f32 %v1483_v6, %v1481_v34  ;;  %v1808_v30 = vrot.slane %v9213_v16, 7  ;;  %v9519_v6 = vrot.slane %v9516_v29, 7 }
 0x2b2   : > { %3568 = vmatprep.mubr.bf16.mxu1 %v2143_v47  ;;  %v1533_v47 = vld [vmem:[#allocation3] sm:$0xfc] }
 0x2b3   : > { %3569 = vmatmul.mubr.bf16.gmra.mrb[24].mxu1 %v2111_v10  ;;  %v1810_v4 = vsel %vm1807_vm9, %v1808_v30, %v1809_v56  ;;  %v7847_v16 = vpack.i.bf16 %v9494_v50, %v9492_v12  ;;  %v1722_v20 = vrot.slane %v1533_v47, 2  ;;  %v1817_v47 = vrot.slane %v9102_v24, 7 }
 0x2b4   : > { %v1718_v28 = vpop.permute.xlu1 %1717  ;;  %1962 = vrot.lane.b32.xlu0 %v1923_v49, %s11533_s22  ;;  %v2002_v49 = vshll.u32 %v9508_v55, 16 }
 0x2b5   : > { %1964 = vrot.lane.b32.xlu1 %v8983_v52, %s11533_s22  ;;  %v2147_v61 = vsel %vm2091_vm6, %v1660_v39, %v1718_v28  ;;  %v1789_v53 = vpop.permute.xlu0 %1788  ;;  %v1529_v52 = vld [vmem:[#allocation3 + $0x38] sm:$0xf]  ;;  %v1539_v39 = vld [vmem:[#allocation3 + $0x40] sm:$0x1f]  ;;  %v1999_v28 = vshrl.u32 %v9508_v55, 16 }
 0x2b6   : > { %3576 = vmatprep.mubr.bf16.mxu1 %v2147_v61  ;;  %v2115_v54 = vsel %vm2091_vm6, %v1529_v52, %v1637_v2  ;;  %v1812_v52 = vsel %vm1807_vm9, %v1809_v56, %v9519_v6  ;;  %v7945_v56 = vld [vmem:[%s11472_s3 + $0x108] sm:$0xff]  }
 0x2b8   : > { %v1859_v41 = vpop.permute.xlu1 %1858  ;;  %1966 = vrot.lane.b32.xlu0 %v9083_v27, %s11533_s22  ;;  %v1878_v27 = vshll.u32 %v1539_v39, 16 }
 0x2b9   : > { %1968 = vrot.lane.b32.xlu1 %v9154_v43, %s11533_s22  ;;  %v9501_v59 = vpop.permute.xlu0 %1790  ;;  %v2183_v33 = vsel %vm2091_vm6, %v1810_v4, %v1859_v41  ;;  %v1723_v43 = vrot.slane %v9489_v48, 2  ;;  %v7944_v48 = vld [vmem:[%s11472_s3 + $0x148] sm:$0xff]   ;;  %v2001_v4 = vrot.slane %v1999_v28, 6  ;;  %v2352_v28 = vshll.u32 %v8991_v45, 16 }
 0x2ba   : > { %v1880_v40 = vrot.slane %v1878_v27, 1  ;;  %v7961_v27 = vld [vmem:[%s11472_s3 + $0x220] sm:$0xff]  }
 0x2bb   : > { %3577 = vmatmul.mubr.bf16.gmra.mrb[28].mxu1 %v2115_v54  ;;  %v1724_v61 = vsel %vm1721_vm8, %v1722_v20, %v1723_v43  ;;  %v1882_v20 = vshrl.u32 %v1539_v39, 16  ;;  %v1453_v39 = vrot.slane %v9290_v7, 1 }
 0x2bc   : > { %v1861_v10 = vpop.permute.xlu1 %1860  ;;  %3616 = vmatprep.mubr.bf16.mxu1 %v2183_v33  ;;  %7848 = vrot.lane.b32.xlu0 %v7847_v16, %s11533_s22  ;;  %v2151_v41 = vsel %vm2091_vm6, %v1724_v61, %v1789_v53  ;;  %v2004_v33 = vrot.slane %v2002_v49, 7  ;;  %v1725_v16 = vrot.slane %v9516_v29, 2  ;;  %v2349_v53 = vshrl.u32 %v8991_v45, 16  ;;  %v7946_v49 = vld [vmem:[%s11472_s3 + $0x150] sm:$0xff]   ;;  %v9563_v61 = vld [vmem:[#allocation3 + $0x18] sm:$0xff] }
 0x2bd   : > { %1970 = vrot.lane.b32.xlu1 %v9188_v57, %s11533_s22  ;;  %v9514_v2 = vpop.permute.xlu0 %1792  ;;  %v7943_v57 = vld [vmem:[%s11472_s3 + $0x100] sm:$0xff]   ;;  %v2187_v54 = vsel %vm2091_vm6, %v1812_v52, %v1861_v10  ;;  %v1819_v52 = vrot.slane %v9156_v25, 7 }
 0x2be   : > { %v7960_v10 = vld [vmem:[%s11472_s3 + $0x260] sm:$0xff]   ;;  %v2005_v46 = vor.u32 %v2004_v33, %v2001_v4  ;;  %v2351_v13 = vrot.slane %v2349_v53, 1  ;;  %v7948_v4 = vld [vmem:[%s11472_s3 + $0x158] sm:$0xff]  }
 0x2bf   : > { %7363 = vmatprep.subr.bf16.mxu0 %v7960_v10  ;;  %v7947_v10 = vld [vmem:[%s11472_s3 + $0x110] sm:$0xff]  }
 0x2c0   : > { %v9523_v34 = vpop.permute.xlu1 %1862  ;;  %1972 = vrot.lane.b32.xlu0 %v9236_v42, %s11533_s22  ;;  %v1881_v42 = vsel %vm1427_vm0, %v9223_v35, %v1880_v40  ;;  %7364 = vmatpush3.bf16.msra.mxu0 %v7961_v27  ;;  %v2354_v27 = vrot.slane %v2352_v28, 2  ;;  %v9597_v28 = vsel %vm1807_vm9, %v1817_v47, %v1819_v52 }
 0x2c1   : > { %1885 = vrot.lane.b32.xlu1 %v9220_v22, %s11533_s22  ;;  %v9537_v30 = vpop.permute.xlu0 %1794 }
 0x2c3   : > { %3617 = vmatmul.mubr.bf16.vlgmr.msra.gmra.mrb[32].mxu1 %v2151_v41  ;;  %v9575_v41 = vsel %vm1807_vm9, %v9071_v60, %v1817_v47 }
 0x2c4   : > { %v9542_v22 = vpop.permute.xlu1 %1864  ;;  %3624 = vmatprep.mubr.bf16.mxu1 %v2187_v54  ;;  %7228 = vmatpush3.bf16.msra.mxu1 %v7943_v57  ;;  %v7962_v54 = vld [vmem:[%s8557_s29 + $0xc0] ss:$0 sps:$4 sm:$0xff]  }
 0x2c5   : > { %1887 = vrot.lane.b32.xlu1 %v1881_v42, %s11533_s22  ;;  %7229 = vmatprep.subr.bf16.mxu1 %v7944_v48  ;;  %v1867_v57 = vpop.permute.xlu0 %1866  ;;  %v1884_v42 = vor.u32 %v1882_v20, %v1880_v40  ;;  %v1726_v48 = vsel %vm1721_vm8, %v1723_v43, %v1725_v16 }
 0x2c6   : > { %7696 = vmatmul.mubr.bf16.gmra.mrb[96].mxu0 %v7962_v54  ;;  %v9583_v43 = vsel %vm2091_vm6, %v9575_v41, %v1867_v57  ;;  %v2155_v53 = vsel %vm2091_vm6, %v1726_v48, %v9501_v59  ;;  %v9600_v57 = vrot.slane %v9197_v38, 7  ;;  %v2006_v38 = vsel %vm1737_vm13, %v2005_v46, %v8913_v19  ;;  %v7950_v19 = vld [vmem:[%s11472_s3 + $0x160] sm:$0xff]  }
 0x2c7   : > { %11534 = vst [vmem:[#allocation22_spill] sm:$0xff] %v9583_v43  ;;  %v11502_v47 = vrot.slane %v9583_v43, 4  ;;  %v1727_v48 = vrot.slane %v9563_v61, 2 }
 0x2c8   : > { %v7844_v45 = vpop.permute.xlu1 %7843  ;;  %7230 = vmatpush3.bf16.msra.mxu1 %v7945_v56  ;;  %v11535_v56 = vrot.slane %v9563_v61, 7  ;;  %11536 = vst [vmem:[#allocation23_spill] sm:$0xff] %v9600_v57 }
 0x2c9   : > { %v7846_v51 = vunpack.i.h.bf16 %v7844_v45  ;;  %v7845_v40 = vunpack.i.l.bf16 %v7844_v45  ;;  %1889 = vrot.lane.b32.xlu1 %v1884_v42, %s11533_s22  ;;  %7231 = vmatprep.subr.bf16.mxu1 %v7946_v49  ;;  %v1869_v33 = vpop.permute.xlu0 %1868  ;;  %v1454_v45 = vsel %vm1003_vm1, %v1452_v14, %v1453_v39  ;;  %v2355_v14 = vor.u32 %v2354_v27, %v2351_v13 }
 0x2ca   : > { %v9594_v20 = vsel %vm1807_vm9, %v9519_v6, %v11535_v56  ;;  %v9609_v42 = vsel %vm2091_vm6, %v9597_v28, %v1869_v33  ;;  %v7952_v56 = vld [vmem:[%s11472_s3 + $0x168] sm:$0xff]  }
 0x2cb   : > { %v1451_v49 = vmax.f32 %v9290_v7, %v7846_v51  ;;  %v1450_v54 = vmax.f32 %v9288_v0, %v7845_v40  ;;  %3625 = vmatmul.mubr.bf16.gmra.mrb[36].mxu1 %v2155_v53  ;;  %v2191_v59 = vsel %vm2091_vm6, %v9594_v20, %v9523_v34  ;;  %v2581_v7 = vrot.slane %v9609_v42, 4  ;;  %v7949_v0 = vld [vmem:[%s11472_s3 + $0x118] sm:$0xff]  }
 0x2cc   : > { %3632 = vmatprep.mubr.bf16.mxu1 %v2191_v59  ;;  %7232 = vmatpush3.bf16.msra.mxu1 %v7947_v10  ;;  %v9626_v10 = vsel %vm1807_vm9, %v1819_v52, %v9600_v57  ;;  %v2356_v33 = vsel %vm1013_vm3, %v2355_v14, %v8954_v21  ;;  %v7951_v52 = vld [vmem:[%s11472_s3 + $0x120] sm:$0xff]   ;;  %v1728_v53 = vsel %vm1721_vm8, %v1725_v16, %v1727_v48 }
 0x2cd   : > { %v1457_v51 = vmax.f32 %v1450_v54, %v1454_v45  ;;  %v1458_v34 = vmax.f32 %v1451_v49, %v1453_v39  ;;  %2020 = vrot.lane.b32.xlu1 %v2006_v38, %s11533_s22  ;;  %7233 = vmatprep.subr.bf16.mxu1 %v7948_v4  ;;  %v1871_v46 = vpop.permute.xlu0 %1870  ;;  %v9631_v40 = vsel %vm2549_vm10, %v11502_v47, %v2581_v7  ;;  %v11541_v54 = vrot.slane %v9563_v61, 7  ;;  %v7963_v21 = vld [vmem:[%s11472_s3 + $0x1c0] sm:$0xff]  }
 0x2ce   : > { %11537 = vst [vmem:[#allocation24_spill] sm:$0xff] %v9631_v40  ;;  %v9635_v4 = vsel %vm2091_vm6, %v9626_v10, %v1871_v46  ;;  %v2159_v49 = vsel %vm2091_vm6, %v1728_v53, %v9514_v2  ;;  %v1547_v53 = vld [vmem:[#allocation3 + $0x10] sm:$0xf8] }
 0x2cf   : > { %v1459_v39 = vpack.c.bf16 %v1458_v34, %v1457_v51  ;;  %11538 = vst [vmem:[#allocation25_spill] sm:$0xff] %v9635_v4  ;;  %v11501_v13 = vrot.slane %v9635_v4, 4  ;;  %v9661_v59 = vsel %vm1807_vm9, %v11541_v54, %v9071_v60  ;;  %v7967_v51 = vld [vmem:[%s11472_s3 + $0x268] sm:$0xff]  }
 0x2d0   : > { %7234 = vmatpush3.bf16.msra.mxu1 %v7949_v0  ;;  %v2195_v0 = vsel %vm2091_vm6, %v9661_v59, %v9542_v22  ;;  %v7968_v60 = vld [vmem:[%s11472_s3 + $0x228] sm:$0xff]   ;;  %7365 = vmatprep.subr.bf16.mxu0 %v7967_v51 }
 0x2d1   : > { %v1461_v27 = vshll.u32 %v1459_v39, 16  ;;  %2378 = vrot.lane.b32.xlu1 %v2356_v33, %s11533_s22  ;;  %7235 = vmatprep.subr.bf16.mxu1 %v7950_v19  ;;  %v9666_v16 = vsel %vm2549_vm10, %v2581_v7, %v11501_v13  ;;  %v1464_v38 = vshrl.u32 %v1459_v39, 16  ;;  %v1472_v34 = vld [vmem:[#allocation3 + $0x40] sm:$0x80]  ;;  %v7956_v39 = vld [vmem:[%s11472_s3 + $0x170] sm:$0xff]   ;;  %v2038_v13 = vshll.u32 %v1547_v53, 16 }
 0x2d2   : > { %11542 = vst [vmem:[#allocation26_spill] sm:$0xff] %v9666_v16  ;;  %v7954_v7 = vld [vmem:[%s11472_s3 + $0x128] sm:$0xff]   ;;  %7366 = vmatpush3.bf16.msra.mxu0 %v7968_v60  ;;  %v7957_v33 = vld [vmem:[%s11472_s3 + $0x130] sm:$0xff]   ;;  %v2035_v60 = vshrl.u32 %v1547_v53, 16 }
 0x2d3   : > { %v1463_v45 = vrot.slane %v1461_v27, 1  ;;  %3633 = vmatmul.mubr.bf16.gmra.mrb[40].mxu1 %v2159_v49  ;;  %v9684_v22 = vld [vmem:[#allocation3 + $0x20] sm:$0xff]  ;;  %v7977_v53 = vld [vmem:[%s11472_s3 + $0x270] sm:$0xff]  }
 0x2d4   : > { %3640 = vmatprep.mubr.bf16.mxu1 %v2195_v0  ;;  %7236 = vmatpush3.bf16.msra.mxu1 %v7951_v52  ;;  %v1729_v14 = vrot.slane %v9684_v22, 2  ;;  %v7958_v52 = vld [vmem:[%s11472_s3 + $0x178] sm:$0xff]  }
 0x2d5   : > { %v1466_v19 = vor.u32 %v1464_v38, %v1463_v45  ;;  %v1473_v46 = vsel %vm9651_vm15, %v1463_v45, %v1472_v34  ;;  %2079 = vrot.lane.b32.xlu1 %v9161_v18, %s11533_s22  ;;  %7237 = vmatprep.subr.bf16.mxu1 %v7952_v56  ;;  %v7959_v56 = vld [vmem:[%s11472_s3 + $0x138] sm:$0xff]   ;;  %v9718_v38 = vpop.permute.xlu1 %1796  ;;  %vm11550_vm15 = vcmask 523270  }
 0x2d6   : > { %1474 = vst [vmem:[#allocation3 + $0x40] sm:$0x80] %v1473_v46  ;;  %v1730_v18 = vsel %vm1721_vm8, %v1727_v48, %v1729_v14  ;;  %7367 = vmatprep.subr.bf16.mxu0 %v7977_v53  ;;  %v11545_v53 = vld [vmem:[#allocation14_spill] sm:$0xff] }
 0x2d7   : > { %1476 = vst.msk [vmem:[#allocation3 + $0x48] sm:$0x3f] %vm1260_vm2, %v1466_v19  ;;  %v2163_v27 = vsel %vm2091_vm6, %v1730_v18, %v9537_v30  ;;  %vm11549_vm2 = vcmask 520192  }
 0x2d8   : > { %7238 = vmatpush3.bf16.msra.mxu1 %v7954_v7  ;;  %vm1512_vm14 = vmand %vm11549_vm2, %vm1511_vm11 }
 0x2d9   : > { %2083 = vrot.lane.b32.xlu1 %v9245_v36, %s11533_s22  ;;  %7239 = vmatprep.subr.bf16.mxu1 %v7956_v39  ;;  %v1731_v36 = vrot.slane %v9102_v24, 2  ;;  %vm1518_vm2 = vmand %vm1342_vm5, %vm1517_vm12 }
 0x2db   : > { %3641 = vmatmul.mubr.bf16.gmra.mrb[44].mxu1 %v2163_v27  ;;  %v1732_v46 = vsel %vm1721_vm8, %v1729_v14, %v1731_v36 }
 0x2dc   : > { %3648 = vmatprep.mubr.bf16.mxu1 %v9583_v43  ;;  %7240 = vmatpush3.bf16.msra.mxu1 %v7957_v33 }
 0x2dd   : > { %v9707_v48 = vld [vmem:[#allocation3 + $0x40] sm:$0xff]  ;;  %7241 = vmatprep.subr.bf16.mxu1 %v7958_v52  ;;  %v2167_v52 = vsel %vm2091_vm6, %v1732_v46, %v9718_v38 }
 0x2de   : > { %v9713_v49 = vshrl.u32 %v9707_v48, 16  ;;  %v9716_v54 = vshll.u32 %v9707_v48, 16  ;;  %v1543_v45 = vld [vmem:[#allocation3 + $0x48] sm:$0x3] }
 0x2df   : > { %v1954_v0 = vshrl.u32 %v1543_v45, 16  ;;  %v1957_v51 = vshll.u32 %v1543_v45, 16 }
 0x2e0   : > { %v2062_v24 = vrot.slane %v9713_v49, 3  ;;  %v2063_v34 = vrot.slane %v9716_v54, 4  ;;  %v1947_v7 = vrot.slane %v9713_v49, 5  ;;  %v1950_v19 = vrot.slane %v9716_v54, 6  ;;  %7242 = vmatpush3.bf16.msra.mxu1 %v7959_v56 }
 0x2e1   : > { %v2316_v39 = vrot.slane %v9716_v54, 1  ;;  %v1956_v33 = vrot.slane %v1954_v0, 5  ;;  %v1959_v18 = vrot.slane %v1957_v51, 6  ;;  %7291 = vmatprep.subr.bf16.mxu1 %v7963_v21  ;;  %v2007_v47 = vrot.slane %v9713_v49, 6  ;;  %v7978_v51 = vld [vmem:[%s11472_s3 + $0x230] sm:$0xff]  }
 0x2e2   : > { %v9728_v27 = vor.u32 %v2063_v34, %v2062_v24  ;;  %v1951_v45 = vor.u32 %v1950_v19, %v1947_v7  ;;  %v2008_v0 = vrot.slane %v9716_v54, 7  ;;  %v2040_v24 = vrot.slane %v2038_v13, 4  ;;  %v9751_v34 = vpop.permute.xlu1 %1798  ;;  %v9753_v7 = vld [vmem:[#allocation3 + $0x10] sm:$0xf0]  ;;  %7368 = vmatpush3.bf16.msra.mxu0 %v7978_v51 }
 0x2e3   : > { %3649 = vmatmul.mubr.bf16.gmra.mrb[48].mxu1 %v2167_v52  ;;  %v9732_v16 = vor.u32 %v2316_v39, %v9713_v49  ;;  %v1960_v21 = vor.u32 %v1959_v18, %v1956_v33  ;;  %v2317_v19 = vsel %vm1427_vm0, %v9223_v35, %v2316_v39  ;;  %v2311_v35 = vshll.u32 %v9753_v7, 16  ;;  %v11543_v52 = vld [vmem:[#allocation9_spill] sm:$0xff] }
 0x2e4   : > { %3656 = vmatprep.mubr.bf16.mxu1 %v9609_v42  ;;  %v2065_v14 = vsel %vm1511_vm11, %v9238_v32, %v9728_v27  ;;  %v1952_v56 = vsel %vm1345_vm4, %v9227_v11, %v1951_v45  ;;  %v1733_v32 = vrot.slane %v9156_v25, 2  ;;  %v2037_v42 = vrot.slane %v2035_v60, 3 }
 0x2e5   : > { %2085 = vrot.lane.b32.xlu1 %v2065_v14, %s11533_s22  ;;  %1974 = vrot.lane.b32.xlu0 %v1952_v56, %s11533_s22  ;;  %v11503_v11 = vrot.slane %v9713_v49, 7  ;;  %v1961_v46 = vsel %vm1345_vm4, %v1951_v45, %v1960_v21  ;;  %v9758_v33 = vor.u32 %v2008_v0, %v2007_v47  ;;  %v7981_v47 = vld [vmem:[%s11472_s3 + $0x278] sm:$0xff]   ;;  %v2313_v21 = vrot.slane %v2311_v35, 1 }
 0x2e6   : > { %v1734_v13 = vsel %vm1721_vm8, %v1731_v36, %v1733_v32  ;;  %v2041_v18 = vor.u32 %v2040_v24, %v2037_v42  ;;  %7369 = vmatprep.subr.bf16.mxu0 %v7981_v47  ;;  %v7982_v45 = vld [vmem:[%s11472_s3 + $0x238] sm:$0xff]   ;;  %v9786_v0 = vpop.permute.xlu1 %1800  ;;  %v1823_v47 = vrot.slane %v9465_v23, 7  ;;  %vm1894_vm4 = vcmask 1042432  }
 0x2e7   : > { %v9763_v25 = vor.u32 %v11503_v11, %v9716_v54  ;;  %v2171_v60 = vsel %vm2091_vm6, %v1734_v13, %v9751_v34  ;;  %v2010_v39 = vsel %vm1737_vm13, %v9355_v5, %v9758_v33  ;;  %v11544_v14 = vld [vmem:[#allocation19_spill] sm:$0xff]  ;;  %7370 = vmatpush3.bf16.msra.mxu0 %v7982_v45  ;;  %v2309_v5 = vshrl.u32 %v9753_v7, 16 }
 0x2e8   : > { %v2045_v36 = vsel %vm1511_vm11, %v2041_v18, %v11543_v52  ;;  %v1735_v56 = vrot.slane %v11544_v14, 2  ;;  %v2361_v13 = vrot.slane %v9713_v49, 1  ;;  %v11547_v18 = vld [vmem:[#allocation18_spill] sm:$0xff]  ;;  %v1824_v45 = vsel %vm1807_vm9, %v9600_v57, %v1823_v47 }
 0x2e9   : > { %2329 = vrot.lane.b32.xlu1 %v2317_v19, %s11533_s22  ;;  %1976 = vrot.lane.b32.xlu0 %v1961_v46, %s11533_s22  ;;  %v2314_v24 = vor.u32 %v2313_v21, %v2309_v5  ;;  %v11546_v19 = vld [vmem:[#allocation8_spill] sm:$0xff] }
 0x2ea   : > { %v1736_v51 = vsel %vm1721_vm8, %v1733_v32, %v1735_v56 }
 0x2eb   : > { %3657 = vmatmul.mubr.bf16.gmra.mrb[52].mxu1 %v2171_v60  ;;  %v2175_v42 = vsel %vm2091_vm6, %v1736_v51, %v9786_v0  ;;  %v2315_v46 = vsel %vm1427_vm0, %v2314_v24, %v11546_v19  ;;  %v2362_v60 = vrot.slane %v9716_v54, 2  ;;  %v9813_v54 = vld [vmem:[%s11472_s3 + $0x300] sm:$0xff]   ;;  %v1895_v51 = vrot.slane %v9457_v26, 5  ;;  %v7965_v26 = vld [vmem:[%s11472_s3 + $0x1c8] sm:$0xff]  }
 0x2ec   : > { %3664 = vmatprep.mubr.bf16.mxu1 %v9635_v4  ;;  %7699 = vmatprep.subr.bf16.mxu0 %v9813_v54 }
 0x2ed   : > { %2022 = vrot.lane.b32.xlu1 %v2010_v39, %s11533_s22  ;;  %2075 = vrot.lane.b32.xlu0 %v2045_v36, %s11533_s22  ;;  %v9801_v35 = vor.u32 %v2362_v60, %v2361_v13  ;;  %v1898_v60 = vrot.slane %v9563_v61, 5 }
 0x2ef   : > { %v2364_v32 = vsel %vm1013_vm3, %v9240_v63, %v9801_v35 }
 0x2f1   : > { %2077 = vrot.lane.b32.xlu0 %v11545_v53, %s11533_s22 }
 0x2f3   : > { %3665 = vmatmul.mubr.bf16.gmra.mrb[56].mxu1 %v2175_v42 }
 0x2f5   : > { %2327 = vrot.lane.b32.xlu0 %v2315_v46, %s11533_s22 }
 0x2f9   : > { %2081 = vrot.lane.b32.xlu0 %v11547_v18, %s11533_s22 }
 0x2fd   : > { %2380 = vrot.lane.b32.xlu0 %v9252_v9, %s11533_s22  ;;  %v1896_v9 = vrot.slane %v9516_v29, 5 }
 0x2ff   : > { %v1897_v19 = vsel %vm1894_vm4, %v1895_v51, %v1896_v9  ;;  %v1899_v47 = vsel %vm1894_vm4, %v1896_v9, %v1898_v60  ;;  %v1900_v51 = vrot.slane %v9684_v22, 5 }
 0x301   : > { %2382 = vrot.lane.b32.xlu0 %v2364_v32, %s11533_s22  ;;  %v7964_v32 = vld [vmem:[%s11472_s3 + $0x180] sm:$0xff]  }
 0x321   : > { %v7115_v39 = vpop.f32.mrb[0].mxu1 }
 0x322   : > { %v7116_v52 = vpop.f32.mrb[1].mxu1  ;;  %v1873_v36 = vpop.permute.xlu0 %1872 }
 0x323   : > { %v9818_v14 = vadd.f32 %v7116_v52, %v7115_v39  ;;  %v7118_v63 = vpop.f32.mrb[2].mxu1  ;;  %v1803_v21 = vpop.permute.xlu1 %1802  ;;  %v2211_v5 = vsel %vm2091_vm6, %v1824_v45, %v1873_v36  ;;  %v1497_v52 = vrot.slane %v9492_v12, 1  ;;  %v1498_v45 = vrot.slane %v9494_v50, 1 }
 0x324   : > { %v7119_v23 = vpop.f32.mrb[3].mxu1  ;;  %3672 = vmatprep.mubr.bf16.mxu1 %v2211_v5  ;;  %v2179_v53 = vsel %vm2091_vm6, %v1735_v56, %v1803_v21 }
 0x325   : > { %v9824_v42 = vadd.f32 %v7119_v23, %v7118_v63  ;;  %3673 = vmatmul.mubr.bf16.gmra.mrb[60].mxu1 %v2179_v53  ;;  %v7966_v63 = vld [vmem:[%s11472_s3 + $0x188] sm:$0xff]  }
 0x326   : > { %v1963_v24 = vpop.permute.xlu0 %1962 }
 0x327   : > { %v1965_v46 = vpop.permute.xlu1 %1964  ;;  %v2224_v13 = vsel %vm2091_vm6, %v1897_v19, %v1963_v24 }
 0x328   : > { %3712 = vmatprep.mubr.bf16.mxu1 %v2224_v13  ;;  %v2228_v39 = vsel %vm2091_vm6, %v1899_v47, %v1965_v46 }
 0x32a   : > { %v1967_v18 = vpop.permute.xlu0 %1966 }
 0x32b   : > { %v9832_v56 = vpop.permute.xlu1 %1968 }
 0x32d   : > { %3713 = vmatmul.mubr.bf16.vlgmr.msra.gmra.mrb[64].mxu1 %v9351_v31  ;;  %v7969_v31 = vld [vmem:[%s11472_s3 + $0x1d0] sm:$0xff]  }
 0x32e   : > { %3720 = vmatprep.mubr.bf16.mxu1 %v2228_v39  ;;  %v7849_v36 = vpop.permute.xlu0 %7848  ;;  %7292 = vmatpush3.bf16.msra.mxu1 %v7964_v32  ;;  %v1499_v32 = vsel %vm1003_vm1, %v1497_v52, %v1498_v45 }
 0x32f   : > { %v9845_v21 = vpop.permute.xlu1 %1970  ;;  %v7851_v5 = vunpack.i.h.bf16 %v7849_v36  ;;  %v7850_v23 = vunpack.i.l.bf16 %v7849_v36  ;;  %v7121_v9 = vpop.f32.mrb[4].mxu1  ;;  %7293 = vmatprep.subr.bf16.mxu1 %v7965_v26  ;;  %v7970_v26 = vld [vmem:[%s11472_s3 + $0x190] sm:$0xff]  }
 0x330   : > { %v7122_v53 = vpop.f32.mrb[5].mxu1 }
 0x331   : > { %v1496_v24 = vmax.f32 %v9494_v50, %v7851_v5  ;;  %v1495_v19 = vmax.f32 %v9492_v12, %v7850_v23  ;;  %v9853_v46 = vadd.f32 %v7122_v53, %v7121_v9  ;;  %v7124_v13 = vpop.f32.mrb[6].mxu1  ;;  %v7971_v12 = vld [vmem:[%s11472_s3 + $0x1d8] sm:$0xff]   ;;  %v1901_v50 = vsel %vm1894_vm4, %v1898_v60, %v1900_v51  ;;  %v9879_v60 = vld [vmem:[#allocation3 + $0x28] sm:$0xff] }
 0x332   : > { %v7125_v47 = vpop.f32.mrb[7].mxu1  ;;  %7294 = vmatpush3.bf16.msra.mxu1 %v7966_v63  ;;  %v2232_v63 = vsel %vm2091_vm6, %v1901_v50, %v1967_v18  ;;  %v7972_v5 = vld [vmem:[%s11472_s3 + $0x198] sm:$0xff]   ;;  %v1902_v18 = vrot.slane %v9879_v60, 5  ;;  %v9883_v53 = vld [vmem:[#allocation3 + $0x48] sm:$0x7] }
 0x333   : > { %v1502_v39 = vmax.f32 %v1495_v19, %v1499_v32  ;;  %v1503_v36 = vmax.f32 %v1496_v24, %v1498_v45  ;;  %v9859_v11 = vadd.f32 %v7125_v47, %v7124_v13  ;;  %v9861_v22 = vpop.permute.xlu1 %1885  ;;  %7295 = vmatprep.subr.bf16.mxu1 %v7969_v31  ;;  %v1513_v45 = vld [vmem:[#allocation3 + $0x50] sm:$0x1f]  ;;  %11551 = vst [vmem:[#allocation19_spill] sm:$0xff] %v9883_v53  ;;  %v7974_v19 = vld [vmem:[%s11472_s3 + $0x1a0] sm:$0xff]   ;;  %v7975_v47 = vld [vmem:[%s11472_s3 + $0x1e8] sm:$0xff]   ;;  %v2015_v50 = vshll.u32 %v9883_v53, 16 }
 0x335   : > { %11548 = vst [vmem:[#allocation9_spill] sm:$0xff] %v9859_v11  ;;  %v1504_v52 = vpack.c.bf16 %v1503_v36, %v1502_v39  ;;  %3721 = vmatmul.mubr.bf16.gmra.mrb[68].mxu1 %v9381_v3  ;;  %v7973_v3 = vld [vmem:[%s11472_s3 + $0x1e0] sm:$0xff]   ;;  %v1903_v36 = vsel %vm1894_vm4, %v1900_v51, %v1902_v18  ;;  %v7976_v51 = vld [vmem:[%s11472_s3 + $0x1a8] sm:$0xff]  }
 0x336   : > { %3728 = vmatprep.mubr.bf16.mxu1 %v2232_v63  ;;  %7296 = vmatpush3.bf16.msra.mxu1 %v7970_v26  ;;  %v2236_v63 = vsel %vm2091_vm6, %v1903_v36, %v9832_v56  ;;  %v7979_v56 = vld [vmem:[%s11472_s3 + $0x1f0] sm:$0xff]  }
 0x337   : > { %v1506_v23 = vrot.slane %v1504_v52, 2  ;;  %v9874_v9 = vpop.permute.xlu1 %1887  ;;  %7297 = vmatprep.subr.bf16.mxu1 %v7971_v12  ;;  %v2012_v12 = vshrl.u32 %v9883_v53, 16 }
 0x339   : > { %1509 = vst.msk [vmem:[#allocation3 + $0x48] sm:$0xc0] %vm11550_vm15, %v1506_v23  ;;  %v1514_v31 = vsel %vm1512_vm14, %v1506_v23, %v1513_v45 }
 0x33a   : > { %1515 = vst [vmem:[#allocation3 + $0x50] sm:$0x1f] %v1514_v31  ;;  %v7127_v24 = vpop.f32.mrb[8].mxu1  ;;  %7298 = vmatpush3.bf16.msra.mxu1 %v7972_v5  ;;  %v9903_v5 = vld [vmem:[#allocation3 + $0x30] sm:$0xff] }
 0x33b   : > { %v9888_v13 = vpop.permute.xlu1 %1889  ;;  %v7128_v32 = vpop.f32.mrb[9].mxu1  ;;  %7299 = vmatprep.subr.bf16.mxu1 %v7973_v3  ;;  %v11507_v23 = vrot.slane %v9903_v5, 5 }
 0x33c   : > { %v9893_v26 = vadd.f32 %v7128_v32, %v7127_v24  ;;  %v7130_v39 = vpop.f32.mrb[10].mxu1  ;;  %v2014_v24 = vrot.slane %v2012_v12, 6  ;;  %v2017_v32 = vrot.slane %v2015_v50, 7  ;;  %v7980_v12 = vld [vmem:[%s11472_s3 + $0x1b0] sm:$0xff]  }
 0x33d   : > { %v7131_v52 = vpop.f32.mrb[11].mxu1  ;;  %3729 = vmatmul.mubr.bf16.gmra.mrb[72].mxu1 %v9414_v44 }
 0x33e   : > { %11552 = vst [vmem:[#allocation14_spill] sm:$0xff] %v9893_v26  ;;  %v9901_v45 = vadd.f32 %v7131_v52, %v7130_v39  ;;  %3736 = vmatprep.mubr.bf16.mxu1 %v2236_v63  ;;  %7300 = vmatpush3.bf16.msra.mxu1 %v7974_v19 }
 0x33f   : > { %v9911_v3 = vpop.permute.xlu1 %2020  ;;  %7301 = vmatprep.subr.bf16.mxu1 %v7975_v47  ;;  %v1905_v47 = vsel %vm1894_vm4, %v1902_v18, %v11507_v23  ;;  %v11555_v18 = vld [vmem:[#allocation10_spill] sm:$0xff] }
 0x340   : > { %11553 = vst [vmem:[#allocation8_spill] sm:$0xff] %v9901_v45  ;;  %v9916_v31 = vld [vmem:[#allocation3 + $0x48] sm:$0xff] }
 0x341   : > { %11554 = vst [vmem:[#allocation18_spill] sm:$0xff] %v9916_v31  ;;  %v1519_v39 = vld [vmem:[#allocation3 + $0x50] sm:$0xf0]  ;;  %v9919_v19 = vshll.u32 %v9916_v31, 16  ;;  %v9922_v36 = vshrl.u32 %v9916_v31, 16  ;;  %v2018_v31 = vor.u32 %v2017_v32, %v2014_v24  ;;  %v11556_v24 = vrot.slane %v9409_v15, 4 }
 0x342   : > { %v1520_v52 = vsel %vm1518_vm2, 0, %v1519_v39  ;;  %v9927_v63 = vld [vmem:[#allocation3 + $0x50] sm:$0x1]  ;;  %7302 = vmatpush3.bf16.msra.mxu1 %v7976_v51  ;;  %v2240_v51 = vsel %vm2091_vm6, %v1905_v47, %v9845_v21  ;;  %v7985_v15 = vld [vmem:[%s11472_s3 + $0x2c0] sm:$0xff]  }
 0x343   : > { %1521 = vst [vmem:[#allocation3 + $0x50] sm:$0xf0] %v1520_v52  ;;  %v2379_v50 = vpop.permute.xlu1 %2378  ;;  %v2319_v4 = vrot.slane %v9919_v19, 1  ;;  %v2069_v40 = vrot.slane %v9922_v36, 3  ;;  %v2072_v43 = vrot.slane %v9919_v19, 4  ;;  %v2365_v39 = vrot.slane %v9922_v36, 1  ;;  %7303 = vmatprep.subr.bf16.mxu1 %v7979_v56 }
 0x344   : > { %v1552_v53 = vld [vmem:[#allocation3 + $0x50] sm:$0x3]  ;;  %v2476_v23 = vsel %vm2091_vm6, %v11555_v18, %v2379_v50  ;;  %v2366_v52 = vrot.slane %v9919_v19, 2  ;;  %v2323_v11 = vshll.u32 %v9927_v63, 16  ;;  %v8354_v50 = vld [vmem:[#allocation3 + $0x18] sm:$0xf8] }
 0x345   : > { %v2553_v57 = vrot.slane %v2476_v23, 4  ;;  %3737 = vmatmul.mubr.bf16.gmra.mrb[76].mxu1 %v9423_v1  ;;  %v2320_v45 = vsel %vm1427_vm0, %v9732_v16, %v2319_v4  ;;  %v2073_v26 = vor.u32 %v2072_v43, %v2069_v40  ;;  %v7983_v56 = vld [vmem:[%s11472_s3 + $0x1f8] sm:$0xff]   ;;  %v2370_v21 = vshrl.u32 %v1552_v53, 16  ;;  %v9958_v40 = vld [vmem:[#allocation3 + $0x38] sm:$0xff] }
 0x346   : > { %3744 = vmatprep.mubr.bf16.mxu1 %v2240_v51  ;;  %2331 = vrot.lane.b32.xlu1 %v2320_v45, %s11533_s22  ;;  %v2367_v47 = vor.u32 %v2366_v52, %v2365_v39  ;;  %v2373_v16 = vshll.u32 %v1552_v53, 16  ;;  %v7984_v43 = vld [vmem:[%s11472_s3 + $0x1b8] sm:$0xff]   ;;  %v1906_v45 = vrot.slane %v9958_v40, 5  ;;  %v2325_v53 = vrot.slane %v2323_v11, 1  ;;  %v8355_v18 = vld [vmem:[#allocation3 + $0x18] sm:$0xfc] }
 0x347   : > { %v2555_v23 = vsel %vm2549_vm10, %v2553_v57, %v11556_v24  ;;  %v2074_v32 = vsel %vm1511_vm11, %v9728_v27, %v2073_v26  ;;  %7304 = vmatpush3.bf16.msra.mxu1 %v7980_v12  ;;  %v2019_v57 = vsel %vm1737_vm13, %v9758_v33, %v2018_v31  ;;  %v2321_v27 = vor.u32 %v2319_v4, %v9922_v36  ;;  %v1973_v12 = vpop.permute.xlu0 %1972 }
 0x348   : > { %3904 = vmatprep.mubr.bf16.mxu0 %v2555_v23  ;;  %2087 = vrot.lane.b32.xlu0 %v2074_v32, %s11533_s22  ;;  %v2435_v39 = vshrl.u32 %v8354_v50, 16  ;;  %v2397_v51 = vshrl.u32 %v8355_v18, 16  ;;  %v2368_v52 = vsel %vm1013_vm3, %v9801_v35, %v2367_v47  ;;  %v2372_v24 = vrot.slane %v2370_v21, 1 }
 0x349   : > { %7305 = vmatprep.subr.bf16.mxu1 %v7983_v56  ;;  %v2375_v23 = vrot.slane %v2373_v16, 2  ;;  %v2400_v32 = vshll.u32 %v8355_v18, 16  ;;  %v11557_v4 = vrot.slane %v9903_v5, 5  ;;  %v2326_v56 = vsel %vm1427_vm0, %v2321_v27, %v2325_v53  ;;  %v11558_v18 = vld [vmem:[#allocation11_spill] sm:$0xff] }
 0x34a   : > { %2024 = vrot.lane.b32.xlu1 %v2019_v57, %s11533_s22  ;;  %v9978_v35 = vld [vmem:[#allocation3 + $0x50] sm:$0xff]  ;;  %v2437_v21 = vrot.slane %v2435_v39, 7  ;;  %v1908_v27 = vrot.slane %v9707_v48, 5  ;;  %v2438_v39 = vshll.u32 %v8354_v50, 16 }
 0x34b   : > { %7306 = vmatpush3.bf16.msra.mxu1 %v7984_v43  ;;  %v1907_v11 = vsel %vm1894_vm4, %v11557_v4, %v1906_v45  ;;  %v2376_v16 = vor.u32 %v2375_v23, %v2372_v24  ;;  %v2399_v43 = vrot.slane %v2397_v51, 6  ;;  %v2402_v57 = vrot.slane %v2400_v32, 7  ;;  %v1542_v23 = vld [vmem:[#allocation3 + $0x48] sm:$0x1] }
 0x34c   : > { %2384 = vrot.lane.b32.xlu0 %v2368_v52, %s11533_s22  ;;  %7419 = vmatprep.subr.bf16.mxu1 %v7985_v15  ;;  %v2244_v31 = vsel %vm2091_vm6, %v1907_v11, %v1973_v12  ;;  %v2441_v15 = vsel %vm1181_vm7, %v2437_v21, %v11558_v18  ;;  %v2445_v52 = vrot.slane %v9922_v36, 7  ;;  %v2449_v12 = vshrl.u32 %v9978_v35, 16 }
 0x34d   : > { %3745 = vmatmul.mubr.bf16.gmra.mrb[80].mxu1 %v9449_v62  ;;  %v2377_v53 = vsel %vm1013_vm3, %v2367_v47, %v2376_v16  ;;  %v2403_v4 = vor.u32 %v2402_v57, %v2399_v43  ;;  %v1909_v47 = vsel %vm1894_vm4, %v1906_v45, %v1908_v27  ;;  %v1910_v50 = vrot.slane %v1542_v23, 5  ;;  %v10003_v16 = vld [vmem:[#allocation3 + $0x50] sm:$0x7f] }
 0x34e   : > { %3752 = vmatprep.mubr.bf16.mxu1 %v2244_v31  ;;  %2333 = vrot.lane.b32.xlu1 %v2326_v56, %s11533_s22  ;;  %v2446_v24 = vor.u32 %v2445_v52, %v9919_v19  ;;  %v2451_v32 = vrot.slane %v2449_v12, 7  ;;  %v2440_v31 = vor.u32 %v2438_v39, %v2437_v21  ;;  %v11559_v43 = vrot.slane %v9713_v49, 7 }
 0x34f   : > { %v2404_v51 = vsel %vm1737_vm13, %v2403_v4, %v9036_v17  ;;  %v2405_v45 = vrot.slane %v9922_v36, 6  ;;  %v2406_v39 = vrot.slane %v9919_v19, 7  ;;  %v2413_v23 = vshll.u32 %v10003_v16, 16 }
 0x350   : > { %2089 = vrot.lane.b32.xlu0 %v2073_v26, %s11533_s22  ;;  %v9992_v26 = vsel %vm2091_vm6, %v9903_v5, %v9861_v22  ;;  %v2452_v22 = vshll.u32 %v9978_v35, 16  ;;  %v2447_v57 = vsel %vm1181_vm7, %v11559_v43, %v2446_v24  ;;  %v2217_v49 = vsel %vm2091_vm6, %v9958_v40, %v9874_v9  ;;  %v8356_v43 = vld [vmem:[#allocation3 + $0x40] sm:$0xf] }
 0x351   : > { %v1911_v24 = vsel %vm1894_vm4, %v1908_v27, %v1910_v50  ;;  %vm11560_vm3 = vcmask 1041408  }
 0x352   : > { %2458 = vrot.lane.b32.xlu1 %v2441_v15, %s11533_s22  ;;  %v2454_v18 = vor.u32 %v2452_v22, %v2451_v32  ;;  %v2415_v22 = vrot.slane %v2413_v23, 7  ;;  %vm11561_vm5 = vmmov %vm11560_vm3 }
 0x353   : > { %vm11566_vm0 = vmmov %vm11560_vm3 }
 0x354   : > { %2386 = vrot.lane.b32.xlu0 %v2377_v53, %s11533_s22  ;;  %v2455_v19 = vsel %vm1181_vm7, %v2445_v52, %v2454_v18  ;;  %v1982_v18 = vrot.slane %v9516_v29, 6  ;;  %v7986_v29 = vld [vmem:[%s11472_s3 + $0x280] sm:$0xff]   ;;  %vm11569_vm11 = vmmov %vm11566_vm0 }
 0x355   : > { %3753 = vmatmul.mubr.bf16.gmra.mrb[84].mxu1 %v9992_v26  ;;  %vm11575_vm4 = vmmov %vm11566_vm0 }
 0x356   : > { %2420 = vrot.lane.b32.xlu1 %v2404_v51, %s11533_s22  ;;  %v2410_v51 = vshrl.u32 %v10003_v16, 16  ;;  %vm11577_vm14 = vmmov %vm11566_vm0 }
 0x357   : > { %v1975_v11 = vpop.permute.xlu0 %1974  ;;  %vm11590_vm15 = vmmov %vm11566_vm0 }
 0x358   : > { %v2248_v56 = vsel %vm2091_vm6, %v1909_v47, %v1975_v11  ;;  %2456 = vrot.lane.b32.xlu0 %v2440_v31, %s11533_s22  ;;  %v2407_v31 = vor.u32 %v2406_v39, %v2405_v45  ;;  %v2412_v9 = vrot.slane %v2410_v51, 6 }
 0x359   : > { %3760 = vmatprep.mubr.bf16.mxu1 %v2248_v56  ;;  %v7133_v17 = vpop.f32.mrb[12].mxu1  ;;  %v1546_v56 = vld [vmem:[#allocation3 + $0x8] sm:$0x80] }
 0x35a   : > { %v7134_v15 = vpop.f32.mrb[13].mxu1  ;;  %2462 = vrot.lane.b32.xlu1 %v2447_v57, %s11533_s22  ;;  %v2028_v27 = vrot.slane %v1546_v56, 7  ;;  %v2416_v52 = vor.u32 %v2415_v22, %v2412_v9  ;;  %v2220_v57 = vsel %vm2091_vm6, %v8356_v43, %v9888_v13  ;;  %v2551_v13 = vrot.slane %v9414_v44, 4  ;;  %v11562_v43 = vld [vmem:[#allocation20_spill] sm:$0xff] }
 0x35b   : > { %v10010_v21 = vadd.f32 %v7134_v15, %v7133_v17  ;;  %v7136_v12 = vpop.f32.mrb[14].mxu1  ;;  %v1977_v53 = vpop.permute.xlu0 %1976  ;;  %v2408_v17 = vsel %vm1737_vm13, %v9758_v33, %v2407_v31  ;;  %v2340_v44 = vrot.slane %v9958_v40, 1  ;;  %v2565_v56 = vrot.slane %v9423_v1, 4  ;;  %v7999_v1 = vld [vmem:[%s11472_s3 + $0x310] sm:$0xff]  }
 0x35c   : > { %v7137_v11 = vpop.f32.mrb[15].mxu1  ;;  %2418 = vrot.lane.b32.xlu0 %v2403_v4, %s11533_s22  ;;  %v2252_v32 = vsel %vm2091_vm6, %v1911_v24, %v1977_v53  ;;  %v2444_v4 = vsel %vm1181_vm7, %v9307_v8, %v9763_v25  ;;  %v2029_v8 = vsel %vm1807_vm9, %v2028_v27, %v9519_v6  ;;  %v2417_v33 = vsel %vm1737_vm13, %v2407_v31, %v2416_v52  ;;  %v7988_v31 = vld [vmem:[%s11472_s3 + $0x288] sm:$0xff]   ;;  %v2080_v27 = vpop.permute.xlu1 %2079  ;;  %vm11567_vm7 = vmmov %vm11566_vm0 }
 0x35d   : > { %v10020_v36 = vadd.f32 %v7137_v11, %v7136_v12  ;;  %3761 = vmatmul.mubr.bf16.gmra.mrb[88].mxu1 %v2217_v49  ;;  %v1981_v6 = vrot.slane %v9508_v55, 6  ;;  %v7987_v55 = vld [vmem:[%s11472_s3 + $0x2c8] sm:$0xff]   ;;  %vm11568_vm13 = vmmov %vm11566_vm0 }
 0x35e   : > { %3768 = vmatprep.mubr.bf16.mxu1 %v2252_v32  ;;  %2464 = vrot.lane.b32.xlu1 %v2455_v19, %s11533_s22 }
 0x35f   : > { %v2076_v47 = vpop.permute.xlu0 %2075  ;;  %v1983_v49 = vsel %vm11560_vm3, %v1981_v6, %v1982_v18 }
 0x360   : > { %2460 = vrot.lane.b32.xlu0 %v2444_v4, %s11533_s22  ;;  %v2283_v25 = vsel %vm2091_vm6, %v2029_v8, %v2076_v47  ;;  %v2256_v19 = vsel %vm2091_vm6, %v1983_v49, %v9911_v3  ;;  %v7994_v47 = vld [vmem:[%s11472_s3 + $0x308] sm:$0xff]   ;;  %v2341_v3 = vsel %vm1003_vm1, %v9436_v37, %v2340_v44  ;;  %v7996_v49 = vld [vmem:[%s11472_s3 + $0x2a0] sm:$0xff]  }
 0x363   : > { %v2078_v50 = vpop.permute.xlu0 %2077 }
 0x364   : > { %2422 = vrot.lane.b32.xlu0 %v2408_v17, %s11533_s22  ;;  %v2286_v4 = vsel %vm2091_vm6, %v9594_v20, %v2078_v50  ;;  %v7990_v20 = vld [vmem:[%s11472_s3 + $0x2d0] sm:$0xff]   ;;  %v2566_v17 = vsel %vm2549_vm10, %v2551_v13, %v2565_v56 }
 0x365   : > { %3769 = vmatmul.mubr.bf16.gmra.mrb[92].mxu1 %v2220_v57  ;;  %v11563_v57 = vrot.slane %v11562_v43, 4 }
 0x366   : > { %3808 = vmatprep.mubr.bf16.mxu1 %v2283_v25  ;;  %v7992_v25 = vld [vmem:[%s11472_s3 + $0x2d8] sm:$0xff]  }
 0x367   : > { %v2328_v15 = vpop.permute.xlu0 %2327  ;;  %v7139_v45 = vpop.f32.mrb[16].mxu1 }
 0x368   : > { %v2467_v12 = vsel %vm2091_vm6, %v9753_v7, %v2328_v15  ;;  %v7140_v53 = vpop.f32.mrb[17].mxu1  ;;  %2424 = vrot.lane.b32.xlu0 %v2417_v33, %s11533_s22 }
 0x369   : > { %v2550_v39 = vrot.slane %v2467_v12, 4  ;;  %v10044_v51 = vadd.f32 %v7140_v53, %v7139_v45  ;;  %v7142_v23 = vpop.f32.mrb[18].mxu1  ;;  %v11564_v12 = vld [vmem:[#allocation21_spill] sm:$0xff] }
 0x36a   : > { %v7143_v11 = vpop.f32.mrb[19].mxu1 }
 0x36b   : > { %v10050_v24 = vadd.f32 %v7143_v11, %v7142_v23  ;;  %v10052_v7 = vpop.permute.xlu0 %2081  ;;  %v2552_v32 = vsel %vm2549_vm10, %v2550_v39, %v2551_v13  ;;  %v2289_v13 = vsel %vm2091_vm6, %v9661_v59, %v2080_v27  ;;  %v2575_v39 = vrot.slane %v9449_v62, 4  ;;  %v2084_v23 = vpop.permute.xlu1 %2083  ;;  %v7995_v11 = vld [vmem:[%s11472_s3 + $0x2e0] sm:$0xff]   ;;  %v11565_v62 = vld [vmem:[#allocation15_spill] sm:$0xff] }
 0x36c   : > { %3905 = vmatmul.mubr.bf16.vlgmr.msra.gmra.mrb[100].mxu0 %v2552_v32  ;;  %v8002_v27 = vld [vmem:[%s11472_s3 + $0x2f8] sm:$0xff]  }
 0x36d   : > { %3912 = vmatprep.mubr.bf16.mxu0 %v9431_v58  ;;  %3809 = vmatmul.mubr.bf16.vlgmr.msra.gmra.mrb[96].mxu1 %v2256_v19  ;;  %v1984_v58 = vrot.slane %v9563_v61, 6  ;;  %v7991_v61 = vld [vmem:[%s11472_s3 + $0x290] sm:$0xff]  }
 0x36e   : > { %3816 = vmatprep.mubr.bf16.mxu1 %v2286_v4  ;;  %7420 = vmatpush3.bf16.msra.mxu1 %v7986_v29  ;;  %v2342_v29 = vrot.slane %v9707_v48, 1 }
 0x36f   : > { %v2381_v9 = vpop.permute.xlu0 %2380  ;;  %7421 = vmatprep.subr.bf16.mxu1 %v7987_v55  ;;  %7700 = vmatpush3.bf16.msra.mxu0 %v9813_v54  ;;  %v1985_v52 = vsel %vm11561_vm5, %v1982_v18, %v1984_v58  ;;  %v8004_v18 = vld [vmem:[%s11472_s3 + $0x318] sm:$0xff]   ;;  %v2086_v32 = vpop.permute.xlu1 %2085  ;;  %v2576_v55 = vsel %vm2549_vm10, %v2565_v56, %v2575_v39  ;;  %v1987_v19 = vsel %vm11566_vm0, %v1984_v58, %v11565_v62  ;;  %v1988_v58 = vrot.slane %v9879_v60, 6 }
 0x370   : > { %v10081_v22 = vsel %vm2091_vm6, %v2341_v3, %v2381_v9  ;;  %7701 = vmatprep.subr.bf16.mxu0 %v7994_v47  ;;  %v2259_v33 = vsel %vm2091_vm6, %v1985_v52, %v9514_v2  ;;  %v7993_v2 = vld [vmem:[%s11472_s3 + $0x298] sm:$0xff]   ;;  %v2343_v4 = vsel %vm1003_vm1, %v2340_v44, %v2342_v29  ;;  %v2292_v3 = vsel %vm2091_vm6, %v9575_v41, %v10052_v7  ;;  %v7998_v9 = vld [vmem:[%s11472_s3 + $0x2a8] sm:$0xff]   ;;  %v8001_v41 = vld [vmem:[%s11472_s3 + $0x2b0] sm:$0xff]  }
 0x371   : > { %v2587_v37 = vrot.slane %v10081_v22, 4  ;;  %v2585_v44 = vrot.slane %v9992_v26, 4  ;;  %v1989_v26 = vsel %vm11567_vm7, %v11565_v62, %v1988_v58  ;;  %v2295_v52 = vsel %vm2091_vm6, %v9597_v28, %v2084_v23  ;;  %v8003_v22 = vld [vmem:[%s11472_s3 + $0x2b8] sm:$0xff]  }
 0x372   : > { %v7145_v50 = vpop.f32.mrb[20].mxu1  ;;  %7422 = vmatpush3.bf16.msra.mxu1 %v7988_v31  ;;  %v2262_v31 = vsel %vm2091_vm6, %v1987_v19, %v9537_v30  ;;  %v8000_v30 = vld [vmem:[%s11472_s3 + $0x2f0] sm:$0xff]   ;;  %v1992_v23 = vrot.slane %v9958_v40, 6 }
 0x373   : > { %v7146_v54 = vpop.f32.mrb[21].mxu1  ;;  %v2588_v8 = vsel %vm2549_vm10, %v11563_v57, %v2587_v37  ;;  %7423 = vmatprep.subr.bf16.mxu1 %v7990_v20  ;;  %7702 = vmatpush3.bf16.msra.mxu0 %v7994_v47  ;;  %v2383_v59 = vpop.permute.xlu0 %2382  ;;  %v7997_v47 = vld [vmem:[%s11472_s3 + $0x2e8] sm:$0xff]   ;;  %v2586_v7 = vsel %vm2549_vm10, %v2575_v39, %v2585_v44 }
 0x374   : > { %v10100_v15 = vadd.f32 %v7146_v54, %v7145_v50  ;;  %3913 = vmatmul.mubr.bf16.gmra.mrb[104].mxu0 %v2566_v17  ;;  %v7148_v45 = vpop.f32.mrb[22].mxu1  ;;  %7703 = vmatprep.subr.bf16.mxu0 %v7999_v1  ;;  %v10137_v56 = vsel %vm2091_vm6, %v2343_v4, %v2383_v59  ;;  %v10171_v54 = vsel %vm2091_vm6, %v1989_v26, %v9718_v38 }
 0x375   : > { %3920 = vmatprep.mubr.bf16.mxu0 %v11564_v12  ;;  %v7149_v53 = vpop.f32.mrb[23].mxu1  ;;  %3817 = vmatmul.mubr.bf16.gmra.mrb[100].mxu1 %v2259_v33  ;;  %v2597_v20 = vrot.slane %v10137_v56, 4 }
 0x376   : > { %v10110_v6 = vadd.f32 %v7149_v53, %v7148_v45  ;;  %3824 = vmatprep.mubr.bf16.mxu1 %v2289_v13  ;;  %7424 = vmatpush3.bf16.msra.mxu1 %v7991_v61  ;;  %v2298_v53 = vsel %vm2091_vm6, %v9626_v10, %v2086_v32 }
 0x377   : > { %7425 = vmatprep.subr.bf16.mxu1 %v7992_v25  ;;  %7704 = vmatpush3.bf16.msra.mxu0 %v7999_v1  ;;  %v2330_v1 = vpop.permute.xlu1 %2329  ;;  %v2598_v61 = vsel %vm2549_vm10, %v2587_v37, %v2597_v20 }
 0x378   : > { %7705 = vmatprep.subr.bf16.mxu0 %v8004_v18  ;;  %v10162_v50 = vsel %vm2091_vm6, %v9958_v40, %v2330_v1 }
 0x379   : > { %v2595_v37 = vrot.slane %v10162_v50, 4 }
 0x37a   : > { %7426 = vmatpush3.bf16.msra.mxu1 %v7993_v2 }
 0x37b   : > { %7427 = vmatprep.subr.bf16.mxu1 %v7995_v11  ;;  %7706 = vmatpush3.bf16.msra.mxu0 %v8004_v18  ;;  %v2596_v28 = vsel %vm2549_vm10, %v2585_v44, %v2595_v37 }
 0x37c   : > { %3921 = vmatmul.mubr.bf16.gmra.mrb[108].mxu0 %v2576_v55 }
 0x37d   : > { %3928 = vmatprep.mubr.bf16.mxu0 %v2588_v8  ;;  %3825 = vmatmul.mubr.bf16.gmra.mrb[104].mxu1 %v2262_v31  ;;  %v1990_v8 = vrot.slane %v9903_v5, 6 }
 0x37e   : > { %3832 = vmatprep.mubr.bf16.mxu1 %v2292_v3  ;;  %7428 = vmatpush3.bf16.msra.mxu1 %v7996_v49 }
 0x37f   : > { %7429 = vmatprep.subr.bf16.mxu1 %v7997_v47  ;;  %v1991_v33 = vsel %vm11568_vm13, %v1988_v58, %v1990_v8  ;;  %v1993_v59 = vsel %vm11569_vm11, %v1990_v8, %v1992_v23 }
 0x380   : > { %v10191_v18 = vsel %vm2091_vm6, %v1991_v33, %v9751_v34  ;;  %v10205_v34 = vld [vmem:[%s11473_s4] ss:$0 sm:$0xff]  ;;  %v10209_v10 = vsel %vm2091_vm6, %v1993_v59, %v9786_v0 }
 0x381   : > { %v3523_v55 = vadd.f32 %v9818_v14, %v10205_v34  ;;  %v3526_v4 = vadd.f32 %v9824_v42, %v10205_v34  ;;  %v3531_v58 = vadd.f32 %v9853_v46, %v10205_v34  ;;  %v11570_v14 = vld [vmem:[#allocation9_spill] sm:$0xff]  ;;  %v11572_v46 = vld [vmem:[#allocation8_spill] sm:$0xff] }
 0x382   : > { %7430 = vmatpush3.bf16.msra.mxu1 %v7998_v9 }
 0x383   : > { %7431 = vmatprep.subr.bf16.mxu1 %v8000_v30 }
 0x384   : > { %3929 = vmatmul.mubr.bf16.gmra.mrb[112].mxu0 %v2586_v7  ;;  %v3534_v7 = vadd.f32 %v11570_v14, %v10205_v34 }
 0x385   : > { %3936 = vmatprep.mubr.bf16.mxu0 %v2598_v61  ;;  %3833 = vmatmul.mubr.bf16.gmra.mrb[108].mxu1 %v10171_v54 }
 0x386   : > { %v7151_v17 = vpop.f32.mrb[24].mxu1  ;;  %3840 = vmatprep.mubr.bf16.mxu1 %v2295_v52  ;;  %7432 = vmatpush3.bf16.msra.mxu1 %v8001_v41  ;;  %v11571_v52 = vld [vmem:[#allocation14_spill] sm:$0xff] }
 0x387   : > { %v7152_v43 = vpop.f32.mrb[25].mxu1  ;;  %7433 = vmatprep.subr.bf16.mxu1 %v8002_v27 }
 0x388   : > { %v10180_v57 = vadd.f32 %v7152_v43, %v7151_v17  ;;  %v7154_v38 = vpop.f32.mrb[26].mxu1  ;;  %v3539_v43 = vadd.f32 %v11571_v52, %v10205_v34 }
 0x389   : > { %v7155_v25 = vpop.f32.mrb[27].mxu1 }
 0x38a   : > { %v10183_v45 = vadd.f32 %v7155_v25, %v7154_v38  ;;  %7434 = vmatpush3.bf16.msra.mxu1 %v8003_v22  ;;  %v3542_v25 = vadd.f32 %v11572_v46, %v10205_v34 }
 0x38c   : > { %3937 = vmatmul.mubr.bf16.gmra.mrb[116].mxu0 %v2596_v28 }
 0x38d   : > { %3841 = vmatmul.mubr.bf16.gmra.mrb[112].mxu1 %v10191_v18 }
 0x38e   : > { %v7157_v12 = vpop.f32.mrb[28].mxu1  ;;  %3848 = vmatprep.mubr.bf16.mxu1 %v2298_v53 }
 0x38f   : > { %v7158_v13 = vpop.f32.mrb[29].mxu1 }
 0x390   : > { %v10196_v2 = vadd.f32 %v7158_v13, %v7157_v12  ;;  %v7160_v39 = vpop.f32.mrb[30].mxu1 }
 0x391   : > { %v7161_v11 = vpop.f32.mrb[31].mxu1  ;;  %v3547_v39 = vadd.f32 %v10010_v21, %v10205_v34  ;;  %v3555_v21 = vadd.f32 %v10044_v51, %v10205_v34  ;;  %v11574_v51 = vld [vmem:[#allocation18_spill] sm:$0xff] }
 0x392   : > { %v2344_v52 = vrot.slane %v11574_v51, 1 }
 0x395   : > { %3849 = vmatmul.mubr.bf16.gmra.mrb[116].mxu1 %v10209_v10 }
 0x396   : > { %v7179_v49 = vpop.f32.mrb[32].mxu1 }
 0x397   : > { %v7180_v32 = vpop.f32.mrb[33].mxu1 }
 0x398   : > { %v7181_v62 = vadd.f32 %v7180_v32, %v7179_v49  ;;  %v7182_v19 = vpop.f32.mrb[34].mxu1  ;;  %v3550_v32 = vadd.f32 %v10020_v36, %v10205_v34 }
 0x399   : > { %v7183_v47 = vpop.f32.mrb[35].mxu1 }
 0x39a   : > { %v10216_v31 = vadd.f32 %v7181_v62, %v3523_v55  ;;  %v7184_v3 = vadd.f32 %v7183_v47, %v7182_v19  ;;  %v2023_v47 = vpop.permute.xlu1 %2022 }
 0x39c   : > { %v10218_v9 = vadd.f32 %v7184_v3, %v3526_v4 }
 0x39e   : > { %v7185_v0 = vpop.f32.mrb[36].mxu1 }
 0x39f   : > { %v7186_v44 = vpop.f32.mrb[37].mxu1 }
 0x3a0   : > { %v7187_v30 = vadd.f32 %v7186_v44, %v7185_v0  ;;  %v7188_v1 = vpop.f32.mrb[38].mxu1  ;;  %v10245_v0 = vrot.slane %v9707_v48, 7 }
 0x3a1   : > { %v7189_v41 = vpop.f32.mrb[39].mxu1 }
 0x3a2   : > { %v10224_v26 = vadd.f32 %v7187_v30, %v3531_v58  ;;  %v7190_v27 = vadd.f32 %v7189_v41, %v7188_v1  ;;  %v10250_v30 = vrot.slane %v9707_v48, 6  ;;  %v3558_v41 = vadd.f32 %v10050_v24, %v10205_v34 }
 0x3a3   : > { %v3566_v48 = vadd.f32 %v10110_v6, %v10205_v34 }
 0x3a4   : > { %v10226_v42 = vadd.f32 %v7190_v27, %v3534_v7  ;;  %v1995_v24 = vsel %vm11575_vm4, %v1992_v23, %v10250_v30 }
 0x3a6   : > { %v7191_v61 = vpop.f32.mrb[40].mxu1 }
 0x3a7   : > { %v7192_v17 = vpop.f32.mrb[41].mxu1 }
 0x3a8   : > { %v7193_v22 = vadd.f32 %v7192_v17, %v7191_v61  ;;  %v7194_v38 = vpop.f32.mrb[42].mxu1  ;;  %v11573_v61 = vld [vmem:[#allocation23_spill] sm:$0xff] }
 0x3a9   : > { %v7195_v8 = vpop.f32.mrb[43].mxu1  ;;  %v10259_v17 = vsel %vm1807_vm9, %v11573_v61, %v10245_v0 }
 0x3aa   : > { %v10232_v28 = vadd.f32 %v7193_v22, %v3539_v43  ;;  %v7196_v33 = vadd.f32 %v7195_v8, %v7194_v38  ;;  %v10270_v38 = vld [vmem:[#allocation3 + $0x40] sm:$0xff] }
 0x3ac   : > { %v10234_v12 = vadd.f32 %v7196_v33, %v3542_v25  ;;  %v10277_v25 = vsel %vm2091_vm6, %v1995_v24, %v2023_v47  ;;  %v879_v33 = vpop.f32.mrb[96].mxu0  ;;  %v2346_v24 = vrot.slane %v9927_v63, 1 }
 0x3ae   : > { %v7197_v53 = vpop.f32.mrb[44].mxu1 }
 0x3af   : > { %v7198_v13 = vpop.f32.mrb[45].mxu1 }
 0x3b0   : > { %v7199_v11 = vadd.f32 %v7198_v13, %v7197_v53  ;;  %v7200_v59 = vpop.f32.mrb[46].mxu1  ;;  %v7697_v13 = vpop.f32.mrb[97].mxu0 }
 0x3b1   : > { %v7201_v49 = vpop.f32.mrb[47].mxu1  ;;  %v11578_v13 = vld [vmem:[#allocation16_spill] sm:$0xff] }
 0x3b2   : > { %v10240_v55 = vadd.f32 %v7199_v11, %v3547_v39  ;;  %v7202_v62 = vadd.f32 %v7201_v49, %v7200_v59  ;;  %v3563_v39 = vadd.f32 %v10100_v15, %v10205_v34  ;;  %v2345_v11 = vsel %vm1003_vm1, %v2342_v29, %v2344_v52  ;;  %v11576_v49 = vld [vmem:[#allocation19_spill] sm:$0xff] }
 0x3b4   : > { %v10242_v19 = vadd.f32 %v7202_v62, %v3550_v32  ;;  %v2032_v32 = vrot.slane %v11576_v49, 7  ;;  %v8359_v62 = vld [vmem:[#allocation3 + $0x48] sm:$0x3]  ;;  %v3571_v49 = vadd.f32 %v10180_v57, %v10205_v34 }
 0x3b6   : > { %v7203_v4 = vpop.f32.mrb[48].mxu1 }
 0x3b7   : > { %v7204_v3 = vpop.f32.mrb[49].mxu1 }
 0x3b8   : > { %v7205_v44 = vadd.f32 %v7204_v3, %v7203_v4  ;;  %v7206_v58 = vpop.f32.mrb[50].mxu1  ;;  %v2332_v1 = vpop.permute.xlu1 %2331  ;;  %v1996_v4 = vrot.slane %v8359_v62, 6 }
 0x3b9   : > { %v7207_v36 = vpop.f32.mrb[51].mxu1  ;;  %v10274_v8 = vsel %vm2091_vm6, %v10270_v38, %v2332_v1 }
 0x3ba   : > { %v10254_v14 = vadd.f32 %v7205_v44, %v3555_v21  ;;  %v7208_v7 = vadd.f32 %v7207_v36, %v7206_v58  ;;  %v2088_v27 = vpop.permute.xlu0 %2087  ;;  %v2605_v47 = vrot.slane %v10274_v8, 4  ;;  %v882_v58 = vpop.f32.mrb[98].mxu0 }
 0x3bb   : > { %v2302_v22 = vsel %vm2091_vm6, %v10259_v17, %v2088_v27 }
 0x3bc   : > { %v10262_v43 = vadd.f32 %v7208_v7, %v3558_v41  ;;  %v2025_v46 = vpop.permute.xlu1 %2024  ;;  %3856 = vmatprep.mubr.bf16.mxu1 %v2302_v22  ;;  %v7698_v7 = vpop.f32.mrb[99].mxu0  ;;  %v2033_v22 = vsel %vm1807_vm9, %v10245_v0, %v2032_v32  ;;  %v2606_v6 = vsel %vm2549_vm10, %v2595_v37, %v2605_v47  ;;  %v2347_v37 = vsel %vm1003_vm1, %v2344_v52, %v2346_v24 }
 0x3bd   : > { %3857 = vmatmul.mubr.bf16.gmra.mrb[120].mxu1 %v10277_v25 }
 0x3be   : > { %v7209_v53 = vpop.f32.mrb[52].mxu1  ;;  %v2385_v59 = vpop.permute.xlu0 %2384 }
 0x3bf   : > { %v7210_v23 = vpop.f32.mrb[53].mxu1  ;;  %v2485_v21 = vsel %vm2091_vm6, %v2345_v11, %v2385_v59 }
 0x3c0   : > { %v7211_v3 = vadd.f32 %v7210_v23, %v7209_v53  ;;  %v7212_v44 = vpop.f32.mrb[54].mxu1  ;;  %v2607_v36 = vrot.slane %v2485_v21, 4  ;;  %v2334_v15 = vpop.permute.xlu1 %2333  ;;  %v1997_v53 = vsel %vm11577_vm14, %v10250_v30, %v1996_v4 }
 0x3c1   : > { %v7213_v1 = vpop.f32.mrb[55].mxu1  ;;  %v2473_v56 = vsel %vm2091_vm6, %v11574_v51, %v2334_v15  ;;  %v2279_v63 = vsel %vm2091_vm6, %v1997_v53, %v2025_v46  ;;  %v3574_v15 = vadd.f32 %v10183_v45, %v10205_v34  ;;  %v11583_v53 = vld [vmem:[#allocation17_spill] sm:$0xff] }
 0x3c2   : > { %v10290_v41 = vadd.f32 %v7211_v3, %v3563_v39  ;;  %v7214_v29 = vadd.f32 %v7213_v1, %v7212_v44  ;;  %v2090_v27 = vpop.permute.xlu0 %2089  ;;  %v2608_v61 = vsel %vm2549_vm10, %v2597_v20, %v2607_v36  ;;  %v2615_v32 = vrot.slane %v2473_v56, 4  ;;  %v11579_v44 = vld [vmem:[#allocation22_spill] sm:$0xff] }
 0x3c3   : > { %3944 = vmatprep.mubr.bf16.mxu0 %v2608_v61  ;;  %v2306_v33 = vsel %vm2091_vm6, %v2033_v22, %v2090_v27  ;;  %v11580_v58 = vrot.slane %v11579_v44, 4  ;;  %v11581_v61 = vld [vmem:[#allocation12_spill] sm:$0xff] }
 0x3c4   : > { %v10298_v8 = vadd.f32 %v7214_v29, %v3566_v48  ;;  %v2459_v20 = vpop.permute.xlu1 %2458  ;;  %3864 = vmatprep.mubr.bf16.mxu1 %v2306_v33  ;;  %3945 = vmatmul.mubr.bf16.gmra.mrb[120].mxu0 %v2606_v6  ;;  %v11582_v22 = vrot.slane %v11581_v61, 7  ;;  %v2616_v33 = vsel %vm2549_vm10, %v2605_v47, %v2615_v32  ;;  %v11586_v44 = vld [vmem:[#allocation24_spill] sm:$0xff]  ;;  %v2430_v61 = vrot.slane %v11574_v51, 7 }
 0x3c5   : > { %v2506_v39 = vsel %vm2091_vm6, %v11578_v13, %v2459_v20  ;;  %3865 = vmatmul.mubr.bf16.gmra.mrb[124].mxu1 %v2279_v63  ;;  %v11584_v63 = vld [vmem:[#allocation13_spill] sm:$0xff] }
 0x3c6   : > { %v7215_v23 = vpop.f32.mrb[56].mxu1  ;;  %v2560_v11 = vrot.slane %v2506_v39, 4  ;;  %v2387_v59 = vpop.permute.xlu0 %2386  ;;  %v1558_v39 = vld [vmem:[#allocation3 + $0x18] sm:$0xf0] }
 0x3c7   : > { %v7216_v50 = vpop.f32.mrb[57].mxu1  ;;  %v2488_v4 = vsel %vm2091_vm6, %v2347_v37, %v2387_v59  ;;  %v8360_v37 = vld [vmem:[#allocation3 + $0x20] sm:$0xff] }
 0x3c8   : > { %v7217_v62 = vadd.f32 %v7216_v50, %v7215_v23  ;;  %v7218_v3 = vpop.f32.mrb[58].mxu1  ;;  %v2617_v21 = vrot.slane %v2488_v4, 4  ;;  %v2572_v1 = vsel %vm2549_vm10, %v2560_v11, %v11580_v58  ;;  %v2421_v29 = vpop.permute.xlu1 %2420  ;;  %v2563_v59 = vrot.slane %v8360_v37, 4 }
 0x3c9   : > { %v7219_v46 = vpop.f32.mrb[59].mxu1  ;;  %v2494_v45 = vsel %vm2091_vm6, %v11583_v53, %v2421_v29  ;;  %v2569_v4 = vrot.slane %v10171_v54, 4  ;;  %v2579_v58 = vrot.slane %v10191_v18, 4  ;;  %v2603_v54 = vrot.slane %v10270_v38, 4  ;;  %v11587_v29 = vld [vmem:[#allocation26_spill] sm:$0xff] }
 0x3ca   : > { %v10320_v48 = vadd.f32 %v7217_v62, %v3571_v49  ;;  %v7220_v52 = vadd.f32 %v7219_v46, %v7218_v3  ;;  %v2457_v7 = vpop.permute.xlu0 %2456  ;;  %v2618_v57 = vsel %vm2549_vm10, %v2607_v36, %v2617_v21  ;;  %v11585_v36 = vrot.slane %v11584_v63, 6 }
 0x3cb   : > { %v2503_v24 = vsel %vm2091_vm6, %v11582_v22, %v2457_v7  ;;  %3952 = vmatprep.mubr.bf16.mxu0 %v2618_v57  ;;  %v2557_v23 = vrot.slane %v2494_v45, 4  ;;  %v2562_v49 = vrot.slane %v1558_v39, 4  ;;  %v2583_v3 = vrot.slane %v9903_v5, 4 }
 0x3cc   : > { %v10323_v27 = vadd.f32 %v7220_v52, %v3574_v15  ;;  %v2559_v6 = vrot.slane %v2503_v24, 4  ;;  %3953 = vmatmul.mubr.bf16.gmra.mrb[124].mxu0 %v2616_v33  ;;  %v2613_v38 = vrot.slane %v11574_v51, 4  ;;  %v2623_v57 = vrot.slane %v9978_v35, 4  ;;  %v11588_v24 = vld [vmem:[#allocation25_spill] sm:$0xff] }
 0x3cd   : > { %3960 = vmatprep.mubr.bf16.mxu0 %v2617_v21  ;;  %v2564_v62 = vsel %vm2549_vm10, %v2562_v49, %v2563_v59  ;;  %v2570_v21 = vsel %vm2549_vm10, %v2557_v23, %v2569_v4  ;;  %v11589_v33 = vrot.slane %v11588_v24, 4  ;;  %v2431_v35 = vsel %vm1807_vm9, %v10245_v0, %v2430_v61 }
 0x3ce   : > { %v2419_v56 = vpop.permute.xlu0 %2418  ;;  %v2561_v20 = vsel %vm2549_vm10, %v2559_v6, %v2560_v11  ;;  %v2573_v11 = vrot.slane %v9879_v60, 4  ;;  %v2593_v60 = vrot.slane %v9958_v40, 4  ;;  %v2589_v40 = vrot.slane %v10209_v10, 4 }
 0x3cf   : > { %v2491_v13 = vsel %vm2091_vm6, %v11585_v36, %v2419_v56  ;;  %4000 = vmatprep.mubr.bf16.mxu1 %v2561_v20  ;;  %v2614_v53 = vsel %vm2549_vm10, %v2603_v54, %v2613_v38  ;;  %v2624_v10 = vsel %vm2549_vm10, %v2613_v38, %v2623_v57  ;;  %v2599_v45 = vrot.slane %v10277_v25, 4 }
 0x3d0   : > { %v2556_v50 = vrot.slane %v2491_v13, 4  ;;  %v2574_v46 = vsel %vm2549_vm10, %v2563_v59, %v2573_v11  ;;  %v2594_v15 = vsel %vm2549_vm10, %v2583_v3, %v2593_v60  ;;  %v2604_v7 = vsel %vm2549_vm10, %v2593_v60, %v2603_v54  ;;  %v1554_v59 = vld [vmem:[#allocation3 + $0x50] sm:$0x3f] }
 0x3d1   : > { %v2590_v22 = vsel %vm2549_vm10, %v2579_v58, %v2589_v40  ;;  %v2392_v20 = vrot.slane %v11574_v51, 6  ;;  %v2432_v63 = vrot.slane %v10003_v16, 7 }
 0x3d2   : > { %v2558_v47 = vsel %vm2549_vm10, %v2556_v50, %v2557_v23  ;;  %v2461_v5 = vpop.permute.xlu0 %2460  ;;  %v2600_v50 = vsel %vm2549_vm10, %v2589_v40, %v2599_v45 }
 0x3d3   : > { %4001 = vmatmul.mubr.bf16.vlgmr.msra.gmra.mrb[128].mxu1 %v2558_v47  ;;  %v2508_v52 = vsel %vm2091_vm6, %v10259_v17, %v2461_v5  ;;  %v2463_v17 = vpop.permute.xlu1 %2462  ;;  %v2393_v23 = vsel %vm11590_vm15, %v10250_v30, %v2392_v20  ;;  %v2433_v0 = vsel %vm1807_vm9, %v2430_v61, %v2432_v63  ;;  %v2394_v47 = vrot.slane %v1554_v59, 6  ;;  %vm11591_vm9 = vmmov %vm11566_vm0 }
 0x3d4   : > { %3961 = vmatmul.mubr.bf16.gmra.mrb[128].mxu0 %v2615_v32  ;;  %4008 = vmatprep.mubr.bf16.mxu1 %v2572_v1  ;;  %v2584_v32 = vsel %vm2549_vm10, %v2573_v11, %v2583_v3  ;;  %v2580_v1 = vsel %vm2549_vm10, %v2569_v4, %v2579_v58  ;;  %v2601_v18 = vrot.slane %v2508_v52, 4  ;;  %v2511_v56 = vsel %vm2091_vm6, %v2431_v35, %v2463_v17 }
 0x3d5   : > { %7707 = vmatprep.mubr.msk.bf16.mxu0 %vm2091_vm6, %v2564_v62  ;;  %v2611_v13 = vrot.slane %v2511_v56, 4  ;;  %v3579_v4 = vadd.f32 %v10196_v2, %v10205_v34  ;;  %v2395_v3 = vsel %vm11591_vm9, %v2392_v20, %v2394_v47 }
 0x3d6   : > { %v2602_v6 = vsel %vm2549_vm10, %v11589_v33, %v2601_v18  ;;  %v2423_v36 = vpop.permute.xlu0 %2422 }
 0x3d7   : > { %v2465_v39 = vpop.permute.xlu1 %2464  ;;  %v2497_v37 = vsel %vm2091_vm6, %v2393_v23, %v2423_v36  ;;  %v2612_v25 = vsel %vm2549_vm10, %v2601_v18, %v2611_v13 }
 0x3d8   : > { %v2514_v51 = vsel %vm2091_vm6, %v2433_v0, %v2465_v39  ;;  %v2609_v16 = vrot.slane %v2497_v37, 4 }
 0x3d9   : > { %v2621_v49 = vrot.slane %v2514_v51, 4 }
 0x3da   : > { %v2425_v62 = vpop.permute.xlu0 %2424 }
 0x3db   : > { %4009 = vmatmul.mubr.bf16.gmra.mrb[132].mxu1 %v2570_v21  ;;  %v2622_v60 = vsel %vm2549_vm10, %v2611_v13, %v2621_v49 }
 0x3dc   : > { %4016 = vmatprep.mubr.bf16.mxu1 %v11586_v44  ;;  %7708 = vmatmul.mubr.msk.bf16.vlgmr.msra.gmra.mrb[132].mxu0 %vm2091_vm6, %v2574_v46  ;;  %v2610_v44 = vsel %vm2549_vm10, %v2599_v45, %v2609_v16 }
 0x3dd   : > { %7711 = vmatprep.mubr.msk.bf16.mxu0 %vm2091_vm6, %v2584_v32  ;;  %v2500_v32 = vsel %vm2091_vm6, %v2395_v3, %v2425_v62 }
 0x3de   : > { %v2619_v5 = vrot.slane %v2500_v32, 4 }
 0x3e0   : > { %v2620_v34 = vsel %vm2549_vm10, %v2609_v16, %v2619_v5 }
 0x3e3   : > { %4017 = vmatmul.mubr.bf16.gmra.mrb[136].mxu1 %v2580_v1 }
 0x3e4   : > { %4024 = vmatprep.mubr.bf16.mxu1 %v11587_v29  ;;  %7712 = vmatmul.mubr.msk.bf16.gmra.mrb[136].mxu0 %vm2091_vm6, %v2594_v15 }
 0x3e5   : > { %7715 = vmatprep.mubr.msk.bf16.mxu0 %vm2091_vm6, %v2604_v7 }
 0x3eb   : > { %4025 = vmatmul.mubr.bf16.gmra.mrb[140].mxu1 %v2590_v22 }
 0x3ec   : > { %4032 = vmatprep.mubr.bf16.mxu1 %v2602_v6  ;;  %7716 = vmatmul.mubr.msk.bf16.gmra.mrb[140].mxu0 %vm2091_vm6, %v2614_v53 }
 0x3ed   : > { %7719 = vmatprep.mubr.msk.bf16.mxu0 %vm2091_vm6, %v2624_v10 }
 0x3f3   : > { %4033 = vmatmul.mubr.bf16.gmra.mrb[144].mxu1 %v2600_v50 }
 0x3f4   : > { %4040 = vmatprep.mubr.bf16.mxu1 %v2612_v25  ;;  %7720 = vmatmul.mubr.msk.bf16.gmra.mrb[144].mxu0 %vm2091_vm6, %v2623_v57 }
 0x3f8   : > { %v7221_v30 = vpop.f32.mrb[60].mxu1 }
 0x3f9   : > { %v7222_v11 = vpop.f32.mrb[61].mxu1 }
 0x3fa   : > { %v7223_v21 = vadd.f32 %v7222_v11, %v7221_v30  ;;  %v7224_v46 = vpop.f32.mrb[62].mxu1 }
 0x3fb   : > { %v7225_v58 = vpop.f32.mrb[63].mxu1  ;;  %4041 = vmatmul.mubr.bf16.gmra.mrb[148].mxu1 %v2610_v44 }
 0x3fc   : > { %v10390_v54 = vadd.f32 %v7223_v21, %v3579_v4  ;;  %4048 = vmatprep.mubr.bf16.mxu1 %v2622_v60 }
 0x400   : > { %v7243_v1 = vpop.f32.mrb[64].mxu1 }
 0x401   : > { %v7244_v15 = vpop.f32.mrb[65].mxu1 }
 0x402   : > { %v7245_v52 = vadd.f32 %v7244_v15, %v7243_v1  ;;  %v7246_v2 = vpop.f32.mrb[66].mxu1 }
 0x403   : > { %v7247_v29 = vpop.f32.mrb[67].mxu1  ;;  %4049 = vmatmul.mubr.bf16.gmra.mrb[152].mxu1 %v2620_v34 }
 0x404   : > { %v10394_v7 = vadd.f32 %v7245_v52, %v10216_v31  ;;  %v7248_v40 = vadd.f32 %v7247_v29, %v7246_v2  ;;  %4056 = vmatprep.mubr.bf16.mxu1 %v2621_v49 }
 0x406   : > { %v10397_v18 = vadd.f32 %v7248_v40, %v10218_v9 }
 0x408   : > { %v7249_v38 = vpop.f32.mrb[68].mxu1 }
 0x409   : > { %v7250_v57 = vpop.f32.mrb[69].mxu1 }
 0x40a   : > { %v7251_v61 = vadd.f32 %v7250_v57, %v7249_v38  ;;  %v7252_v22 = vpop.f32.mrb[70].mxu1 }
 0x40b   : > { %v7253_v17 = vpop.f32.mrb[71].mxu1  ;;  %4057 = vmatmul.mubr.bf16.gmra.mrb[156].mxu1 %v2619_v5 }
 0x40c   : > { %v10400_v24 = vadd.f32 %v7251_v61, %v10224_v26  ;;  %v7254_v33 = vadd.f32 %v7253_v17, %v7252_v22 }
 0x40e   : > { %v10403_v6 = vadd.f32 %v7254_v33, %v10226_v42 }
 0x410   : > { %v7255_v31 = vpop.f32.mrb[72].mxu1 }
 0x411   : > { %v7256_v53 = vpop.f32.mrb[73].mxu1 }
 0x412   : > { %v7257_v10 = vadd.f32 %v7256_v53, %v7255_v31  ;;  %v7258_v35 = vpop.f32.mrb[74].mxu1 }
 0x413   : > { %v7259_v45 = vpop.f32.mrb[75].mxu1 }
 0x414   : > { %v10406_v9 = vadd.f32 %v7257_v10, %v10232_v28  ;;  %v7260_v56 = vadd.f32 %v7259_v45, %v7258_v35 }
 0x416   : > { %v10409_v20 = vadd.f32 %v7260_v56, %v10234_v12 }
 0x418   : > { %v7261_v63 = vpop.f32.mrb[76].mxu1 }
 0x419   : > { %v7262_v36 = vpop.f32.mrb[77].mxu1 }
 0x41a   : > { %v7263_v26 = vadd.f32 %v7262_v36, %v7261_v63  ;;  %v7264_v13 = vpop.f32.mrb[78].mxu1 }
 0x41b   : > { %v7265_v39 = vpop.f32.mrb[79].mxu1 }
 0x41c   : > { %v10412_v42 = vadd.f32 %v7263_v26, %v10240_v55  ;;  %v7266_v23 = vadd.f32 %v7265_v39, %v7264_v13 }
 0x41e   : > { %v10415_v50 = vadd.f32 %v7266_v23, %v10242_v19 }
 0x420   : > { %v7267_v0 = vpop.f32.mrb[80].mxu1 }
 0x421   : > { %v7268_v37 = vpop.f32.mrb[81].mxu1 }
 0x422   : > { %v7269_v28 = vadd.f32 %v7268_v37, %v7267_v0  ;;  %v7270_v59 = vpop.f32.mrb[82].mxu1 }
 0x423   : > { %v7271_v25 = vpop.f32.mrb[83].mxu1 }
 0x424   : > { %v10418_v12 = vadd.f32 %v7269_v28, %v10254_v14  ;;  %v7272_v51 = vadd.f32 %v7271_v25, %v7270_v59 }
 0x426   : > { %v10421_v16 = vadd.f32 %v7272_v51, %v10262_v43 }
 0x428   : > { %v7273_v47 = vpop.f32.mrb[84].mxu1 }
 0x429   : > { %v7274_v49 = vpop.f32.mrb[85].mxu1 }
 0x42a   : > { %v7275_v55 = vadd.f32 %v7274_v49, %v7273_v47  ;;  %v7276_v62 = vpop.f32.mrb[86].mxu1 }
 0x42b   : > { %v7277_v30 = vpop.f32.mrb[87].mxu1 }
 0x42c   : > { %v10424_v19 = vadd.f32 %v7275_v55, %v10290_v41  ;;  %v7278_v11 = vadd.f32 %v7277_v30, %v7276_v62 }
 0x42e   : > { %v10427_v4 = vadd.f32 %v7278_v11, %v10298_v8 }
 0x430   : > { %v7279_v3 = vpop.f32.mrb[88].mxu1 }
 0x431   : > { %v7280_v21 = vpop.f32.mrb[89].mxu1 }
 0x432   : > { %v7281_v14 = vadd.f32 %v7280_v21, %v7279_v3  ;;  %v7282_v46 = vpop.f32.mrb[90].mxu1 }
 0x433   : > { %v7283_v44 = vpop.f32.mrb[91].mxu1 }
 0x434   : > { %v10430_v43 = vadd.f32 %v7281_v14, %v10320_v48  ;;  %v7284_v32 = vadd.f32 %v7283_v44, %v7282_v46 }
 0x436   : > { %v10433_v58 = vadd.f32 %v7284_v32, %v10323_v27 }
 0x438   : > { %v7285_v60 = vpop.f32.mrb[92].mxu1 }
 0x439   : > { %v7286_v5 = vpop.f32.mrb[93].mxu1 }
 0x43a   : > { %v7287_v41 = vadd.f32 %v7286_v5, %v7285_v60  ;;  %v7288_v1 = vpop.f32.mrb[94].mxu1 }
 0x43b   : > { %v7289_v15 = vpop.f32.mrb[95].mxu1 }
 0x43c   : > { %v10436_v8 = vadd.f32 %v7287_v41, %v10390_v54 }
 0x43f   : > { %v7371_v52 = vpop.f32.mrb[100].mxu0 }
 0x440   : > { %v7372_v2 = vpop.f32.mrb[101].mxu0  ;;  %v7307_v34 = vpop.f32.mrb[96].mxu1 }
 0x441   : > { %v7373_v29 = vadd.f32 %v7372_v2, %v7371_v52  ;;  %v7374_v40 = vpop.f32.mrb[102].mxu0  ;;  %v7308_v38 = vpop.f32.mrb[97].mxu1 }
 0x442   : > { %v7309_v48 = vadd.f32 %v7308_v38, %v7307_v34  ;;  %v7375_v57 = vpop.f32.mrb[103].mxu0  ;;  %v7310_v61 = vpop.f32.mrb[98].mxu1 }
 0x443   : > { %v7376_v22 = vadd.f32 %v7375_v57, %v7374_v40  ;;  %v7311_v27 = vpop.f32.mrb[99].mxu1 }
 0x444   : > { %v3811_v17 = vadd.f32 %v7309_v48, %v10394_v7  ;;  %v7312_v33 = vadd.f32 %v7311_v27, %v7310_v61 }
 0x446   : > { %v3814_v31 = vadd.f32 %v7312_v33, %v10397_v18  ;;  %v10440_v53 = vadd.f32 %v7373_v29, %v3811_v17 }
 0x447   : > { %v7377_v54 = vpop.f32.mrb[104].mxu0 }
 0x448   : > { %v7378_v10 = vpop.f32.mrb[105].mxu0  ;;  %v7313_v35 = vpop.f32.mrb[100].mxu1  ;;  %v10442_v45 = vadd.f32 %v7376_v22, %v3814_v31 }
 0x449   : > { %v7379_v56 = vadd.f32 %v7378_v10, %v7377_v54  ;;  %v7380_v63 = vpop.f32.mrb[106].mxu0  ;;  %v7314_v36 = vpop.f32.mrb[101].mxu1 }
 0x44a   : > { %v7315_v26 = vadd.f32 %v7314_v36, %v7313_v35  ;;  %v7381_v13 = vpop.f32.mrb[107].mxu0  ;;  %v7316_v39 = vpop.f32.mrb[102].mxu1 }
 0x44b   : > { %v7382_v23 = vadd.f32 %v7381_v13, %v7380_v63  ;;  %v7317_v0 = vpop.f32.mrb[103].mxu1 }
 0x44c   : > { %v3819_v7 = vadd.f32 %v7315_v26, %v10400_v24  ;;  %v7318_v37 = vadd.f32 %v7317_v0, %v7316_v39 }
 0x44e   : > { %v3822_v18 = vadd.f32 %v7318_v37, %v10403_v6  ;;  %v10446_v28 = vadd.f32 %v7379_v56, %v3819_v7 }
 0x44f   : > { %v7383_v59 = vpop.f32.mrb[108].mxu0 }
 0x450   : > { %v7384_v25 = vpop.f32.mrb[109].mxu0  ;;  %v7319_v51 = vpop.f32.mrb[104].mxu1  ;;  %v10448_v47 = vadd.f32 %v7382_v23, %v3822_v18 }
 0x451   : > { %v7385_v49 = vadd.f32 %v7384_v25, %v7383_v59  ;;  %v7386_v55 = vpop.f32.mrb[110].mxu0  ;;  %v7320_v62 = vpop.f32.mrb[105].mxu1 }
 0x452   : > { %v7321_v30 = vadd.f32 %v7320_v62, %v7319_v51  ;;  %v7387_v11 = vpop.f32.mrb[111].mxu0  ;;  %v7322_v3 = vpop.f32.mrb[106].mxu1  ;;  %v8033_v62 = vld [vmem:[%s11474_s5 + $0x8] ss:$12 sps:$4 sm:$0xff]  }
 0x453   : > { %v7388_v21 = vadd.f32 %v7387_v11, %v7386_v55  ;;  %v7323_v14 = vpop.f32.mrb[107].mxu1  ;;  %v8032_v55 = vld [vmem:[%s11474_s5 + $0xc8] ss:$12 sps:$4 sm:$0xff]   ;;  %v8037_v11 = vld [vmem:[%s11474_s5 + $0xe0] ss:$12 sps:$4 sm:$0xff]  }
 0x454   : > { %v3827_v24 = vadd.f32 %v7321_v30, %v10406_v9  ;;  %v7324_v46 = vadd.f32 %v7323_v14, %v7322_v3  ;;  %v8011_v30 = vld [vmem:[%s11474_s5 + $0x30] ss:$12 sps:$4 sm:$0xff]   ;;  %v8016_v3 = vld [vmem:[%s11474_s5 + $0x4c] ss:$12 sps:$4 sm:$0xff]   ;;  %7495 = vmatprep.subr.bf16.mxu0 %v8032_v55  ;;  %v8041_v55 = vld [vmem:[%s11474_s5 + $0xf4] ss:$12 sps:$4 sm:$0xff]  }
 0x455   : > { %7496 = vmatpush3.bf16.msra.mxu0 %v8033_v62  ;;  %v8042_v14 = vld [vmem:[%s11474_s5 + $0xf8] ss:$12 sps:$4 sm:$0xff]  }
 0x456   : > { %v3830_v6 = vadd.f32 %v7324_v46, %v10409_v20  ;;  %v10452_v44 = vadd.f32 %v7385_v49, %v3827_v24  ;;  %v8010_v49 = vld [vmem:[%s11474_s5 + $0x1c] ss:$12 sps:$4 sm:$0xff]   ;;  %7497 = vmatprep.subr.bf16.mxu0 %v8037_v11  ;;  %v8019_v46 = vld [vmem:[%s11474_s5 + $0x64] ss:$12 sps:$4 sm:$0xff]  }
 0x457   : > { %v7389_v32 = vpop.f32.mrb[112].mxu0  ;;  %v8014_v24 = vld [vmem:[%s11474_s5 + $0x48] ss:$12 sps:$4 sm:$0xff]  }
 0x458   : > { %v7390_v60 = vpop.f32.mrb[113].mxu0  ;;  %v7325_v5 = vpop.f32.mrb[108].mxu1  ;;  %v10454_v41 = vadd.f32 %v7388_v21, %v3830_v6  ;;  %v8038_v21 = vld [vmem:[%s11474_s5 + $0x20] ss:$12 sps:$4 sm:$0xff]   ;;  %v8043_v6 = vld [vmem:[%s11474_s5 + $0x38] ss:$12 sps:$4 sm:$0xff]  }
 0x459   : > { %v7391_v1 = vadd.f32 %v7390_v60, %v7389_v32  ;;  %v7392_v15 = vpop.f32.mrb[114].mxu0  ;;  %v7326_v52 = vpop.f32.mrb[109].mxu1  ;;  %7498 = vmatpush3.bf16.msra.mxu0 %v8038_v21  ;;  %v8047_v32 = vld [vmem:[%s11474_s5 + $0x110] ss:$12 sps:$4 sm:$0xff]   ;;  %v8017_v60 = vld [vmem:[%s11474_s5 + $0x60] ss:$12 sps:$4 sm:$0xff]  }
 0x45a   : > { %v7327_v2 = vadd.f32 %v7326_v52, %v7325_v5  ;;  %v7393_v34 = vpop.f32.mrb[115].mxu0  ;;  %v7328_v29 = vpop.f32.mrb[110].mxu1  ;;  %7499 = vmatprep.subr.bf16.mxu0 %v8042_v14  ;;  %v8022_v5 = vld [vmem:[%s11474_s5 + $0x7c] ss:$12 sps:$4 sm:$0xff]   ;;  %v8020_v52 = vld [vmem:[%s11474_s5 + $0x78] ss:$12 sps:$4 sm:$0xff]  }
 0x45b   : > { %v7394_v40 = vadd.f32 %v7393_v34, %v7392_v15  ;;  %v7329_v38 = vpop.f32.mrb[111].mxu1  ;;  %v8052_v15 = vld [vmem:[%s11474_s5 + $0x128] ss:$12 sps:$4 sm:$0xff]   ;;  %v8046_v14 = vld [vmem:[%s11474_s5 + $0x10c] ss:$12 sps:$4 sm:$0xff]  }
 0x45c   : > { %v3835_v9 = vadd.f32 %v7327_v2, %v10412_v42  ;;  %v7330_v48 = vadd.f32 %v7329_v38, %v7328_v29  ;;  %v8025_v2 = vld [vmem:[%s11474_s5 + $0x94] ss:$12 sps:$4 sm:$0xff]  }
 0x45d   : > { %7500 = vmatpush3.bf16.msra.mxu0 %v8043_v6  ;;  %v8053_v29 = vld [vmem:[%s11474_s5 + $0x68] ss:$12 sps:$4 sm:$0xff]   ;;  %v8057_v38 = vld [vmem:[%s11474_s5 + $0x140] ss:$12 sps:$4 sm:$0xff]  }
 0x45e   : > { %v3838_v20 = vadd.f32 %v7330_v48, %v10415_v50  ;;  %v10458_v57 = vadd.f32 %v7391_v1, %v3835_v9  ;;  %v8048_v1 = vld [vmem:[%s11474_s5 + $0x50] ss:$12 sps:$4 sm:$0xff]   ;;  %7501 = vmatprep.subr.bf16.mxu0 %v8047_v32  ;;  %v8044_v6 = vld [vmem:[%s11474_s5 + $0x108] ss:$12 sps:$4 sm:$0xff]  }
 0x45f   : > { %v7395_v61 = vpop.f32.mrb[116].mxu0 }
 0x460   : > { %v7396_v22 = vpop.f32.mrb[117].mxu0  ;;  %v7331_v27 = vpop.f32.mrb[112].mxu1  ;;  %v10460_v17 = vadd.f32 %v7394_v40, %v3838_v20  ;;  %v8023_v20 = vld [vmem:[%s11474_s5 + $0x90] ss:$12 sps:$4 sm:$0xff]  }
 0x461   : > { %v7397_v33 = vadd.f32 %v7396_v22, %v7395_v61  ;;  %v7398_v31 = vpop.f32.mrb[118].mxu0  ;;  %v7332_v54 = vpop.f32.mrb[113].mxu1  ;;  %7502 = vmatpush3.bf16.msra.mxu0 %v8048_v1  ;;  %v8028_v22 = vld [vmem:[%s11474_s5 + $0xac] ss:$12 sps:$4 sm:$0xff]  }
 0x462   : > { %v7333_v10 = vadd.f32 %v7332_v54, %v7331_v27  ;;  %v7399_v35 = vpop.f32.mrb[119].mxu0  ;;  %v7334_v56 = vpop.f32.mrb[114].mxu1  ;;  %7503 = vmatprep.subr.bf16.mxu0 %v8052_v15  ;;  %v8062_v54 = vld [vmem:[%s11474_s5 + $0x158] ss:$12 sps:$4 sm:$0xff]  }
 0x463   : > { %v7400_v63 = vadd.f32 %v7399_v35, %v7398_v31  ;;  %v7335_v36 = vpop.f32.mrb[115].mxu1  ;;  %v8058_v31 = vld [vmem:[%s11474_s5 + $0x80] ss:$12 sps:$4 sm:$0xff]   ;;  %v8026_v35 = vld [vmem:[%s11474_s5 + $0xa8] ss:$12 sps:$4 sm:$0xff]  }
 0x464   : > { %v3843_v42 = vadd.f32 %v7333_v10, %v10418_v12  ;;  %v7336_v26 = vadd.f32 %v7335_v36, %v7334_v56  ;;  %v8005_v12 = vld [vmem:[%s11474_s5] ss:$12 sps:$4 sm:$0xff]  }
 0x465   : > { %7504 = vmatpush3.bf16.msra.mxu0 %v8053_v29 }
 0x466   : > { %v3846_v50 = vadd.f32 %v7336_v26, %v10421_v16  ;;  %v10464_v13 = vadd.f32 %v7397_v33, %v3843_v42  ;;  %v8007_v16 = vld [vmem:[%s11474_s5 + $0x4] ss:$12 sps:$4 sm:$0xff]   ;;  %7505 = vmatprep.subr.bf16.mxu0 %v8057_v38 }
 0x467   : > { %5737 = vmatprep.subr.bf16.mxu1 %v8007_v16  ;;  %v8063_v42 = vld [vmem:[%s11474_s5 + $0x98] ss:$12 sps:$4 sm:$0xff]   ;;  %v8036_v16 = vld [vmem:[%s11474_s5 + $0xdc] ss:$12 sps:$4 sm:$0xff]  }
 0x468   : > { %v7337_v39 = vpop.f32.mrb[116].mxu1  ;;  %v10466_v23 = vadd.f32 %v7400_v63, %v3846_v50  ;;  %5738 = vmatpush1.bf16.msra.mxu1 %v8005_v12 }
 0x469   : > { %v7338_v0 = vpop.f32.mrb[117].mxu1  ;;  %5739 = vmatprep.subr.bf16.mxu1 %v8010_v49  ;;  %7506 = vmatpush3.bf16.msra.mxu0 %v8058_v31 }
 0x46a   : > { %v7339_v7 = vadd.f32 %v7338_v0, %v7337_v39  ;;  %v7340_v37 = vpop.f32.mrb[118].mxu1  ;;  %7507 = vmatprep.subr.bf16.mxu0 %v8062_v54  ;;  %v8061_v54 = vld [vmem:[%s11474_s5 + $0x154] ss:$12 sps:$4 sm:$0xff]  }
 0x46b   : > { %v7341_v18 = vpop.f32.mrb[119].mxu1 }
 0x46c   : > { %v10469_v59 = vadd.f32 %v7339_v7, %v10424_v19  ;;  %v7342_v25 = vadd.f32 %v7341_v18, %v7340_v37  ;;  %v8008_v19 = vld [vmem:[%s11474_s5 + $0x18] ss:$12 sps:$4 sm:$0xff]   ;;  %v8029_v37 = vld [vmem:[%s11474_s5 + $0xc0] ss:$12 sps:$4 sm:$0xff]  }
 0x46d   : > { %5740 = vmatpush1.bf16.msra.mxu1 %v8008_v19  ;;  %7508 = vmatpush3.bf16.msra.mxu0 %v8063_v42 }
 0x46e   : > { %v10472_v51 = vadd.f32 %v7342_v25, %v10427_v4  ;;  %v8013_v4 = vld [vmem:[%s11474_s5 + $0x34] ss:$12 sps:$4 sm:$0xff]  }
 0x46f   : > { %5741 = vmatprep.subr.bf16.mxu1 %v8013_v4  ;;  %v8034_v4 = vld [vmem:[%s11474_s5 + $0xd8] ss:$12 sps:$4 sm:$0xff]  }
 0x471   : > { %5742 = vmatpush1.bf16.msra.mxu1 %v8011_v30 }
 0x472   : > { %5743 = vmatprep.subr.bf16.mxu1 %v8016_v3 }
 0x475   : > { %5744 = vmatpush1.bf16.msra.mxu1 %v8014_v24 }
 0x476   : > { %5745 = vmatprep.subr.bf16.mxu1 %v8019_v46 }
 0x479   : > { %5746 = vmatpush1.bf16.msra.mxu1 %v8017_v60 }
 0x47a   : > { %5747 = vmatprep.subr.bf16.mxu1 %v8022_v5  ;;  %v8051_v5 = vld [vmem:[%s11474_s5 + $0x124] ss:$12 sps:$4 sm:$0xff]  }
 0x47d   : > { %5748 = vmatpush1.bf16.msra.mxu1 %v8020_v52 }
 0x47e   : > { %5749 = vmatprep.subr.bf16.mxu1 %v8025_v2 }
 0x481   : > { %5750 = vmatpush1.bf16.msra.mxu1 %v8023_v20 }
 0x482   : > { %5751 = vmatprep.subr.bf16.mxu1 %v8028_v22 }
 0x485   : > { %5752 = vmatpush1.bf16.msra.mxu1 %v8026_v35 }
 0x490   : > { %v7343_v34 = vpop.f32.mrb[120].mxu1 }
 0x491   : > { %v7344_v40 = vpop.f32.mrb[121].mxu1 }
 0x492   : > { %v7345_v9 = vadd.f32 %v7344_v40, %v7343_v34  ;;  %v7346_v48 = vpop.f32.mrb[122].mxu1 }
 0x493   : > { %v7347_v61 = vpop.f32.mrb[123].mxu1 }
 0x494   : > { %v3859_v27 = vadd.f32 %v7345_v9, %v10430_v43  ;;  %v7348_v33 = vadd.f32 %v7347_v61, %v7346_v48  ;;  %v8031_v43 = vld [vmem:[%s11474_s5 + $0xc4] ss:$12 sps:$4 sm:$0xff]   ;;  %v8049_v48 = vld [vmem:[%s11474_s5 + $0x120] ss:$12 sps:$4 sm:$0xff]   ;;  %v8056_v61 = vld [vmem:[%s11474_s5 + $0x13c] ss:$12 sps:$4 sm:$0xff]  }
 0x495   : > { %5753 = vmatprep.subr.bf16.mxu1 %v8031_v43 }
 0x496   : > { %v3862_v10 = vadd.f32 %v7348_v33, %v10433_v58  ;;  %5754 = vmatpush1.bf16.msra.mxu1 %v8029_v37 }
 0x497   : > { %v7401_v56 = vpop.f32.mrb[120].mxu0  ;;  %5755 = vmatprep.subr.bf16.mxu1 %v8036_v16 }
 0x498   : > { %v7349_v63 = vpop.f32.mrb[124].mxu1  ;;  %v7402_v36 = vpop.f32.mrb[121].mxu0 }
 0x499   : > { %v7403_v26 = vadd.f32 %v7402_v36, %v7401_v56  ;;  %v7350_v58 = vpop.f32.mrb[125].mxu1  ;;  %v7404_v50 = vpop.f32.mrb[122].mxu0 }
 0x49a   : > { %v7351_v39 = vadd.f32 %v7350_v58, %v7349_v63  ;;  %v7352_v0 = vpop.f32.mrb[126].mxu1  ;;  %v7405_v7 = vpop.f32.mrb[123].mxu0  ;;  %5756 = vmatpush1.bf16.msra.mxu1 %v8034_v4  ;;  %v8059_v58 = vld [vmem:[%s11474_s5 + $0x150] ss:$12 sps:$4 sm:$0xff]  }
 0x49b   : > { %v10573_v18 = vadd.f32 %v7403_v26, %v10469_v59  ;;  %v7406_v25 = vadd.f32 %v7405_v7, %v7404_v50  ;;  %v7353_v12 = vpop.f32.mrb[127].mxu1  ;;  %5757 = vmatprep.subr.bf16.mxu1 %v8041_v55 }
 0x49c   : > { %v3867_v49 = vadd.f32 %v7351_v39, %v10436_v8  ;;  %v8039_v8 = vld [vmem:[%s11474_s5 + $0xf0] ss:$12 sps:$4 sm:$0xff]  }
 0x49d   : > { %v10580_v19 = vadd.f32 %v7406_v25, %v10472_v51 }
 0x49e   : > { %5758 = vmatpush1.bf16.msra.mxu1 %v8039_v8 }
 0x49f   : > { %v7407_v59 = vpop.f32.mrb[124].mxu0  ;;  %5759 = vmatprep.subr.bf16.mxu1 %v8046_v14 }
 0x4a0   : > { %v7408_v62 = vpop.f32.mrb[125].mxu0 }
 0x4a1   : > { %v7409_v30 = vadd.f32 %v7408_v62, %v7407_v59  ;;  %v7410_v11 = vpop.f32.mrb[126].mxu0 }
 0x4a2   : > { %v7411_v3 = vpop.f32.mrb[127].mxu0  ;;  %5760 = vmatpush1.bf16.msra.mxu1 %v8044_v6 }
 0x4a3   : > { %v10591_v51 = vadd.f32 %v7409_v30, %v3859_v27  ;;  %v7412_v21 = vadd.f32 %v7411_v3, %v7410_v11  ;;  %5761 = vmatprep.subr.bf16.mxu1 %v8051_v5 }
 0x4a5   : > { %v10596_v24 = vadd.f32 %v7412_v21, %v3862_v10 }
 0x4a6   : > { %v7435_v46 = vpop.f32.mrb[128].mxu1  ;;  %5762 = vmatpush1.bf16.msra.mxu1 %v8049_v48 }
 0x4a7   : > { %v7413_v32 = vpop.f32.mrb[128].mxu0  ;;  %v7436_v60 = vpop.f32.mrb[129].mxu1  ;;  %5763 = vmatprep.subr.bf16.mxu1 %v8056_v61 }
 0x4a8   : > { %v7437_v1 = vadd.f32 %v7436_v60, %v7435_v46  ;;  %v7414_v15 = vpop.f32.mrb[129].mxu0  ;;  %v7438_v52 = vpop.f32.mrb[130].mxu1 }
 0x4a9   : > { %v7415_v2 = vadd.f32 %v7414_v15, %v7413_v32  ;;  %v7416_v34 = vpop.f32.mrb[130].mxu0  ;;  %v7439_v29 = vpop.f32.mrb[131].mxu1 }
 0x4aa   : > { %v7440_v40 = vadd.f32 %v7439_v29, %v7438_v52  ;;  %v7417_v38 = vpop.f32.mrb[131].mxu0  ;;  %v4003_v9 = vadd.f32 %v7437_v1, %v10440_v53  ;;  %v8054_v53 = vld [vmem:[%s11474_s5 + $0x138] ss:$12 sps:$4 sm:$0xff]  }
 0x4ab   : > { %v10608_v20 = vadd.f32 %v7415_v2, %v3867_v49  ;;  %5764 = vmatpush1.bf16.msra.mxu1 %v8054_v53 }
 0x4ac   : > { %v4006_v22 = vadd.f32 %v7440_v40, %v10442_v45  ;;  %5765 = vmatprep.subr.bf16.mxu1 %v8061_v54 }
 0x4ae   : > { %v7441_v27 = vpop.f32.mrb[132].mxu1 }
 0x4af   : > { %v7442_v33 = vpop.f32.mrb[133].mxu1  ;;  %v7709_v31 = vpop.f32.mrb[132].mxu0  ;;  %5766 = vmatpush1.bf16.msra.mxu1 %v8059_v58 }
 0x4b0   : > { %v7443_v10 = vadd.f32 %v7442_v33, %v7441_v27  ;;  %v7444_v35 = vpop.f32.mrb[134].mxu1  ;;  %v4098_v56 = vpop.f32.mrb[133].mxu0 }
 0x4b1   : > { %v4099_v43 = vadd.f32 %v4098_v56, %v4003_v9  ;;  %v7445_v63 = vpop.f32.mrb[135].mxu1  ;;  %v7710_v36 = vpop.f32.mrb[134].mxu0 }
 0x4b2   : > { %v4011_v45 = vadd.f32 %v7443_v10, %v10446_v28  ;;  %v7446_v42 = vadd.f32 %v7445_v63, %v7444_v35  ;;  %v4101_v26 = vpop.f32.mrb[135].mxu0 }
 0x4b3   : > { %v4160_v50 = vmax.f32 %v4099_v43, 0.0  ;;  %v4102_v39 = vadd.f32 %v4101_v26, %v4006_v22 }
 0x4b4   : > { %v4107_v0 = vadd.f32 %v7709_v31, %v4011_v45  ;;  %v4014_v7 = vadd.f32 %v7446_v42, %v10448_v47 }
 0x4b5   : > { %v4161_v37 = vmax.f32 %v4102_v39, 0.0  ;;  %v4190_v49 = vrot.slane %v4160_v50, 1  ;;  %v4250_v28 = vrot.slane %v4160_v50, 2 }
 0x4b6   : > { %v4162_v25 = vmax.f32 %v4107_v0, 0.0  ;;  %v4110_v12 = vadd.f32 %v7710_v36, %v4014_v7  ;;  %v7447_v16 = vpop.f32.mrb[136].mxu1 }
 0x4b7   : > { %v4191_v4 = vrot.slane %v4161_v37, 1  ;;  %v4251_v59 = vrot.slane %v4161_v37, 2  ;;  %v7448_v55 = vpop.f32.mrb[137].mxu1  ;;  %v7713_v62 = vpop.f32.mrb[136].mxu0 }
 0x4b8   : > { %v4193_v30 = vrot.slane %v4162_v25, 1  ;;  %v4253_v11 = vrot.slane %v4162_v25, 2  ;;  %v4163_v3 = vmax.f32 %v4110_v12, 0.0  ;;  %v7449_v8 = vadd.f32 %v7448_v55, %v7447_v16  ;;  %v7450_v21 = vpop.f32.mrb[138].mxu1  ;;  %v4114_v14 = vpop.f32.mrb[137].mxu0 }
 0x4b9   : > { %v4192_v46 = vsel %vm1003_vm1, %v4190_v49, %v4191_v4  ;;  %v4252_v47 = vsel %vm1721_vm8, %v4250_v28, %v4251_v59  ;;  %v7451_v6 = vpop.f32.mrb[139].mxu1  ;;  %v7714_v32 = vpop.f32.mrb[138].mxu0 }
 0x4ba   : > { %v4195_v60 = vrot.slane %v4163_v3, 1  ;;  %v4255_v5 = vrot.slane %v4163_v3, 2  ;;  %v4194_v1 = vsel %vm1003_vm1, %v4191_v4, %v4193_v30  ;;  %v4234_v15 = vmax.f32 %v4160_v50, %v4192_v46  ;;  %v4117_v52 = vpop.f32.mrb[139].mxu0 }
 0x4bb   : > { %v4235_v2 = vmax.f32 %v4161_v37, %v4194_v1  ;;  %v4254_v34 = vsel %vm1721_vm8, %v4251_v59, %v4253_v11  ;;  %v4019_v29 = vadd.f32 %v7449_v8, %v10452_v44  ;;  %v7452_v40 = vadd.f32 %v7451_v6, %v7450_v21 }
 0x4bc   : > { %v4196_v38 = vsel %vm1003_vm1, %v4193_v30, %v4195_v60  ;;  %v4256_v9 = vsel %vm1721_vm8, %v4253_v11, %v4255_v5  ;;  %v4294_v48 = vmax.f32 %v4234_v15, %v4252_v47 }
 0x4bd   : > { %v4236_v61 = vmax.f32 %v4162_v25, %v4196_v38  ;;  %v4295_v22 = vmax.f32 %v4235_v2, %v4254_v34  ;;  %v4115_v27 = vadd.f32 %v4114_v14, %v4019_v29  ;;  %v4022_v53 = vadd.f32 %v7452_v40, %v10454_v41 }
 0x4be   : > { %4309 = vst.msk [vmem:[#allocation4] sm:$0xff] %vm2091_vm6, %v4294_v48  ;;  %v7453_v33 = vpop.f32.mrb[140].mxu1 }
 0x4bf   : > { %v4296_v31 = vmax.f32 %v4236_v61, %v4256_v9  ;;  %4310 = vst.msk [vmem:[#allocation4 + $0x8] sm:$0xff] %vm2091_vm6, %v4295_v22  ;;  %v4164_v54 = vmax.f32 %v4115_v27, 0.0  ;;  %v4118_v10 = vadd.f32 %v4117_v52, %v4022_v53  ;;  %v7454_v44 = vpop.f32.mrb[141].mxu1  ;;  %v10635_v35 = vpop.f32.mrb[140].mxu0  ;;  %v8064_v61 = vld [vmem:[%s11474_s5 + $0x168] ss:$12 sps:$4 sm:$0xff]  }
 0x4c0   : > { %v7455_v56 = vadd.f32 %v7454_v44, %v7453_v33  ;;  %v7456_v43 = vpop.f32.mrb[142].mxu1  ;;  %v4130_v63 = vpop.f32.mrb[141].mxu0  ;;  %v8066_v22 = vld [vmem:[%s11474_s5 + $0x16c] ss:$12 sps:$4 sm:$0xff]   ;;  %v8067_v27 = vld [vmem:[%s11474_s5 + $0x170] ss:$12 sps:$4 sm:$0xff]  }
 0x4c1   : > { %4311 = vst.msk [vmem:[#allocation4 + $0x10] sm:$0xff] %vm2091_vm6, %v4296_v31  ;;  %v4197_v36 = vrot.slane %v4164_v54, 1  ;;  %v4257_v45 = vrot.slane %v4164_v54, 2  ;;  %v4165_v42 = vmax.f32 %v4118_v10, 0.0  ;;  %v7457_v41 = vpop.f32.mrb[143].mxu1  ;;  %v10638_v26 = vpop.f32.mrb[142].mxu0  ;;  %5767 = vmatprep.subr.bf16.mxu1 %v8066_v22  ;;  %7509 = vmatprep.subr.bf16.mxu0 %v8067_v27 }
 0x4c2   : > { %v4027_v58 = vadd.f32 %v7455_v56, %v10458_v57  ;;  %v7458_v50 = vadd.f32 %v7457_v41, %v7456_v43  ;;  %v4133_v39 = vpop.f32.mrb[143].mxu0  ;;  %v8068_v44 = vld [vmem:[%s11474_s5 + $0xb0] ss:$12 sps:$4 sm:$0xff]   ;;  %5768 = vmatpush1.bf16.msra.mxu1 %v8064_v61 }
 0x4c3   : > { %v4198_v0 = vsel %vm1003_vm1, %v4195_v60, %v4197_v36  ;;  %v4258_v7 = vsel %vm1721_vm8, %v4255_v5, %v4257_v45  ;;  %v4199_v37 = vrot.slane %v4165_v42, 1  ;;  %v4259_v25 = vrot.slane %v4165_v42, 2  ;;  %v8071_v43 = vld [vmem:[%s11474_s5 + $0x184] ss:$12 sps:$4 sm:$0xff]   ;;  %7510 = vmatpush3.bf16.msra.mxu0 %v8068_v44 }
 0x4c4   : > { %v4237_v12 = vmax.f32 %v4163_v3, %v4198_v0  ;;  %v4123_v16 = vadd.f32 %v7713_v62, %v4027_v58  ;;  %v4030_v49 = vadd.f32 %v7458_v50, %v10460_v17  ;;  %5778 = vmatprep.subr.bf16.mxu1 %v8071_v43 }
 0x4c5   : > { %v4200_v28 = vsel %vm1003_vm1, %v4197_v36, %v4199_v37  ;;  %v4260_v4 = vsel %vm1721_vm8, %v4257_v45, %v4259_v25  ;;  %v4329_v38 = vld [vmem:[#allocation4 + $0x2] sm:$0x1]  ;;  %v4339_v41 = vld [vmem:[#allocation4 + $0x6] sm:$0x1] }
 0x4c6   : > { %v4297_v59 = vmax.f32 %v4237_v12, %v4258_v7  ;;  %v4238_v55 = vmax.f32 %v4164_v54, %v4200_v28  ;;  %v4166_v30 = vmax.f32 %v4123_v16, 0.0  ;;  %v4126_v57 = vadd.f32 %v7714_v32, %v4030_v49  ;;  %v7459_v11 = vpop.f32.mrb[144].mxu1  ;;  %v4330_v54 = vld [vmem:[#allocation4 + $0xf] sm:$0x1] }
 0x4c7   : > { %v7460_v8 = vpop.f32.mrb[145].mxu1  ;;  %v10646_v21 = vpop.f32.mrb[144].mxu0  ;;  %v4331_v0 = vmax.f32 %v4329_v38, %v4330_v54 }
 0x4c8   : > { %4312 = vst.msk [vmem:[#allocation4 + $0x18] sm:$0xff] %vm2091_vm6, %v4297_v59  ;;  %v4298_v14 = vmax.f32 %v4238_v55, %v4260_v4  ;;  %v4201_v46 = vrot.slane %v4166_v30, 1  ;;  %v4261_v3 = vrot.slane %v4166_v30, 2  ;;  %v10649_v62 = vmax.f32 %v4126_v57, 0.0  ;;  %v7462_v17 = vpop.f32.mrb[146].mxu1  ;;  %v10651_v47 = vpop.f32.mrb[145].mxu0 }
 0x4c9   : > { %v7461_v6 = vadd.f32 %v7460_v8, %v7459_v11  ;;  %v7463_v60 = vpop.f32.mrb[147].mxu1  ;;  %v7722_v5 = vpop.f32.mrb[146].mxu0  ;;  %v4340_v10 = vld [vmem:[#allocation4 + $0x13] sm:$0x1] }
 0x4ca   : > { %4313 = vst.msk [vmem:[#allocation4 + $0x20] sm:$0xff] %vm2091_vm6, %v4298_v14  ;;  %v4202_v32 = vsel %vm1003_vm1, %v4199_v37, %v4201_v46  ;;  %v4262_v1 = vsel %vm1721_vm8, %v4259_v25, %v4261_v3  ;;  %v4203_v15 = vrot.slane %v10649_v62, 1  ;;  %v4263_v52 = vrot.slane %v10649_v62, 2  ;;  %v10658_v2 = vpop.f32.mrb[147].mxu0  ;;  %v8072_v37 = vld [vmem:[%s11474_s5 + $0x248] ss:$12 sps:$4 sm:$0xff]  }
 0x4cb   : > { %v4239_v34 = vmax.f32 %v4165_v42, %v4202_v32  ;;  %v4035_v29 = vadd.f32 %v7461_v6, %v10464_v13  ;;  %v7464_v40 = vadd.f32 %v7463_v60, %v7462_v17  ;;  %v4341_v7 = vmax.f32 %v4339_v41, %v4340_v10  ;;  %7517 = vmatprep.subr.bf16.mxu0 %v8072_v37 }
 0x4cc   : > { %v4204_v9 = vsel %vm1003_vm1, %v4201_v46, %v4203_v15  ;;  %v4264_v48 = vsel %vm1721_vm8, %v4261_v3, %v4263_v52 }
 0x4cd   : > { %v4299_v53 = vmax.f32 %v4239_v34, %v4262_v1  ;;  %v4240_v13 = vmax.f32 %v4166_v30, %v4204_v9  ;;  %v4131_v33 = vadd.f32 %v4130_v63, %v4035_v29  ;;  %v4038_v31 = vadd.f32 %v7464_v40, %v10466_v23 }
 0x4ce   : > { %v7465_v56 = vpop.f32.mrb[148].mxu1 }
 0x4cf   : > { %4314 = vst.msk [vmem:[#allocation4 + $0x28] sm:$0xff] %vm2091_vm6, %v4299_v53  ;;  %v4300_v36 = vmax.f32 %v4240_v13, %v4264_v48  ;;  %v4168_v45 = vmax.f32 %v4131_v33, 0.0  ;;  %v4134_v63 = vadd.f32 %v4133_v39, %v4038_v31  ;;  %v7466_v42 = vpop.f32.mrb[149].mxu1  ;;  %v10680_v23 = vld [vmem:[#allocation4 + $0x1c] sm:$0x1] }
 0x4d0   : > { %v7467_v58 = vadd.f32 %v7466_v42, %v7465_v56  ;;  %v7468_v50 = vpop.f32.mrb[150].mxu1  ;;  %v4333_v59 = vmax.f32 %v4331_v0, %v10680_v23 }
 0x4d1   : > { %4315 = vst.msk [vmem:[#allocation4 + $0x30] sm:$0xff] %vm2091_vm6, %v4300_v36  ;;  %v4205_v25 = vrot.slane %v4168_v45, 1  ;;  %v4265_v12 = vrot.slane %v4168_v45, 2  ;;  %v4169_v39 = vmax.f32 %v4134_v63, 0.0  ;;  %v7469_v16 = vpop.f32.mrb[151].mxu1 }
 0x4d2   : > { %v4342_v49 = vld [vmem:[#allocation4 + $0x20] sm:$0x1]  ;;  %v4043_v28 = vadd.f32 %v7467_v58, %v10573_v18  ;;  %v7470_v4 = vadd.f32 %v7469_v16, %v7468_v50 }
 0x4d3   : > { %v4343_v55 = vmax.f32 %v4341_v7, %v4342_v49  ;;  %v4206_v30 = vsel %vm1003_vm1, %v4203_v15, %v4205_v25  ;;  %v4266_v57 = vsel %vm1721_vm8, %v4263_v52, %v4265_v12  ;;  %v4207_v11 = vrot.slane %v4169_v39, 1 }
 0x4d4   : > { %v4267_v8 = vrot.slane %v4169_v39, 2  ;;  %v4241_v14 = vmax.f32 %v10649_v62, %v4206_v30  ;;  %v4139_v46 = vadd.f32 %v10635_v35, %v4043_v28  ;;  %v4046_v3 = vadd.f32 %v7470_v4, %v10580_v19 }
 0x4d5   : > { %v7852_v17 = vpack.i.bf16 %v4333_v59, %v4343_v55  ;;  %v4208_v18 = vsel %vm1003_vm1, %v4205_v25, %v4207_v11 }
 0x4d6   : > { %v4268_v6 = vsel %vm1721_vm8, %v4265_v12, %v4267_v8  ;;  %v4301_v60 = vmax.f32 %v4241_v14, %v4266_v57  ;;  %v4242_v5 = vmax.f32 %v4168_v45, %v4208_v18  ;;  %v4170_v32 = vmax.f32 %v4139_v46, 0.0  ;;  %v7471_v15 = vpop.f32.mrb[152].mxu1  ;;  %v4348_v9 = vld [vmem:[#allocation4 + $0x29] sm:$0x1]  ;;  %v4356_v33 = vld [vmem:[#allocation4 + $0x2d] sm:$0x1] }
 0x4d7   : > { %v4142_v1 = vadd.f32 %v10638_v26, %v4046_v3  ;;  %7853 = vrot.lane.b32.xlu1 %v7852_v17, %s11533_s22  ;;  %v7472_v52 = vpop.f32.mrb[153].mxu1  ;;  %v4349_v10 = vmax.f32 %v10680_v23, %v4348_v9  ;;  %v4357_v42 = vmax.f32 %v4342_v49, %v4356_v33  ;;  %v4335_v33 = vld [vmem:[#allocation4 + $0x11] sm:$0x1] }
 0x4d8   : > { %4316 = vst.msk [vmem:[#allocation4 + $0x38] sm:$0xff] %vm2091_vm6, %v4301_v60  ;;  %v4302_v62 = vmax.f32 %v4242_v5, %v4268_v6  ;;  %v4209_v35 = vrot.slane %v4170_v32, 1  ;;  %v4269_v34 = vrot.slane %v4170_v32, 2  ;;  %v7474_v29 = vpop.f32.mrb[154].mxu1  ;;  %v7473_v40 = vadd.f32 %v7472_v52, %v7471_v15  ;;  %v4350_v45 = vld [vmem:[#allocation4 + $0x36] sm:$0x1] }
 0x4d9   : > { %v4171_v19 = vmax.f32 %v4142_v1, 0.0  ;;  %v7475_v38 = vpop.f32.mrb[155].mxu1  ;;  %v4351_v23 = vmax.f32 %v4349_v10, %v4350_v45  ;;  %v4337_v10 = vld [vmem:[#allocation4 + $0x1e] sm:$0x1] }
 0x4da   : > { %4317 = vst.msk [vmem:[#allocation4 + $0x40] sm:$0xff] %vm2091_vm6, %v4302_v62  ;;  %v4210_v48 = vsel %vm1003_vm1, %v4207_v11, %v4209_v35  ;;  %v4270_v26 = vsel %vm1721_vm8, %v4267_v8, %v4269_v34  ;;  %v4051_v53 = vadd.f32 %v7473_v40, %v10591_v51  ;;  %v7476_v13 = vadd.f32 %v7475_v38, %v7474_v29 }
 0x4db   : > { %v4211_v61 = vrot.slane %v4171_v19, 1  ;;  %v4271_v22 = vrot.slane %v4171_v19, 2  ;;  %v4243_v27 = vmax.f32 %v4169_v39, %v4210_v48 }
 0x4dc   : > { %v4147_v43 = vadd.f32 %v10651_v47, %v4051_v53  ;;  %v4054_v36 = vadd.f32 %v7476_v13, %v10596_v24  ;;  %v4325_v53 = vld [vmem:[#allocation4 + $0xd] sm:$0x1]  ;;  %v4324_v13 = vld [vmem:[#allocation4] sm:$0x1] }
 0x4dd   : > { %v4212_v31 = vsel %vm1003_vm1, %v4209_v35, %v4211_v61  ;;  %v4272_v54 = vsel %vm1721_vm8, %v4269_v34, %v4271_v22  ;;  %v4303_v44 = vmax.f32 %v4243_v27, %v4270_v26 }
 0x4de   : > { %v4244_v56 = vmax.f32 %v4170_v32, %v4212_v31  ;;  %v7477_v63 = vpop.f32.mrb[156].mxu1  ;;  %v4172_v41 = vmax.f32 %v4147_v43, 0.0  ;;  %v4150_v58 = vadd.f32 %v10658_v2, %v4054_v36  ;;  %v10724_v31 = vld [vmem:[#allocation4 + $0x1a] sm:$0x1] }
 0x4df   : > { %4318 = vst.msk [vmem:[#allocation4 + $0x48] sm:$0xff] %vm2091_vm6, %v4303_v44  ;;  %v7478_v50 = vpop.f32.mrb[157].mxu1  ;;  %v4358_v0 = vld [vmem:[#allocation4 + $0x3a] sm:$0x1]  ;;  %v4326_v44 = vmax.f32 %v4324_v13, %v4325_v53  ;;  %v8111_v13 = vld [vmem:[%s11474_s5 + $0x244] ss:$12 sps:$4 sm:$0xff]  }
 0x4e0   : > { %v4304_v51 = vmax.f32 %v4244_v56, %v4272_v54  ;;  %v7479_v7 = vadd.f32 %v7478_v50, %v7477_v63  ;;  %v7480_v37 = vpop.f32.mrb[158].mxu1  ;;  %v4359_v25 = vmax.f32 %v4357_v42, %v4358_v0  ;;  %v4213_v47 = vrot.slane %v4172_v41, 1  ;;  %v4334_v54 = vld [vmem:[#allocation4 + $0x4] sm:$0x1] }
 0x4e1   : > { %v4273_v12 = vrot.slane %v4172_v41, 2  ;;  %v4173_v24 = vmax.f32 %v4150_v58, 0.0  ;;  %v7481_v39 = vpop.f32.mrb[159].mxu1  ;;  %v4364_v57 = vld [vmem:[#allocation4 + $0x43] sm:$0x1]  ;;  %v4336_v56 = vmax.f32 %v4334_v54, %v4335_v33  ;;  %v4328_v63 = vmax.f32 %v4326_v44, %v10724_v31 }
 0x4e2   : > { %4319 = vst.msk [vmem:[#allocation4 + $0x50] sm:$0xff] %vm2091_vm6, %v4304_v51  ;;  %v4059_v16 = vadd.f32 %v7479_v7, %v10608_v20  ;;  %v7857_v49 = vpack.i.bf16 %v4351_v23, %v4359_v25  ;;  %v4214_v28 = vsel %vm1003_vm1, %v4211_v61, %v4213_v47  ;;  %v4372_v11 = vld [vmem:[#allocation4 + $0x47] sm:$0x1]  ;;  %v4365_v17 = vmax.f32 %v4350_v45, %v4364_v57  ;;  %v8073_v7 = vld [vmem:[%s11474_s5 + $0x188] ss:$12 sps:$4 sm:$0xff]  }
 0x4e3   : > { %v4274_v4 = vsel %vm1721_vm8, %v4271_v22, %v4273_v12  ;;  %v4215_v2 = vrot.slane %v4173_v24, 1  ;;  %v4275_v59 = vrot.slane %v4173_v24, 2  ;;  %v4245_v55 = vmax.f32 %v4171_v19, %v4214_v28  ;;  %v8076_v37 = vld [vmem:[%s11474_s5 + $0x19c] ss:$12 sps:$4 sm:$0xff]   ;;  %v8077_v23 = vld [vmem:[%s11474_s5 + $0x260] ss:$12 sps:$4 sm:$0xff]  }
 0x4e4   : > { %v4155_v30 = vadd.f32 %v10646_v21, %v4059_v16  ;;  %7858 = vrot.lane.b32.xlu0 %v7857_v49, %s11533_s22  ;;  %v4373_v18 = vmax.f32 %v4358_v0, %v4372_v11  ;;  %v4338_v42 = vmax.f32 %v4336_v56, %v4337_v10  ;;  %v8069_v0 = vld [vmem:[%s11474_s5 + $0x180] ss:$12 sps:$4 sm:$0xff]   ;;  %v8074_v25 = vld [vmem:[%s11474_s5 + $0x198] ss:$12 sps:$4 sm:$0xff]   ;;  %v4352_v39 = vld [vmem:[#allocation4 + $0x2b] sm:$0x1] }
 0x4e5   : > { %v4216_v8 = vsel %vm1003_vm1, %v4213_v47, %v4215_v2  ;;  %v4276_v14 = vsel %vm1721_vm8, %v4273_v12, %v4275_v59  ;;  %v4305_v46 = vmax.f32 %v4245_v55, %v4274_v4  ;;  %v8078_v47 = vld [vmem:[%s11474_s5 + $0x1a0] ss:$12 sps:$4 sm:$0xff]   ;;  %v8079_v16 = vld [vmem:[%s11474_s5 + $0x1b0] ss:$12 sps:$4 sm:$0xff]   ;;  %v8083_v49 = vld [vmem:[%s11474_s5 + $0x1b8] ss:$12 sps:$4 sm:$0xff]  }
 0x4e6   : > { %v4246_v20 = vmax.f32 %v4172_v41, %v4216_v8  ;;  %v4174_v3 = vmax.f32 %v4155_v30, 0.0  ;;  %v8081_v12 = vld [vmem:[%s11474_s5 + $0x1b4] ss:$12 sps:$4 sm:$0xff]   ;;  %v10759_v28 = vld [vmem:[#allocation4 + $0x38] sm:$0x1] }
 0x4e7   : > { %4320 = vst.msk [vmem:[#allocation4 + $0x58] sm:$0xff] %vm2091_vm6, %v4305_v46  ;;  %v8086_v4 = vld [vmem:[%s11474_s5 + $0x1cc] ss:$12 sps:$4 sm:$0xff]   ;;  %v8084_v11 = vld [vmem:[%s11474_s5 + $0x1c8] ss:$12 sps:$4 sm:$0xff]  }
 0x4e8   : > { %v4306_v6 = vmax.f32 %v4246_v20, %v4276_v14  ;;  %v4217_v60 = vrot.slane %v4174_v3, 1  ;;  %v4277_v5 = vrot.slane %v4174_v3, 2  ;;  %v8088_v8 = vld [vmem:[%s11474_s5 + $0x1d0] ss:$12 sps:$4 sm:$0xff]   ;;  %v8092_v3 = vld [vmem:[%s11474_s5 + $0x2a8] ss:$12 sps:$4 sm:$0xff]  }
 0x4e9   : > { %v4366_v32 = vld [vmem:[#allocation4 + $0x50] sm:$0x1]  ;;  %v4374_v21 = vld [vmem:[#allocation4 + $0x54] sm:$0x1] }
 0x4ea   : > { %v4367_v1 = vmax.f32 %v4365_v17, %v4366_v32  ;;  %v4375_v15 = vmax.f32 %v4373_v18, %v4374_v21  ;;  %4321 = vst.msk [vmem:[#allocation4 + $0x60] sm:$0xff] %vm2091_vm6, %v4306_v6  ;;  %v4218_v52 = vsel %vm1003_vm1, %v4215_v2, %v4217_v60  ;;  %v4278_v62 = vsel %vm1721_vm8, %v4275_v59, %v4277_v5  ;;  %v8087_v2 = vld [vmem:[%s11474_s5 + $0x290] ss:$12 sps:$4 sm:$0xff]   ;;  %v8089_v17 = vld [vmem:[%s11474_s5 + $0x1e0] ss:$12 sps:$4 sm:$0xff]  }
 0x4eb   : > { %v4247_v35 = vmax.f32 %v4173_v24, %v4218_v52  ;;  %v8082_v24 = vld [vmem:[%s11474_s5 + $0x278] ss:$12 sps:$4 sm:$0xff]   ;;  %v4353_v59 = vmax.f32 %v4337_v10, %v4352_v39  ;;  %v8093_v18 = vld [vmem:[%s11474_s5 + $0x1e8] ss:$12 sps:$4 sm:$0xff]   ;;  %v8097_v60 = vld [vmem:[%s11474_s5 + $0x2c0] ss:$12 sps:$4 sm:$0xff]  }
 0x4ec   : > { %v7862_v34 = vpack.i.bf16 %v4367_v1, %v4375_v15  ;;  %v8091_v20 = vld [vmem:[%s11474_s5 + $0x1e4] ss:$12 sps:$4 sm:$0xff]   ;;  %v8096_v6 = vld [vmem:[%s11474_s5 + $0x1fc] ss:$12 sps:$4 sm:$0xff]   ;;  %v10805_v52 = vld [vmem:[#allocation4 + $0x34] sm:$0x1] }
 0x4ed   : > { %v4307_v19 = vmax.f32 %v4247_v35, %v4278_v62  ;;  %v4355_v57 = vmax.f32 %v4353_v59, %v10759_v28  ;;  %v8094_v5 = vld [vmem:[%s11474_s5 + $0x1f8] ss:$12 sps:$4 sm:$0xff]   ;;  %v8099_v62 = vld [vmem:[%s11474_s5 + $0x210] ss:$12 sps:$4 sm:$0xff]   ;;  %v8112_v33 = vld [vmem:[%s11474_s5 + $0x3c8] ss:$12 sps:$4 sm:$0xff]  }
 0x4ee   : > { %7863 = vrot.lane.b32.xlu1 %v7862_v34, %s11533_s22  ;;  %v4380_v29 = vld [vmem:[#allocation4 + $0x5d] sm:$0x1]  ;;  %v8102_v1 = vld [vmem:[%s11474_s5 + $0x2d8] ss:$12 sps:$4 sm:$0xff]   ;;  %v8109_v10 = vld [vmem:[%s11474_s5 + $0x240] ss:$12 sps:$4 sm:$0xff]  }
 0x4ef   : > { %4322 = vst.msk [vmem:[#allocation4 + $0x68] sm:$0xff] %vm2091_vm6, %v4307_v19  ;;  %v4381_v38 = vmax.f32 %v4366_v32, %v4380_v29  ;;  %v8098_v32 = vld [vmem:[%s11474_s5 + $0x200] ss:$12 sps:$4 sm:$0xff]   ;;  %v4344_v15 = vld [vmem:[#allocation4 + $0x27] sm:$0x1] }
 0x4f0   : > { %v8103_v35 = vld [vmem:[%s11474_s5 + $0x218] ss:$12 sps:$4 sm:$0xff]   ;;  %v8107_v29 = vld [vmem:[%s11474_s5 + $0x2f0] ss:$12 sps:$4 sm:$0xff]   ;;  %v8113_v44 = vld [vmem:[%s11474_s5 + $0x308] ss:$12 sps:$4 sm:$0xff]  }
 0x4f1   : > { %v4388_v40 = vld [vmem:[#allocation4 + $0x61] sm:$0x1]  ;;  %v8106_v19 = vld [vmem:[%s11474_s5 + $0x22c] ss:$12 sps:$4 sm:$0xff]   ;;  %v8133_v39 = vld [vmem:[%s11474_s5 + $0x368] ss:$12 sps:$4 sm:$0xff]  }
 0x4f2   : > { %v4389_v9 = vmax.f32 %v4374_v21, %v4388_v40  ;;  %v8101_v21 = vld [vmem:[%s11474_s5 + $0x214] ss:$12 sps:$4 sm:$0xff]   ;;  %v4368_v40 = vld [vmem:[#allocation4 + $0x45] sm:$0x1] }
 0x4f3   : > { %v4369_v53 = vmax.f32 %v10759_v28, %v4368_v40  ;;  %v8134_v28 = vld [vmem:[%s11474_s5 + $0x2b8] ss:$12 sps:$4 sm:$0xff]   ;;  %v8156_v40 = vld [vmem:[%s11474_s5 + $0x31c] ss:$12 sps:$4 sm:$0xff]  }
 0x4f4   : > { %v8142_v59 = vld [vmem:[%s11474_s5 + $0x458] ss:$12 sps:$4 sm:$0xff]  }
 0x4f6   : > { %v4382_v48 = vld [vmem:[#allocation4 + $0x6a] sm:$0x1]  ;;  %v4390_v26 = vld [vmem:[#allocation4 + $0x6e] sm:$0x1] }
 0x4f7   : > { %v4383_v61 = vmax.f32 %v4381_v38, %v4382_v48  ;;  %v4391_v22 = vmax.f32 %v4389_v9, %v4390_v26  ;;  %v4345_v9 = vmax.f32 %v10724_v31, %v4344_v15  ;;  %v10822_v48 = vld [vmem:[#allocation4 + $0x52] sm:$0x1]  ;;  %v8152_v15 = vld [vmem:[%s11474_s5 + $0x548] ss:$12 sps:$4 sm:$0xff]  }
 0x4f8   : > { %v4371_v54 = vmax.f32 %v4369_v53, %v10822_v48  ;;  %v8163_v53 = vld [vmem:[%s11474_s5 + $0x4b8] ss:$12 sps:$4 sm:$0xff]  }
 0x4f9   : > { %v7867_v27 = vpack.i.bf16 %v4383_v61, %v4391_v22  ;;  %v4347_v26 = vmax.f32 %v4345_v9, %v10805_v52  ;;  %v8104_v22 = vld [vmem:[%s11474_s5 + $0x228] ss:$12 sps:$4 sm:$0xff]  }
 0x4fb   : > { %7868 = vrot.lane.b32.xlu0 %v7867_v27, %s11533_s22  ;;  %v8108_v27 = vld [vmem:[%s11474_s5 + $0x230] ss:$12 sps:$4 sm:$0xff]   ;;  %s8429_s22 = smov [#allocation5]  }
 0x4fc   : > { %s8365_s29 = sshll.u32 %s8429_s22, 4  ;;  %s8366_s29 = int_to_ptr.vmem [resolvable:$false] %s8365_s29 }
 0x4fd   : > { %s8367_s13 = scalar_lea.vmem %s8366_s29, 32  ;;  %p8368_p0 = scmp.lt.s32.totalorder %s11429_s24, %s8366_s29 }
 0x4fe   : > { %p8369_p1 = scmp.lt.s32.totalorder %s8367_s13, %s8361_s21 }
 0x500   : > { %p8370_p2 = por %p8369_p1, %p8368_p0 }
 0x502   : > { %p8371_p3 = pnand %p8370_p2, %p8364_p13 }
 0x549   : > { %v7854_v43 = vpop.permute.xlu1 %7853 }
 0x54a   : > { %v7856_v36 = vunpack.i.h.bf16 %v7854_v43  ;;  %v7855_v45 = vunpack.i.l.bf16 %v7854_v43 }
 0x54c   : > { %v4424_v51 = vsel %vm2091_vm6, %v4328_v63, %v7856_v36  ;;  %v4425_v41 = vsel %vm2091_vm6, %v4338_v42, %v7855_v45  ;;  %v8116_v36 = vld [vmem:[%s11474_s5 + $0x25c] ss:$12 sps:$4 sm:$0xff]   ;;  %v8117_v45 = vld [vmem:[%s11474_s5 + $0x3e0] ss:$12 sps:$4 sm:$0xff]   ;;  %v8114_v42 = vld [vmem:[%s11474_s5 + $0x258] ss:$12 sps:$4 sm:$0xff]  }
 0x54d   : > { %v4432_v58 = vpack.c.bf16 %v4424_v51, %v4424_v51  ;;  %v4433_v50 = vpack.c.bf16 %v4425_v41, %v4425_v41  ;;  %v8118_v51 = vld [vmem:[%s11474_s5 + $0x320] ss:$12 sps:$4 sm:$0xff]  }
 0x54e   : > { %v8121_v41 = vld [vmem:[%s11474_s5 + $0x274] ss:$12 sps:$4 sm:$0xff]  }
 0x54f   : > { %5769 = vmatprep.mubr.bf16.mxu1 %v4433_v50  ;;  %5933 = vmatprep.mubr.bf16.mxu0 %v4433_v50  ;;  %v8119_v50 = vld [vmem:[%s11474_s5 + $0x270] ss:$12 sps:$4 sm:$0xff]  }
 0x550   : > { %5770 = vmatmul.mubr.bf16.vlgmr.msra.gmra.mrb[160].mxu1 %v4432_v58  ;;  %5934 = vmatmul.mubr.bf16.vlgmr.msra.gmra.mrb[148].mxu0 %v4432_v58  ;;  %v8122_v58 = vld [vmem:[%s11474_s5 + $0x3f8] ss:$12 sps:$4 sm:$0xff]  }
 0x551   : > { %5779 = vmatpush1.bf16.msra.mxu1 %v8069_v0  ;;  %7518 = vmatpush3.bf16.msra.mxu0 %v8073_v7  ;;  %v8123_v0 = vld [vmem:[%s11474_s5 + $0x338] ss:$12 sps:$4 sm:$0xff]  }
 0x552   : > { %5780 = vmatprep.subr.bf16.mxu1 %v8076_v37  ;;  %7519 = vmatprep.subr.bf16.mxu0 %v8077_v23  ;;  %v8126_v7 = vld [vmem:[%s11474_s5 + $0x28c] ss:$12 sps:$4 sm:$0xff]   ;;  %v8127_v37 = vld [vmem:[%s11474_s5 + $0x410] ss:$12 sps:$4 sm:$0xff]   ;;  %v8124_v23 = vld [vmem:[%s11474_s5 + $0x288] ss:$12 sps:$4 sm:$0xff]  }
 0x555   : > { %5781 = vmatpush1.bf16.msra.mxu1 %v8074_v25  ;;  %7520 = vmatpush3.bf16.msra.mxu0 %v8078_v47  ;;  %v8128_v25 = vld [vmem:[%s11474_s5 + $0x350] ss:$12 sps:$4 sm:$0xff]  }
 0x556   : > { %5782 = vmatprep.subr.bf16.mxu1 %v8081_v12  ;;  %7521 = vmatprep.subr.bf16.mxu0 %v8082_v24  ;;  %v7859_v55 = vpop.permute.xlu0 %7858  ;;  %v8131_v47 = vld [vmem:[%s11474_s5 + $0x2a4] ss:$12 sps:$4 sm:$0xff]   ;;  %v8132_v12 = vld [vmem:[%s11474_s5 + $0x428] ss:$12 sps:$4 sm:$0xff]   ;;  %v8129_v24 = vld [vmem:[%s11474_s5 + $0x2a0] ss:$12 sps:$4 sm:$0xff]  }
 0x557   : > { %v7860_v30 = vunpack.i.l.bf16 %v7859_v55  ;;  %v7861_v38 = vunpack.i.h.bf16 %v7859_v55  ;;  %v4360_v55 = vld [vmem:[#allocation4 + $0x41] sm:$0x1] }
 0x559   : > { %5783 = vmatpush1.bf16.msra.mxu1 %v8079_v16  ;;  %7522 = vmatpush3.bf16.msra.mxu0 %v8083_v49  ;;  %v4427_v14 = vsel %vm2091_vm6, %v4355_v57, %v7860_v30  ;;  %v4426_v31 = vsel %vm2091_vm6, %v4347_v26, %v7861_v38  ;;  %v8136_v16 = vld [vmem:[%s11474_s5 + $0x2bc] ss:$12 sps:$4 sm:$0xff]   ;;  %v8137_v49 = vld [vmem:[%s11474_s5 + $0x440] ss:$12 sps:$4 sm:$0xff]  }
 0x55a   : > { %5784 = vmatprep.subr.bf16.mxu1 %v8086_v4  ;;  %7523 = vmatprep.subr.bf16.mxu0 %v8087_v2  ;;  %v4435_v46 = vpack.c.bf16 %v4427_v14, %v4427_v14  ;;  %v10848_v43 = vpack.c.bf16 %v4426_v31, %v4426_v31  ;;  %v8138_v4 = vld [vmem:[%s11474_s5 + $0x380] ss:$12 sps:$4 sm:$0xff]   ;;  %v8139_v57 = vld [vmem:[%s11474_s5 + $0x2d0] ss:$12 sps:$4 sm:$0xff]   ;;  %v8164_v31 = vld [vmem:[%s11474_s5 + $0x348] ss:$12 sps:$4 sm:$0xff]  }
 0x55b   : > { %v8141_v2 = vld [vmem:[%s11474_s5 + $0x2d4] ss:$12 sps:$4 sm:$0xff]   ;;  %v10920_v30 = vld [vmem:[#allocation4 + $0x4e] sm:$0x1] }
 0x55c   : > { %5810 = vmatprep.mubr.bf16.mxu1 %v4435_v46  ;;  %5973 = vmatprep.mubr.bf16.mxu0 %v4435_v46  ;;  %v8146_v14 = vld [vmem:[%s11474_s5 + $0x2ec] ss:$12 sps:$4 sm:$0xff]   ;;  %v8147_v46 = vld [vmem:[%s11474_s5 + $0x470] ss:$12 sps:$4 sm:$0xff]  }
 0x55d   : > { %5785 = vmatpush1.bf16.msra.mxu1 %v8084_v11  ;;  %7524 = vmatpush3.bf16.msra.mxu0 %v8088_v8  ;;  %v8143_v11 = vld [vmem:[%s11474_s5 + $0x398] ss:$12 sps:$4 sm:$0xff]   ;;  %v8157_v38 = vld [vmem:[%s11474_s5 + $0x560] ss:$12 sps:$4 sm:$0xff]  }
 0x55e   : > { %5786 = vmatprep.subr.bf16.mxu1 %v8091_v20  ;;  %7525 = vmatprep.subr.bf16.mxu0 %v8092_v3  ;;  %v4384_v20 = vld [vmem:[#allocation4 + $0x5f] sm:$0x1]  ;;  %v4361_v3 = vmax.f32 %v10805_v52, %v4360_v55  ;;  %v8158_v26 = vld [vmem:[%s11474_s5 + $0x4a0] ss:$12 sps:$4 sm:$0xff]  }
 0x55f   : > { %v8197_v55 = vld [vmem:[%s11474_s5 + $0x3f4] ss:$12 sps:$4 sm:$0xff]  }
 0x560   : > { %v10813_v34 = vpop.permute.xlu1 %7863 }
 0x561   : > { %5787 = vmatpush1.bf16.msra.mxu1 %v8089_v17  ;;  %7526 = vmatpush3.bf16.msra.mxu0 %v8093_v18  ;;  %v7865_v61 = vunpack.i.l.bf16 %v10813_v34  ;;  %v7866_v17 = vunpack.i.h.bf16 %v10813_v34  ;;  %v4386_v18 = vld [vmem:[#allocation4 + $0x6c] sm:$0x1] }
 0x562   : > { %5788 = vmatprep.subr.bf16.mxu1 %v8096_v6  ;;  %7527 = vmatprep.subr.bf16.mxu0 %v8097_v60  ;;  %v4363_v6 = vmax.f32 %v4361_v3, %v10920_v30  ;;  %v8209_v3 = vld [vmem:[%s11474_s5 + $0x454] ss:$12 sps:$4 sm:$0xff]  }
 0x563   : > { %v4429_v56 = vsel %vm2091_vm6, %v4371_v54, %v7865_v61  ;;  %v8161_v61 = vld [vmem:[%s11474_s5 + $0x334] ss:$12 sps:$4 sm:$0xff]   ;;  %v8168_v54 = vld [vmem:[%s11474_s5 + $0x4d0] ss:$12 sps:$4 sm:$0xff]  }
 0x564   : > { %v10857_v63 = vpack.c.bf16 %v4429_v56, %v4429_v56  ;;  %v4428_v52 = vsel %vm2091_vm6, %v4363_v6, %v7866_v17  ;;  %v8169_v56 = vld [vmem:[%s11474_s5 + $0x360] ss:$12 sps:$4 sm:$0xff]   ;;  %v8207_v17 = vld [vmem:[%s11474_s5 + $0x450] ss:$12 sps:$4 sm:$0xff]   ;;  %v8210_v6 = vld [vmem:[%s11474_s5 + $0x468] ss:$12 sps:$4 sm:$0xff]  }
 0x565   : > { %5789 = vmatpush1.bf16.msra.mxu1 %v8094_v5  ;;  %7528 = vmatpush3.bf16.msra.mxu0 %v8098_v32  ;;  %v8144_v5 = vld [vmem:[%s11474_s5 + $0x2e8] ss:$12 sps:$4 sm:$0xff]   ;;  %v8148_v32 = vld [vmem:[%s11474_s5 + $0x3b0] ss:$12 sps:$4 sm:$0xff]  }
 0x566   : > { %5790 = vmatprep.subr.bf16.mxu1 %v8101_v21  ;;  %7529 = vmatprep.subr.bf16.mxu0 %v8102_v1  ;;  %v4385_v21 = vmax.f32 %v10822_v48, %v4384_v20  ;;  %v8151_v1 = vld [vmem:[%s11474_s5 + $0x304] ss:$12 sps:$4 sm:$0xff]  }
 0x567   : > { %v8154_v48 = vld [vmem:[%s11474_s5 + $0x318] ss:$12 sps:$4 sm:$0xff]  }
 0x568   : > { %v8204_v20 = vld [vmem:[%s11474_s5 + $0x438] ss:$12 sps:$4 sm:$0xff]  }
 0x569   : > { %5791 = vmatpush1.bf16.msra.mxu1 %v8099_v62  ;;  %7530 = vmatpush3.bf16.msra.mxu0 %v8103_v35  ;;  %v4387_v62 = vmax.f32 %v4385_v21, %v4386_v18  ;;  %v8149_v35 = vld [vmem:[%s11474_s5 + $0x300] ss:$12 sps:$4 sm:$0xff]   ;;  %v8216_v21 = vld [vmem:[%s11474_s5 + $0x498] ss:$12 sps:$4 sm:$0xff]  }
 0x56a   : > { %5792 = vmatprep.subr.bf16.mxu1 %v8106_v19  ;;  %7531 = vmatprep.subr.bf16.mxu0 %v8107_v29  ;;  %v10958_v19 = vpack.c.bf16 %v4428_v52, %v4428_v52  ;;  %v8153_v29 = vld [vmem:[%s11474_s5 + $0x488] ss:$12 sps:$4 sm:$0xff]   ;;  %v8212_v18 = vld [vmem:[%s11474_s5 + $0x46c] ss:$12 sps:$4 sm:$0xff]  }
 0x56b   : > { %v8224_v52 = vld [vmem:[%s11474_s5 + $0x4cc] ss:$12 sps:$4 sm:$0xff]  }
 0x56d   : > { %5793 = vmatpush1.bf16.msra.mxu1 %v8104_v22  ;;  %7532 = vmatpush3.bf16.msra.mxu0 %v8108_v27  ;;  %v10928_v8 = vpop.permute.xlu0 %7868  ;;  %v8162_v22 = vld [vmem:[%s11474_s5 + $0x578] ss:$12 sps:$4 sm:$0xff]   ;;  %v8159_v27 = vld [vmem:[%s11474_s5 + $0x330] ss:$12 sps:$4 sm:$0xff]  }
 0x56e   : > { %5794 = vmatprep.subr.bf16.mxu1 %v8111_v13  ;;  %7539 = vmatprep.subr.bf16.mxu0 %v8112_v33  ;;  %v7870_v60 = vunpack.i.l.bf16 %v10928_v8  ;;  %v8166_v13 = vld [vmem:[%s11474_s5 + $0x34c] ss:$12 sps:$4 sm:$0xff]   ;;  %v8167_v33 = vld [vmem:[%s11474_s5 + $0x590] ss:$12 sps:$4 sm:$0xff]  }
 0x570   : > { %5974 = vmatmul.mubr.bf16.vlgmr.msra.gmra.mrb[152].mxu0 %v10848_v43  ;;  %v4431_v34 = vsel %vm2091_vm6, %v4387_v62, %v7870_v60  ;;  %v8215_v60 = vld [vmem:[%s11474_s5 + $0x484] ss:$12 sps:$4 sm:$0xff]   ;;  %v8222_v62 = vld [vmem:[%s11474_s5 + $0x4c8] ss:$12 sps:$4 sm:$0xff]  }
 0x571   : > { %5795 = vmatpush1.bf16.msra.mxu1 %v8109_v10  ;;  %7540 = vmatpush3.bf16.msra.mxu0 %v8113_v44  ;;  %v10971_v9 = vpack.c.bf16 %v4431_v34, %v4431_v34  ;;  %v8171_v10 = vld [vmem:[%s11474_s5 + $0x364] ss:$12 sps:$4 sm:$0xff]   ;;  %v8172_v44 = vld [vmem:[%s11474_s5 + $0x5a8] ss:$12 sps:$4 sm:$0xff]   ;;  %v8225_v34 = vld [vmem:[%s11474_s5 + $0x4e0] ss:$12 sps:$4 sm:$0xff]  }
 0x572   : > { %6013 = vmatprep.mubr.bf16.mxu0 %v10857_v63  ;;  %5796 = vmatprep.subr.bf16.mxu1 %v8116_v36  ;;  %v8176_v36 = vld [vmem:[%s11474_s5 + $0x37c] ss:$12 sps:$4 sm:$0xff]  }
 0x573   : > { %7541 = vmatprep.subr.bf16.mxu0 %v8117_v45  ;;  %v8177_v45 = vld [vmem:[%s11474_s5 + $0x5c0] ss:$12 sps:$4 sm:$0xff]  }
 0x575   : > { %5797 = vmatpush1.bf16.msra.mxu1 %v8114_v42  ;;  %7542 = vmatpush3.bf16.msra.mxu0 %v8118_v51  ;;  %v8178_v42 = vld [vmem:[%s11474_s5 + $0x500] ss:$12 sps:$4 sm:$0xff]  }
 0x576   : > { %5798 = vmatprep.subr.bf16.mxu1 %v8121_v41  ;;  %7543 = vmatprep.subr.bf16.mxu0 %v8122_v58  ;;  %v8181_v51 = vld [vmem:[%s11474_s5 + $0x394] ss:$12 sps:$4 sm:$0xff]   ;;  %v8182_v41 = vld [vmem:[%s11474_s5 + $0x5d8] ss:$12 sps:$4 sm:$0xff]  }
 0x577   : > { %v4376_v58 = vld [vmem:[#allocation4 + $0x5b] sm:$0x1] }
 0x579   : > { %5799 = vmatpush1.bf16.msra.mxu1 %v8119_v50  ;;  %7544 = vmatpush3.bf16.msra.mxu0 %v8123_v0  ;;  %v8179_v50 = vld [vmem:[%s11474_s5 + $0x390] ss:$12 sps:$4 sm:$0xff]   ;;  %v8183_v0 = vld [vmem:[%s11474_s5 + $0x518] ss:$12 sps:$4 sm:$0xff]  }
 0x57a   : > { %5800 = vmatprep.subr.bf16.mxu1 %v8126_v7  ;;  %7545 = vmatprep.subr.bf16.mxu0 %v8127_v37  ;;  %v8186_v7 = vld [vmem:[%s11474_s5 + $0x3ac] ss:$12 sps:$4 sm:$0xff]   ;;  %v4378_v37 = vld [vmem:[#allocation4 + $0x68] sm:$0x1] }
 0x57d   : > { %5801 = vmatpush1.bf16.msra.mxu1 %v8124_v23  ;;  %7546 = vmatpush3.bf16.msra.mxu0 %v8128_v25  ;;  %v8187_v23 = vld [vmem:[%s11474_s5 + $0x5f0] ss:$12 sps:$4 sm:$0xff]   ;;  %v4377_v25 = vmax.f32 %v10920_v30, %v4376_v58 }
 0x57e   : > { %5802 = vmatprep.subr.bf16.mxu1 %v8131_v47  ;;  %7547 = vmatprep.subr.bf16.mxu0 %v8132_v12  ;;  %v7871_v47 = vunpack.i.h.bf16 %v10928_v8  ;;  %v8184_v12 = vld [vmem:[%s11474_s5 + $0x3a8] ss:$12 sps:$4 sm:$0xff]   ;;  %v8195_v30 = vld [vmem:[%s11474_s5 + $0x3f0] ss:$12 sps:$4 sm:$0xff]  }
 0x57f   : > { %v8203_v8 = vld [vmem:[%s11474_s5 + $0x424] ss:$12 sps:$4 sm:$0xff]  }
 0x580   : > { %v8264_v58 = vld [vmem:[%s11476_s7 + $0x10] ss:$8 sps:$4 sm:$0xff]  }
 0x581   : > { %5803 = vmatpush1.bf16.msra.mxu1 %v8129_v24  ;;  %7548 = vmatpush3.bf16.msra.mxu0 %v8133_v39  ;;  %v4379_v24 = vmax.f32 %v4377_v25, %v4378_v37  ;;  %v8188_v39 = vld [vmem:[%s11474_s5 + $0x530] ss:$12 sps:$4 sm:$0xff]   ;;  %v8273_v25 = vld [vmem:[%s11476_s7 + $0x40] ss:$8 sps:$4 sm:$0xff]  }
 0x582   : > { %5804 = vmatprep.subr.bf16.mxu1 %v8136_v16  ;;  %7549 = vmatprep.subr.bf16.mxu0 %v8137_v49  ;;  %v8191_v16 = vld [vmem:[%s11474_s5 + $0x3c4] ss:$12 sps:$4 sm:$0xff]  }
 0x583   : > { %v4430_v49 = vsel %vm2091_vm6, %v4379_v24, %v7871_v47  ;;  %v8270_v37 = vld [vmem:[%s11476_s7 + $0x30] ss:$8 sps:$4 sm:$0xff]   ;;  %v8278_v47 = vld [vmem:[%s11476_s7 + $0x54] ss:$8 sps:$4 sm:$0xff]   ;;  %v8281_v24 = vld [vmem:[%s11476_s7 + $0x64] ss:$8 sps:$4 sm:$0xff]  }
 0x585   : > { %5805 = vmatpush1.bf16.msra.mxu1 %v8134_v28  ;;  %7550 = vmatpush3.bf16.msra.mxu0 %v8138_v4  ;;  %v8189_v28 = vld [vmem:[%s11474_s5 + $0x3c0] ss:$12 sps:$4 sm:$0xff]   ;;  %v8194_v4 = vld [vmem:[%s11474_s5 + $0x3dc] ss:$12 sps:$4 sm:$0xff]  }
 0x586   : > { %5806 = vmatprep.subr.bf16.mxu1 %v8141_v2  ;;  %7551 = vmatprep.subr.bf16.mxu0 %v8142_v59  ;;  %v11065_v2 = vpack.c.bf16 %v4430_v49, %v4430_v49  ;;  %v8192_v59 = vld [vmem:[%s11474_s5 + $0x3d8] ss:$12 sps:$4 sm:$0xff]  }
 0x589   : > { %5807 = vmatpush1.bf16.msra.mxu1 %v8139_v57  ;;  %7552 = vmatpush3.bf16.msra.mxu0 %v8143_v11  ;;  %v8200_v57 = vld [vmem:[%s11474_s5 + $0x40c] ss:$12 sps:$4 sm:$0xff]   ;;  %v8198_v11 = vld [vmem:[%s11474_s5 + $0x408] ss:$12 sps:$4 sm:$0xff]  }
 0x58a   : > { %5808 = vmatprep.subr.bf16.mxu1 %v8146_v14  ;;  %7553 = vmatprep.subr.bf16.mxu0 %v8147_v46  ;;  %v8201_v14 = vld [vmem:[%s11474_s5 + $0x420] ss:$12 sps:$4 sm:$0xff]   ;;  %v8206_v46 = vld [vmem:[%s11474_s5 + $0x43c] ss:$12 sps:$4 sm:$0xff]  }
 0x58d   : > { %5809 = vmatpush1.bf16.msra.mxu1 %v8144_v5  ;;  %7554 = vmatpush3.bf16.msra.mxu0 %v8148_v32  ;;  %v8213_v5 = vld [vmem:[%s11474_s5 + $0x480] ss:$12 sps:$4 sm:$0xff]   ;;  %v8218_v32 = vld [vmem:[%s11474_s5 + $0x49c] ss:$12 sps:$4 sm:$0xff]  }
 0x58e   : > { %5819 = vmatprep.subr.bf16.mxu1 %v8151_v1  ;;  %7561 = vmatprep.subr.bf16.mxu0 %v8152_v15  ;;  %v8221_v1 = vld [vmem:[%s11474_s5 + $0x4b4] ss:$12 sps:$4 sm:$0xff]   ;;  %v8219_v15 = vld [vmem:[%s11474_s5 + $0x4b0] ss:$12 sps:$4 sm:$0xff]  }
 0x590   : > { %5811 = vmatmul.mubr.bf16.vlgmr.msra.gmra.mrb[160].mxu1 %v10848_v43  ;;  %6014 = vmatmul.mubr.bf16.vlgmr.msra.gmra.mrb[156].mxu0 %v10958_v19  ;;  %v8173_v43 = vld [vmem:[%s11474_s5 + $0x4e8] ss:$12 sps:$4 sm:$0xff]  }
 0x591   : > { %5820 = vmatpush1.bf16.msra.mxu1 %v8149_v35  ;;  %5851 = vmatprep.mubr.bf16.mxu1 %v10857_v63  ;;  %v8174_v63 = vld [vmem:[%s11474_s5 + $0x378] ss:$12 sps:$4 sm:$0xff]  }
 0x592   : > { %7562 = vmatpush3.bf16.msra.mxu0 %v8153_v29  ;;  %6053 = vmatprep.mubr.bf16.mxu0 %v10971_v9  ;;  %v8227_v35 = vld [vmem:[%s11474_s5 + $0x4e4] ss:$12 sps:$4 sm:$0xff]  }
 0x593   : > { %5821 = vmatprep.subr.bf16.mxu1 %v8156_v40  ;;  %7563 = vmatprep.subr.bf16.mxu0 %v8157_v38  ;;  %v8228_v29 = vld [vmem:[%s11474_s5 + $0x4f8] ss:$12 sps:$4 sm:$0xff]   ;;  %v8233_v40 = vld [vmem:[%s11474_s5 + $0x514] ss:$12 sps:$4 sm:$0xff]   ;;  %v8231_v38 = vld [vmem:[%s11474_s5 + $0x510] ss:$12 sps:$4 sm:$0xff]  }
 0x595   : > { %5822 = vmatpush1.bf16.msra.mxu1 %v8154_v48  ;;  %v8234_v48 = vld [vmem:[%s11474_s5 + $0x528] ss:$12 sps:$4 sm:$0xff]  }
 0x596   : > { %7564 = vmatpush3.bf16.msra.mxu0 %v8158_v26  ;;  %5823 = vmatprep.subr.bf16.mxu1 %v8161_v61  ;;  %v8239_v26 = vld [vmem:[%s11474_s5 + $0x544] ss:$12 sps:$4 sm:$0xff]   ;;  %v8237_v61 = vld [vmem:[%s11474_s5 + $0x540] ss:$12 sps:$4 sm:$0xff]  }
 0x597   : > { %7565 = vmatprep.subr.bf16.mxu0 %v8162_v22  ;;  %v8242_v22 = vld [vmem:[%s11474_s5 + $0x55c] ss:$12 sps:$4 sm:$0xff]  }
 0x599   : > { %5824 = vmatpush1.bf16.msra.mxu1 %v8159_v27  ;;  %v8240_v27 = vld [vmem:[%s11474_s5 + $0x558] ss:$12 sps:$4 sm:$0xff]  }
 0x59a   : > { %7566 = vmatpush3.bf16.msra.mxu0 %v8163_v53  ;;  %5825 = vmatprep.subr.bf16.mxu1 %v8166_v13  ;;  %v8245_v53 = vld [vmem:[%s11474_s5 + $0x574] ss:$12 sps:$4 sm:$0xff]   ;;  %v8243_v13 = vld [vmem:[%s11474_s5 + $0x570] ss:$12 sps:$4 sm:$0xff]  }
 0x59b   : > { %7567 = vmatprep.subr.bf16.mxu0 %v8167_v33  ;;  %v8248_v33 = vld [vmem:[%s11474_s5 + $0x58c] ss:$12 sps:$4 sm:$0xff]  }
 0x59d   : > { %5826 = vmatpush1.bf16.msra.mxu1 %v8164_v31  ;;  %v8246_v31 = vld [vmem:[%s11474_s5 + $0x588] ss:$12 sps:$4 sm:$0xff]  }
 0x59e   : > { %7568 = vmatpush3.bf16.msra.mxu0 %v8168_v54  ;;  %5827 = vmatprep.subr.bf16.mxu1 %v8171_v10  ;;  %v8251_v54 = vld [vmem:[%s11474_s5 + $0x5a4] ss:$12 sps:$4 sm:$0xff]   ;;  %v8249_v10 = vld [vmem:[%s11474_s5 + $0x5a0] ss:$12 sps:$4 sm:$0xff]  }
 0x59f   : > { %7569 = vmatprep.subr.bf16.mxu0 %v8172_v44  ;;  %v8254_v44 = vld [vmem:[%s11474_s5 + $0x5bc] ss:$12 sps:$4 sm:$0xff]  }
 0x5a1   : > { %5828 = vmatpush1.bf16.msra.mxu1 %v8169_v56  ;;  %v8252_v56 = vld [vmem:[%s11474_s5 + $0x5b8] ss:$12 sps:$4 sm:$0xff]  }
 0x5a2   : > { %7570 = vmatpush3.bf16.msra.mxu0 %v8173_v43  ;;  %5829 = vmatprep.subr.bf16.mxu1 %v8176_v36  ;;  %v8257_v43 = vld [vmem:[%s11474_s5 + $0x5d4] ss:$12 sps:$4 sm:$0xff]   ;;  %v8255_v36 = vld [vmem:[%s11474_s5 + $0x5d0] ss:$12 sps:$4 sm:$0xff]  }
 0x5a3   : > { %7571 = vmatprep.subr.bf16.mxu0 %v8177_v45  ;;  %v8260_v45 = vld [vmem:[%s11474_s5 + $0x5ec] ss:$12 sps:$4 sm:$0xff]  }
 0x5a5   : > { %5830 = vmatpush1.bf16.msra.mxu1 %v8174_v63  ;;  %v8258_v63 = vld [vmem:[%s11474_s5 + $0x5e8] ss:$12 sps:$4 sm:$0xff]  }
 0x5a6   : > { %7572 = vmatpush3.bf16.msra.mxu0 %v8178_v42  ;;  %5831 = vmatprep.subr.bf16.mxu1 %v8181_v51  ;;  %v8261_v42 = vld [vmem:[%s11476_s7] ss:$8 sps:$4 sm:$0xff]   ;;  %v8263_v51 = vld [vmem:[%s11476_s7 + $0x4] ss:$8 sps:$4 sm:$0xff]  }
 0x5a7   : > { %7573 = vmatprep.subr.bf16.mxu0 %v8182_v41  ;;  %v8266_v41 = vld [vmem:[%s11476_s7 + $0x14] ss:$8 sps:$4 sm:$0xff]  }
 0x5a9   : > { %5832 = vmatpush1.bf16.msra.mxu1 %v8179_v50  ;;  %v8269_v50 = vld [vmem:[%s11476_s7 + $0x24] ss:$8 sps:$4 sm:$0xff]  }
 0x5aa   : > { %7574 = vmatpush3.bf16.msra.mxu0 %v8183_v0  ;;  %5833 = vmatprep.subr.bf16.mxu1 %v8186_v7  ;;  %v8267_v0 = vld [vmem:[%s11476_s7 + $0x20] ss:$8 sps:$4 sm:$0xff]   ;;  %v8272_v7 = vld [vmem:[%s11476_s7 + $0x34] ss:$8 sps:$4 sm:$0xff]  }
 0x5ab   : > { %7575 = vmatprep.subr.bf16.mxu0 %v8187_v23  ;;  %v8275_v23 = vld [vmem:[%s11476_s7 + $0x44] ss:$8 sps:$4 sm:$0xff]  }
 0x5ad   : > { %5834 = vmatpush1.bf16.msra.mxu1 %v8184_v12  ;;  %v8276_v12 = vld [vmem:[%s11476_s7 + $0x50] ss:$8 sps:$4 sm:$0xff]  }
 0x5ae   : > { %7576 = vmatpush3.bf16.msra.mxu0 %v8188_v39  ;;  %5835 = vmatprep.subr.bf16.mxu1 %v8191_v16  ;;  %v8279_v16 = vld [vmem:[%s11476_s7 + $0x60] ss:$8 sps:$4 sm:$0xff]  }
 0x5af   : > { %6367 = vmatprep.subr.bf16.mxu0 %v8263_v51 }
 0x5b1   : > { %6054 = vmatmul.mubr.bf16.vlgmr.msra.gmra.mrb[160].mxu0 %v11065_v2  ;;  %5836 = vmatpush1.bf16.msra.mxu1 %v8189_v28  ;;  %v8284_v28 = vld [vmem:[%s11476_s7 + $0x74] ss:$8 sps:$4 sm:$0xff]  }
 0x5b2   : > { %5837 = vmatprep.subr.bf16.mxu1 %v8194_v4  ;;  %6368 = vmatpush1.bf16.msra.mxu0 %v8261_v42 }
 0x5b3   : > { %6369 = vmatprep.subr.bf16.mxu0 %v8266_v41 }
 0x5b5   : > { %5838 = vmatpush1.bf16.msra.mxu1 %v8192_v59 }
 0x5b6   : > { %5839 = vmatprep.subr.bf16.mxu1 %v8197_v55  ;;  %6370 = vmatpush1.bf16.msra.mxu0 %v8264_v58  ;;  %v8282_v55 = vld [vmem:[%s11476_s7 + $0x70] ss:$8 sps:$4 sm:$0xff]  }
 0x5b7   : > { %6371 = vmatprep.subr.bf16.mxu0 %v8269_v50 }
 0x5b9   : > { %5840 = vmatpush1.bf16.msra.mxu1 %v8195_v30  ;;  %v8287_v30 = vld [vmem:[%s11476_s7 + $0x84] ss:$8 sps:$4 sm:$0xff]  }
 0x5ba   : > { %5841 = vmatprep.subr.bf16.mxu1 %v8200_v57  ;;  %6372 = vmatpush1.bf16.msra.mxu0 %v8267_v0  ;;  %v8285_v57 = vld [vmem:[%s11476_s7 + $0x80] ss:$8 sps:$4 sm:$0xff]  }
 0x5bb   : > { %6373 = vmatprep.subr.bf16.mxu0 %v8272_v7 }
 0x5bd   : > { %5842 = vmatpush1.bf16.msra.mxu1 %v8198_v11  ;;  %v8290_v11 = vld [vmem:[%s11476_s7 + $0x94] ss:$8 sps:$4 sm:$0xff]  }
 0x5be   : > { %5843 = vmatprep.subr.bf16.mxu1 %v8203_v8  ;;  %6374 = vmatpush1.bf16.msra.mxu0 %v8270_v37  ;;  %v8288_v8 = vld [vmem:[%s11476_s7 + $0x90] ss:$8 sps:$4 sm:$0xff]  }
 0x5bf   : > { %6375 = vmatprep.subr.bf16.mxu0 %v8275_v23 }
 0x5c1   : > { %5844 = vmatpush1.bf16.msra.mxu1 %v8201_v14  ;;  %v8293_v14 = vld [vmem:[%s11476_s7 + $0xa4] ss:$8 sps:$4 sm:$0xff]  }
 0x5c2   : > { %5845 = vmatprep.subr.bf16.mxu1 %v8206_v46  ;;  %6376 = vmatpush1.bf16.msra.mxu0 %v8273_v25  ;;  %v8291_v46 = vld [vmem:[%s11476_s7 + $0xa0] ss:$8 sps:$4 sm:$0xff]  }
 0x5c3   : > { %6377 = vmatprep.subr.bf16.mxu0 %v8278_v47 }
 0x5c5   : > { %5846 = vmatpush1.bf16.msra.mxu1 %v8204_v20  ;;  %v8296_v20 = vld [vmem:[%s11476_s7 + $0xb4] ss:$8 sps:$4 sm:$0xff]  }
 0x5c6   : > { %5847 = vmatprep.subr.bf16.mxu1 %v8209_v3  ;;  %6378 = vmatpush1.bf16.msra.mxu0 %v8276_v12  ;;  %v5722_v3 = vlaneseq  ;;  %v8309_v12 = vld [vmem:[%s11476_s7 + $0x100] ss:$8 sps:$4 sm:$0xff]  }
 0x5c7   : > { %6379 = vmatprep.subr.bf16.mxu0 %v8281_v24 }
 0x5c9   : > { %5848 = vmatpush1.bf16.msra.mxu1 %v8207_v17  ;;  %v8294_v17 = vld [vmem:[%s11476_s7 + $0xb0] ss:$8 sps:$4 sm:$0xff]  }
 0x5ca   : > { %5849 = vmatprep.subr.bf16.mxu1 %v8212_v18  ;;  %6380 = vmatpush1.bf16.msra.mxu0 %v8279_v16  ;;  %v8299_v18 = vld [vmem:[%s11476_s7 + $0xc4] ss:$8 sps:$4 sm:$0xff]   ;;  %v8312_v16 = vld [vmem:[%s11476_s7 + $0x110] ss:$8 sps:$4 sm:$0xff]  }
 0x5cb   : > { %6381 = vmatprep.subr.bf16.mxu0 %v8284_v28  ;;  %v8317_v28 = vld [vmem:[%s11476_s7 + $0x124] ss:$8 sps:$4 sm:$0xff]  }
 0x5cd   : > { %5850 = vmatpush1.bf16.msra.mxu1 %v8210_v6  ;;  %v11281_v6 = vshrl.u32 %v5722_v3, 7 }
 0x5ce   : > { %5860 = vmatprep.subr.bf16.mxu1 %v8215_v60  ;;  %6382 = vmatpush1.bf16.msra.mxu0 %v8282_v55  ;;  %v8297_v60 = vld [vmem:[%s11476_s7 + $0xc0] ss:$8 sps:$4 sm:$0xff]   ;;  %v8323_v55 = vld [vmem:[%s11476_s7 + $0x144] ss:$8 sps:$4 sm:$0xff]  }
 0x5cf   : > { %6383 = vmatprep.subr.bf16.mxu0 %v8287_v30  ;;  %v8321_v30 = vld [vmem:[%s11476_s7 + $0x140] ss:$8 sps:$4 sm:$0xff]  }
 0x5d0   : > { %5852 = vmatmul.mubr.bf16.vlgmr.msra.gmra.mrb[160].mxu1 %v10958_v19  ;;  %v8230_v19 = vld [vmem:[%s11474_s5 + $0x4fc] ss:$12 sps:$4 sm:$0xff]  }
 0x5d1   : > { %5861 = vmatpush1.bf16.msra.mxu1 %v8213_v5  ;;  %5892 = vmatprep.mubr.bf16.mxu1 %v10971_v9  ;;  %v8236_v9 = vld [vmem:[%s11474_s5 + $0x52c] ss:$12 sps:$4 sm:$0xff]   ;;  %v8302_v5 = vld [vmem:[%s11476_s7 + $0xd4] ss:$8 sps:$4 sm:$0xff]  }
 0x5d2   : > { %5862 = vmatprep.subr.bf16.mxu1 %v8218_v32  ;;  %6384 = vmatpush1.bf16.msra.mxu0 %v8285_v57  ;;  %v5732_v32 = vsub.s32 2, %v11281_v6  ;;  %v8326_v57 = vld [vmem:[%s11476_s7 + $0x154] ss:$8 sps:$4 sm:$0xff]  }
 0x5d3   : > { %6385 = vmatprep.subr.bf16.mxu0 %v8290_v11  ;;  %v8324_v11 = vld [vmem:[%s11476_s7 + $0x150] ss:$8 sps:$4 sm:$0xff]  }
 0x5d5   : > { %5863 = vmatpush1.bf16.msra.mxu1 %v8216_v21  ;;  %v4696_v21 = vld [vmem:[%s11475_s6] sm:$0x7] }
 0x5d6   : > { %5864 = vmatprep.subr.bf16.mxu1 %v8221_v1  ;;  %6386 = vmatpush1.bf16.msra.mxu0 %v8288_v8  ;;  %v8300_v1 = vld [vmem:[%s11476_s7 + $0xd0] ss:$8 sps:$4 sm:$0xff]   ;;  %v8329_v8 = vld [vmem:[%s11476_s7 + $0x164] ss:$8 sps:$4 sm:$0xff]  }
 0x5d7   : > { %6387 = vmatprep.subr.bf16.mxu0 %v8293_v14  ;;  %v8327_v14 = vld [vmem:[%s11476_s7 + $0x160] ss:$8 sps:$4 sm:$0xff]  }
 0x5d9   : > { %5865 = vmatpush1.bf16.msra.mxu1 %v8219_v15  ;;  %v5733_v15 = vrot.slane %v4696_v21, %v5732_v32  ;;  %v8336_v32 = vld [vmem:[%s11478_s9 + $0x18] sm:$0xff]  }
 0x5da   : > { %5866 = vmatprep.subr.bf16.mxu1 %v8224_v52  ;;  %6388 = vmatpush1.bf16.msra.mxu0 %v8291_v46  ;;  %v8332_v46 = vld [vmem:[%s11476_s7 + $0x174] ss:$8 sps:$4 sm:$0xff]  }
 0x5db   : > { %6389 = vmatprep.subr.bf16.mxu0 %v8296_v20  ;;  %v8330_v20 = vld [vmem:[%s11476_s7 + $0x170] ss:$8 sps:$4 sm:$0xff]  }
 0x5dd   : > { %5867 = vmatpush1.bf16.msra.mxu1 %v8222_v62 }
 0x5de   : > { %5868 = vmatprep.subr.bf16.mxu1 %v8227_v35  ;;  %6390 = vmatpush1.bf16.msra.mxu0 %v8294_v17  ;;  %v8333_v17 = vld [vmem:[%s11478_s9] sm:$0xff]  }
 0x5df   : > { %6391 = vmatprep.subr.bf16.mxu0 %v8299_v18 }
 0x5e1   : > { %5869 = vmatpush1.bf16.msra.mxu1 %v8225_v34 }
 0x5e2   : > { %5870 = vmatprep.subr.bf16.mxu1 %v8230_v19  ;;  %6392 = vmatpush1.bf16.msra.mxu0 %v8297_v60  ;;  %v8334_v60 = vld [vmem:[%s11478_s9 + $0x8] sm:$0xff]  }
 0x5e3   : > { %6393 = vmatprep.subr.bf16.mxu0 %v8302_v5  ;;  %v8335_v5 = vld [vmem:[%s11478_s9 + $0x10] sm:$0xff]  }
 0x5e5   : > { %5871 = vmatpush1.bf16.msra.mxu1 %v8228_v29 }
 0x5e6   : > { %5872 = vmatprep.subr.bf16.mxu1 %v8233_v40  ;;  %6394 = vmatpush1.bf16.msra.mxu0 %v8300_v1  ;;  %v8338_v1 = vld [vmem:[%s11478_s9 + $0x28] sm:$0xff]  }
 0x5e9   : > { %5873 = vmatpush1.bf16.msra.mxu1 %v8231_v38 }
 0x5ea   : > { %5874 = vmatprep.subr.bf16.mxu1 %v8236_v9 }
 0x5ed   : > { %5875 = vmatpush1.bf16.msra.mxu1 %v8234_v48 }
 0x5ee   : > { %5876 = vmatprep.subr.bf16.mxu1 %v8239_v26 }
 0x5f1   : > { %5877 = vmatpush1.bf16.msra.mxu1 %v8237_v61 }
 0x5f2   : > { %5878 = vmatprep.subr.bf16.mxu1 %v8242_v22 }
 0x5f5   : > { %5879 = vmatpush1.bf16.msra.mxu1 %v8240_v27  ;;  %v8303_v27 = vld [vmem:[%s11476_s7 + $0xe0] ss:$8 sps:$4 sm:$0xff]  }
 0x5f6   : > { %5880 = vmatprep.subr.bf16.mxu1 %v8245_v53  ;;  %v8305_v53 = vld [vmem:[%s11476_s7 + $0xe4] ss:$8 sps:$4 sm:$0xff]  }
 0x5f7   : > { %6395 = vmatprep.subr.bf16.mxu0 %v8305_v53 }
 0x5f8   : > { %6396 = vmatpush1.bf16.msra.mxu0 %v8303_v27 }
 0x5f9   : > { %5881 = vmatpush1.bf16.msra.mxu1 %v8243_v13  ;;  %v8308_v13 = vld [vmem:[%s11476_s7 + $0xf4] ss:$8 sps:$4 sm:$0xff]  }
 0x5fa   : > { %5882 = vmatprep.subr.bf16.mxu1 %v8248_v33  ;;  %v8306_v33 = vld [vmem:[%s11476_s7 + $0xf0] ss:$8 sps:$4 sm:$0xff]   ;;  %6397 = vmatprep.subr.bf16.mxu0 %v8308_v13 }
 0x5fc   : > { %6398 = vmatpush1.bf16.msra.mxu0 %v8306_v33 }
 0x5fd   : > { %5883 = vmatpush1.bf16.msra.mxu1 %v8246_v31  ;;  %v8311_v31 = vld [vmem:[%s11476_s7 + $0x104] ss:$8 sps:$4 sm:$0xff]  }
 0x5fe   : > { %5884 = vmatprep.subr.bf16.mxu1 %v8251_v54  ;;  %6408 = vmatprep.subr.bf16.mxu0 %v8311_v31 }
 0x601   : > { %5885 = vmatpush1.bf16.msra.mxu1 %v8249_v10 }
 0x602   : > { %5886 = vmatprep.subr.bf16.mxu1 %v8254_v44 }
 0x605   : > { %5887 = vmatpush1.bf16.msra.mxu1 %v8252_v56 }
 0x606   : > { %5888 = vmatprep.subr.bf16.mxu1 %v8257_v43 }
 0x609   : > { %5889 = vmatpush1.bf16.msra.mxu1 %v8255_v36 }
 0x60a   : > { %5890 = vmatprep.subr.bf16.mxu1 %v8260_v45  ;;  %v5724_v45 = vsub.s32 0, %v11281_v6 }
 0x60c   : > { %v5725_v42 = vrot.slane %v4696_v21, %v5724_v45 }
 0x60d   : > { %5891 = vmatpush1.bf16.msra.mxu1 %v8258_v63  ;;  %v5728_v63 = vsub.s32 1, %v11281_v6  ;;  %v6477_v6 = vld [vmem:[%s11479_s10] sm:$0x1] }
 0x60f   : > { %v5729_v51 = vrot.slane %v4696_v21, %v5728_v63  ;;  %v8337_v21 = vld [vmem:[%s11478_s9 + $0x20] sm:$0xff]  }
 0x610   : > { %5893 = vmatmul.mubr.bf16.vlgmr.msra.gmra.mrb[160].mxu1 %v11065_v2 }
 0x623   : > { %v7511_v39 = vpop.f32.mrb[148].mxu0 }
 0x624   : > { %v7512_v49 = vpop.f32.mrb[149].mxu0 }
 0x625   : > { %v7513_v4 = vadd.f32 %v7512_v49, %v7511_v39  ;;  %v7514_v2 = vpop.f32.mrb[150].mxu0  ;;  %v8314_v39 = vld [vmem:[%s11476_s7 + $0x114] ss:$8 sps:$4 sm:$0xff]   ;;  %v8428_v49 = vmov 0  }
 0x626   : > { %v7515_v59 = vpop.f32.mrb[151].mxu0  ;;  %v8320_v2 = vld [vmem:[%s11476_s7 + $0x134] ss:$8 sps:$4 sm:$0xff]  }
 0x627   : > { %v5936_v35 = vadd.f32 %v7513_v4, %v5733_v15  ;;  %v8315_v4 = vld [vmem:[%s11476_s7 + $0x120] ss:$8 sps:$4 sm:$0xff]   ;;  %v8318_v59 = vld [vmem:[%s11476_s7 + $0x130] ss:$8 sps:$4 sm:$0xff]  }
 0x628   : > { %v8339_v15 = vld [vmem:[%s11478_s9 + $0x30] sm:$0xff]  }
 0x643   : > { %v7533_v52 = vpop.f32.mrb[152].mxu0 }
 0x644   : > { %v7534_v62 = vpop.f32.mrb[153].mxu0 }
 0x645   : > { %v7535_v34 = vadd.f32 %v7534_v62, %v7533_v52  ;;  %v7536_v19 = vpop.f32.mrb[154].mxu0  ;;  %v8340_v52 = vld [vmem:[%s11478_s9 + $0x38] sm:$0xff]   ;;  %v8341_v62 = vld [vmem:[%s11478_s9 + $0x40] sm:$0xff]  }
 0x646   : > { %v7537_v29 = vpop.f32.mrb[155].mxu0  ;;  %v8344_v19 = vld [vmem:[%s11478_s9 + $0x58] sm:$0xff]  }
 0x647   : > { %v5976_v40 = vadd.f32 %v7535_v34, %v5936_v35  ;;  %v8342_v35 = vld [vmem:[%s11478_s9 + $0x48] sm:$0xff]   ;;  %v8343_v34 = vld [vmem:[%s11478_s9 + $0x50] sm:$0xff]   ;;  %v6115_v29 = vld [vmem:[%s11477_s8] sm:$0x3] }
 0x663   : > { %v7555_v38 = vpop.f32.mrb[156].mxu0 }
 0x664   : > { %v7556_v9 = vpop.f32.mrb[157].mxu0 }
 0x665   : > { %v7557_v48 = vadd.f32 %v7556_v9, %v7555_v38  ;;  %v7558_v26 = vpop.f32.mrb[158].mxu0  ;;  %v6364_v38 = vrot.slane %v6115_v29, %v5728_v63 }
 0x666   : > { %v7559_v61 = vpop.f32.mrb[159].mxu0 }
 0x667   : > { %v6016_v22 = vadd.f32 %v7557_v48, %v5976_v40  ;;  %v6360_v40 = vrot.slane %v6115_v29, %v5724_v45 }
 0x684   : > { %v7577_v54 = vpop.f32.mrb[160].mxu0 }
 0x685   : > { %v7578_v10 = vpop.f32.mrb[161].mxu0 }
 0x686   : > { %v7579_v44 = vadd.f32 %v7578_v10, %v7577_v54  ;;  %v7580_v56 = vpop.f32.mrb[162].mxu0 }
 0x687   : > { %v7581_v43 = vpop.f32.mrb[163].mxu0 }
 0x688   : > { %v6056_v36 = vadd.f32 %v7579_v44, %v6016_v22 }
 0x68a   : > { %v6063_v3 = vmax.f32 %v6056_v36, 0.0 }
 0x68c   : > { %v6066_v18 = vpack.c.bf16 %v6063_v3, %v6063_v3 }
 0x6e3   : > { %v5894_v41 = vpop.f32.mrb[160].mxu1 }
 0x6e4   : > { %v7723_v58 = vadd.f32 %v5894_v41, %v5725_v42  ;;  %v5896_v50 = vpop.f32.mrb[161].mxu1 }
 0x6e5   : > { %v7724_v0 = vadd.f32 %v5896_v50, %v5729_v51  ;;  %v5898_v7 = vpop.f32.mrb[162].mxu1 }
 0x6e6   : > { %v6061_v37 = vmax.f32 %v7723_v58, 0.0  ;;  %v5899_v23 = vpop.f32.mrb[163].mxu1 }
 0x6e7   : > { %v6062_v25 = vmax.f32 %v7724_v0, 0.0 }
 0x6e8   : > { %v6064_v24 = vpack.c.bf16 %v6061_v37, %v6061_v37 }
 0x6e9   : > { %v6065_v47 = vpack.c.bf16 %v6062_v25, %v6062_v25 }
 0x6eb   : > { %6399 = vmatprep.mubr.bf16.mxu0 %v6065_v47 }
 0x6ec   : > { %6400 = vmatmul.mubr.bf16.vlgmr.msra.gmra.mrb[164].mxu0 %v6064_v24 }
 0x6ed   : > { %6409 = vmatpush1.bf16.msra.mxu0 %v8309_v12  ;;  %6440 = vmatprep.mubr.bf16.mxu0 %v8428_v49 }
 0x6ee   : > { %6410 = vmatprep.subr.bf16.mxu0 %v8314_v39 }
 0x6f1   : > { %6411 = vmatpush1.bf16.msra.mxu0 %v8312_v16 }
 0x6f2   : > { %6412 = vmatprep.subr.bf16.mxu0 %v8317_v28 }
 0x6f5   : > { %6413 = vmatpush1.bf16.msra.mxu0 %v8315_v4 }
 0x6f6   : > { %6414 = vmatprep.subr.bf16.mxu0 %v8320_v2 }
 0x6f9   : > { %6415 = vmatpush1.bf16.msra.mxu0 %v8318_v59 }
 0x6fa   : > { %6416 = vmatprep.subr.bf16.mxu0 %v8323_v55 }
 0x6fd   : > { %6417 = vmatpush1.bf16.msra.mxu0 %v8321_v30 }
 0x6fe   : > { %6418 = vmatprep.subr.bf16.mxu0 %v8326_v57 }
 0x701   : > { %6419 = vmatpush1.bf16.msra.mxu0 %v8324_v11 }
 0x702   : > { %6420 = vmatprep.subr.bf16.mxu0 %v8329_v8 }
 0x705   : > { %6421 = vmatpush1.bf16.msra.mxu0 %v8327_v14 }
 0x706   : > { %6422 = vmatprep.subr.bf16.mxu0 %v8332_v46 }
 0x709   : > { %6423 = vmatpush1.bf16.msra.mxu0 %v8330_v20 }
 0x70a   : > { %6553 = vmatprep.subr.bf16.mxu0 %v8428_v49 }
 0x70c   : > { %6441 = vmatmul.mubr.bf16.vlgmr.msra.gmra.mrb[164].mxu0 %v6066_v18 }
 0x70d   : > { %6554 = vmatpush1.bf16.msra.mxu0 %v8333_v17 }
 0x70e   : > { %6555 = vmatprep.subr.bf16.mxu0 %v8428_v49 }
 0x711   : > { %6556 = vmatpush1.bf16.msra.mxu0 %v8334_v60 }
 0x712   : > { %6557 = vmatprep.subr.bf16.mxu0 %v8428_v49 }
 0x715   : > { %6558 = vmatpush1.bf16.msra.mxu0 %v8335_v5 }
 0x716   : > { %6559 = vmatprep.subr.bf16.mxu0 %v8428_v49 }
 0x719   : > { %6560 = vmatpush1.bf16.msra.mxu0 %v8336_v32 }
 0x71a   : > { %6561 = vmatprep.subr.bf16.mxu0 %v8428_v49 }
 0x71d   : > { %6562 = vmatpush1.bf16.msra.mxu0 %v8337_v21 }
 0x71e   : > { %6563 = vmatprep.subr.bf16.mxu0 %v8428_v49 }
 0x721   : > { %6564 = vmatpush1.bf16.msra.mxu0 %v8338_v1 }
 0x722   : > { %6565 = vmatprep.subr.bf16.mxu0 %v8428_v49 }
 0x725   : > { %6566 = vmatpush1.bf16.msra.mxu0 %v8339_v15 }
 0x726   : > { %6567 = vmatprep.subr.bf16.mxu0 %v8428_v49 }
 0x729   : > { %6568 = vmatpush1.bf16.msra.mxu0 %v8340_v52 }
 0x72a   : > { %6569 = vmatprep.subr.bf16.mxu0 %v8428_v49 }
 0x72d   : > { %6570 = vmatpush1.bf16.msra.mxu0 %v8341_v62 }
 0x72e   : > { %6571 = vmatprep.subr.bf16.mxu0 %v8428_v49 }
 0x731   : > { %6572 = vmatpush1.bf16.msra.mxu0 %v8342_v35 }
 0x732   : > { %6573 = vmatprep.subr.bf16.mxu0 %v8428_v49 }
 0x735   : > { %6574 = vmatpush1.bf16.msra.mxu0 %v8343_v34 }
 0x736   : > { %6575 = vmatprep.subr.bf16.mxu0 %v8428_v49 }
 0x739   : > { %6576 = vmatpush1.bf16.msra.mxu0 %v8344_v19 }
 0x7df   : > { %v6442_v9 = vpop.f32.mrb[164].mxu0 }
 0x7e0   : > { %v7725_v48 = vadd.f32 %v6442_v9, %v6360_v40  ;;  %v6444_v26 = vpop.f32.mrb[165].mxu0 }
 0x7e1   : > { %v7726_v61 = vadd.f32 %v6444_v26, %v6364_v38  ;;  %v6446_v22 = vpop.f32.mrb[166].mxu0 }
 0x7e2   : > { %v6449_v27 = vmax.f32 %v7725_v48, 0.0  ;;  %v6447_v53 = vpop.f32.mrb[167].mxu0 }
 0x7e3   : > { %v6450_v13 = vmax.f32 %v7726_v61, 0.0 }
 0x7e4   : > { %v6451_v31 = vpack.c.bf16 %v6449_v27, %v6449_v27 }
 0x7e5   : > { %v6452_v33 = vpack.c.bf16 %v6450_v13, %v6450_v13 }
 0x7e7   : > { %7062 = vmatprep.mubr.msk.bf16.mxu0 %vm2091_vm6, %v6452_v33 }
 0x7e8   : > { %6586 = vmatmul.mubr.bf16.vlgmr.msra.gmra.mrb[168].mxu0 %v6451_v31 }
 0x8bb   : > { %v6587_v54 = vpop.f32.mrb[168].mxu0 }
 0x8bc   : > { %v6588_v10 = vadd.f32 %v6587_v54, %v6477_v6  ;;  %v6589_v44 = vpop.f32.mrb[169].mxu0 }
 0x8bd   : > { %v6590_v56 = vpop.f32.mrb[170].mxu0 }
 0x8be   : > { %6593 = vst [vmem:[%s378_s16] sm:$0x1] %v6588_v10  ;;  %v6591_v43 = vpop.f32.mrb[171].mxu0 }
 0x8bf   : > { %8374 = shalt.err (!%p8371_p3)
}
 0x8c0   : > { %s8375_s15 = scalar_lea.hbm %s11427_s0, 16  ;;  %s8379_s25 = scalar_lea.hbm %s11480_s11, 32 }
 0x8c1   : > { %p8376_p4 = scmp.ne.s32.totalorder %s11427_s0, %s8375_s15  ;;  %p8380_p9 = scmp.lt.u32.totalorder %s11427_s0, %s11480_s11 }
 0x8c2   : > { %p8381_p10 = scmp.lt.u32.totalorder %s8379_s25, %s8375_s15  ;;  %p8383_p12 = scmp.lt.u32.totalorder %s8375_s15, %s11427_s0 }
 0x8c3   : > { %p8377_p7 = pnand %p8376_p4, %p8528_p5 }
 0x8c4   : > { %p8382_p11 = por %p8381_p10, %p8380_p9 }
 0x8c5   : > { %p8378_p8 = pneg %p8377_p7 }
 0x8c6   : > { %p8384_p13 = por %p8383_p12, %p8382_p11 }
 0x8c8   : > { %p8385_p0 = pnand %p8384_p13, %p8378_p8 }
 0x8ca   : > { %8388 = shalt.err (!%p8385_p0)
}
 0x8cb   : > { %7744 = dma.vmem_to_hbm [thread:$0]  (%p8528_p5), %s11429_s24, 16, %s11427_s0, %s6595_s12  }
 0x8cc PF: > { %p7750_p1 = scmp.ge.s32.totalorder %s8423_s20, 2  ;;  %s6619_s21 = sand.u32 1, %s8411_s17  }
 0x8cd   : > { %s6620_s29 = scalar_lea.sflag [#allocation6], %s6619_s21 }
 0x8ce   : > { %p7747_p2 = pnand %p7750_p1, %p8532_p6 }
 0x8d0   : > { %8406 = dma.done.wait (!%p7747_p2), %s6620_s29, 16  }
 0x8d1   : > { %8408 = vsyncadd (!%p7747_p2), %s6620_s29, 4294967280  ;;  %p21_p3 = scmp.ge.s32.totalorder %s8515_s23, 4   ;;  %s11592_s17 = smov %s8415_s18 }
 0x8d2   : > { %s11593_s18 = smov %s8419_s19  ;;  %s11594_s19 = smov %s8526_s26 }
 0x8d3   : > { %s11595_s20 = smov %s8515_s23  ;;  %23 = sbr.rel (!%p21_p3) target bundleno = 5 (0x5), region = 99 }
 0x8da   :  { %6624 = vsyncpa [#allocation6], 1 }
 0x8db   :  { %6626 = vsyncpa [#allocation6 + $0x1], 1 }

</bundles_post_ra>
